<compile_context>
chip_gen: v6e
topology: v6e:2x2x1
jax: 0.10.0
libtpu: 0.0.40
codegen_flags: <defaults>
</compile_context>

<pallas_src>
import numpy as np
import jax
import jax.numpy as jnp
from jax.experimental import pallas as pl
from jax.experimental.pallas import tpu as pltpu


# ----------------------------------------------------------------------------
# 1-D bilinear interpolation factors (PyTorch F.interpolate, align_corners=False)
# ----------------------------------------------------------------------------
def _bilinear_matrix_1d(out_size: int, in_size: int) -> np.ndarray:
    scale = in_size / out_size
    i = np.arange(out_size, dtype=np.float64)
    src = scale * (i + 0.5) - 0.5
    src = np.maximum(src, 0.0)  # PyTorch clamps negative source coords to 0
    i0 = np.minimum(np.floor(src).astype(np.int64), in_size - 1)
    i1 = np.minimum(i0 + 1, in_size - 1)
    lam = src - i0
    m = np.zeros((out_size, in_size), dtype=np.float64)
    m[np.arange(out_size), i0] += 1.0 - lam
    m[np.arange(out_size), i1] += lam
    return m.astype(np.float32)


def bilinear_matrix_2d(out_hw, in_hw) -> np.ndarray:
    # Dense Kronecker form; only used by the pure-JAX reference.
    mh = _bilinear_matrix_1d(out_hw[0], in_hw[0])
    mw = _bilinear_matrix_1d(out_hw[1], in_hw[1])
    return np.kron(mh, mw).astype(np.float32)


# ----------------------------------------------------------------------------
# Kernel 1: theta = W_x(x) (stride-k conv straight from NCHW x) and
#           phi   = W_g(g) + b_g (W-major layout).
# x_ref:   (1, Cx, th*k, W)      g_ref: (1, Cg, Wg, Hg)
# wx_ref:  (k, k*Ci, Cx) bf16    sel_ref: (k, W, Wh) bf16 (0/1 column select)
# theta:   (1, Ci, th, Wh) bf16  phi: (1, Ci, Wg, Hg) bf16
# ----------------------------------------------------------------------------
def _proj_kernel(x_ref, g_ref, wx_ref, wg_ref, bg_ref, sel_ref, theta_ref, phi_ref):
    k = sel_ref.shape[0]
    ci = theta_ref.shape[1]
    th = theta_ref.shape[2]

    w_taps = [wx_ref[dh] for dh in range(k)]      # each (k*Ci, Cx), bf16
    sels = [sel_ref[dw] for dw in range(k)]       # each (W, Wh),   bf16

    for r in range(th):
        acc = None
        for dh in range(k):
            # One contiguous input row of x feeds output row r for tap-row dh.
            x_row = x_ref[0, :, r * k + dh, :].astype(w_taps[0].dtype)    # (Cx, W)
            u = jnp.dot(w_taps[dh], x_row,
                        preferred_element_type=jnp.float32)               # (k*Ci, W)
            u = u.astype(sels[0].dtype)
            for dw in range(k):
                part = jnp.dot(u[dw * ci:(dw + 1) * ci], sels[dw],
                               preferred_element_type=jnp.float32)         # (Ci, Wh)
                acc = part if acc is None else acc + part
        theta_ref[0, :, r, :] = acc.astype(theta_ref.dtype)

    @pl.when(pl.program_id(1) == 0)
    def _():
        wg = wg_ref[...]
        bg = bg_ref[...]
        for w in range(phi_ref.shape[2]):                                  # Wg rows
            g_row = g_ref[0, :, w, :]                                      # (Cg, Hg)
            phi_row = jnp.dot(wg, g_row, preferred_element_type=jnp.float32) + bg
            phi_ref[0, :, w, :] = phi_row.astype(phi_ref.dtype)


# ----------------------------------------------------------------------------
# Kernel 2: coarse gate + upsampling of the gate to full resolution.
#   phi_up = separable bilinear resize of phi (two consolidated 2-D matmuls)
#   q      = sum_ci psi_w[ci] * relu(theta + phi_up)[ci] + psi_b
#   alpha  = Mh_f @ sigmoid(q) @ Mw_f^T
# ----------------------------------------------------------------------------
def _gate_kernel(theta_ref, phit_ref, mhct_ref, mwct_ref, mhf_ref, mwft_ref,
                 psiw_ref, psib_ref, alpha_ref):
    ci = theta_ref.shape[1]
    hh = theta_ref.shape[2]
    wh = theta_ref.shape[3]
    wg = phit_ref.shape[2]
    hg = phit_ref.shape[3]

    phit = phit_ref[0].astype(jnp.float32)                        # (Ci, Wg, Hg)
    # 1) H-resize (Hg -> Hh): one (Ci*Wg, Hg) x (Hg, Hh) MXU matmul.
    a = jnp.dot(phit.reshape(ci * wg, hg), mhct_ref[...],
                preferred_element_type=jnp.float32)               # (Ci*Wg, Hh)
    a = jnp.swapaxes(a.reshape(ci, wg, hh), 1, 2)                 # (Ci, Hh, Wg)
    # 2) W-resize (Wg -> Wh): one (Ci*Hh, Wg) x (Wg, Wh) MXU matmul.
    phi_up = jnp.dot(a.reshape(ci * hh, wg), mwct_ref[...],
                     preferred_element_type=jnp.float32).reshape(ci, hh, wh)

    f = jnp.maximum(theta_ref[0].astype(jnp.float32) + phi_up, 0.0)
    # psi: 1x1 conv to a single channel == weighted reduce over Ci on the VPU.
    q = jnp.sum(f * psiw_ref[...], axis=0) + psib_ref[...]        # (Hh, Wh)
    sig = pl.reciprocal(1.0 + jnp.exp(-q), approx=True)           # EUP sigmoid

    # Separable bilinear upsample of the gate back to the input spatial grid.
    t = jnp.dot(sig, mwft_ref[...], preferred_element_type=jnp.float32)     # (Hh, W)
    alpha_ref[0] = jnp.dot(mhf_ref[...], t,
                           preferred_element_type=jnp.float32).astype(alpha_ref.dtype)


# ----------------------------------------------------------------------------
# Kernel 3: out = alpha * (W_out @ x) + b_out, native NCHW layout, row tiles.
# ----------------------------------------------------------------------------
def _output_kernel(x_ref, a_ref, wout_ref, bout_ref, out_ref):
    rows = x_ref.shape[2]
    wout = wout_ref[...]                  # (Cx, Cx) bf16
    bout = bout_ref[...]                  # (Cx, 1)  f32
    for r in range(rows):
        xr = x_ref[0, :, r, :].astype(wout.dtype)                            # (Cx, W)
        y = jnp.dot(wout, xr, preferred_element_type=jnp.float32)            # (Cx, W)
        a = a_ref[0, pl.ds(r, 1), :].astype(jnp.float32)                     # (1, W)
        out_ref[0, :, r, :] = (a * y + bout).astype(out_ref.dtype)


# ----------------------------------------------------------------------------
# Row-tile picker: returns either the full row count (always a legal block) or
# a multiple of 16 (legal second-minor block dim for f32 and bf16 operands).
# Grid uses pl.cdiv, so non-dividing tiles are handled by ragged last blocks.
# ----------------------------------------------------------------------------
def _pick_rows(total_rows, row_bytes, budget_bytes, max_rows):
    if total_rows <= 16:
        return total_rows
    r = max(16, min(max_rows, budget_bytes // max(row_bytes, 1)))
    r = (r // 16) * 16
    return total_rows if r >= total_rows else r


# ----------------------------------------------------------------------------
# Wrapper: NCHW in / NCHW out.
# ----------------------------------------------------------------------------
def attention_gate(x_nchw, g_nchw, params, subsample: int = 2):
    B, Cx, H, W = x_nchw.shape
    _, Cg, Hg, Wg = g_nchw.shape
    k = int(subsample)
    assert H % k == 0 and W % k == 0, \
        "spatial dims must be divisible by subsample_factor"
    Hh, Wh = H // k, W // k
    Ci = params["wg_w"].shape[0]
    dt = x_nchw.dtype
    itemsize = np.dtype(x_nchw.dtype).itemsize

    # ---- generation-aware budgets (128 MiB VMEM on v5e/v6e, 64 MiB on v7x) ----
    try:
        info = pltpu.get_tpu_info()
        vmem_cap = int(getattr(info, "vmem_capacity_bytes", 128 * 1024 * 1024))
    except Exception:
        vmem_cap = 64 * 1024 * 1024
    big_vmem = vmem_cap >= 100 * 1024 * 1024
    block_budget = (4 if big_vmem else 2) * 1024 * 1024
    vmem_limit = (64 if big_vmem else 32) * 1024 * 1024

    # ---- tiny host-side prep (O(weights) / O(|g|) only; no |x|-sized work) ----
    wx2 = (params["wx_w"].transpose(2, 3, 0, 1)
           .reshape(k, k * Ci, Cx)).astype(jnp.bfloat16)       # [dh, dw*Ci+ci, cx]
    wg = params["wg_w"].reshape(Ci, Cg).astype(jnp.float32)
    bg = params["wg_b"].reshape(Ci, 1).astype(jnp.float32)
    psiw = params["psi_w"].reshape(Ci, 1, 1).astype(jnp.float32)
    psib = params["psi_b"].reshape(1, 1).astype(jnp.float32)
    wout = params["wout_w"].reshape(Cx, Cx).astype(jnp.bfloat16)
    bout = params["wout_b"].reshape(Cx, 1).astype(jnp.float32)

    sel_np = np.zeros((k, W, Wh), np.float32)                  # column deinterleave
    for dw in range(k):
        sel_np[dw, np.arange(Wh) * k + dw, np.arange(Wh)] = 1.0
    sel = jnp.asarray(sel_np, jnp.bfloat16)

    mhct = jnp.asarray(_bilinear_matrix_1d(Hh, Hg).T)          # (Hg, Hh)
    mwct = jnp.asarray(_bilinear_matrix_1d(Wh, Wg).T)          # (Wg, Wh)
    mhf = jnp.asarray(_bilinear_matrix_1d(H, Hh))              # (H, Hh)
    mwft = jnp.asarray(_bilinear_matrix_1d(W, Wh).T)           # (Wh, W)

    # W-major gating signal so both bilinear resizes are lane contractions.
    g_t = jnp.transpose(g_nchw, (0, 1, 3, 2)).astype(jnp.float32)   # (B, Cg, Wg, Hg)

    # ---- K1: theta (stride-k conv from native NCHW x) and phi ---------------
    th = _pick_rows(Hh, Cx * k * W * 4, block_budget, max_rows=16)
    nt1 = pl.cdiv(Hh, th)
    flops_k1 = int(2 * B * Hh * k * k * Ci * Wh * (Cx + W)
                   + 2 * B * Ci * Cg * Hg * Wg)
    bytes_k1 = int(B * Cx * H * W * itemsize + 4 * B * Cg * Hg * Wg
                   + 2 * B * Ci * (Hh * Wh + Wg * Hg)
                   + 2 * (wx2.size + sel.size) + 4 * (wg.size + bg.size))
    ce1 = pl.CostEstimate(flops=flops_k1, transcendentals=0, bytes_accessed=bytes_k1)

    theta, phi_t = pl.pallas_call(
        _proj_kernel,
        out_shape=(jax.ShapeDtypeStruct((B, Ci, Hh, Wh), jnp.bfloat16),
                   jax.ShapeDtypeStruct((B, Ci, Wg, Hg), jnp.bfloat16)),
        grid=(B, nt1),
        in_specs=[
            pl.BlockSpec((1, Cx, th * k, W), lambda b, t: (b, 0, t, 0)),
            pl.BlockSpec((1, Cg, Wg, Hg), lambda b, t: (b, 0, 0, 0)),
            pl.BlockSpec((k, k * Ci, Cx), lambda b, t: (0, 0, 0)),
            pl.BlockSpec((Ci, Cg), lambda b, t: (0, 0)),
            pl.BlockSpec((Ci, 1), lambda b, t: (0, 0)),
            pl.BlockSpec((k, W, Wh), lambda b, t: (0, 0, 0)),
        ],
        out_specs=(pl.BlockSpec((1, Ci, th, Wh), lambda b, t: (b, 0, t, 0)),
                   pl.BlockSpec((1, Ci, Wg, Hg), lambda b, t: (b, 0, 0, 0))),
        compiler_params=pltpu.CompilerParams(
            dimension_semantics=("parallel", "arbitrary"),
            vmem_limit_bytes=vmem_limit),
        cost_estimate=ce1,
    )(x_nchw, g_t, wx2, wg, bg, sel)

    # ---- K2: coarse gate + separable upsample of alpha ----------------------
    flops_k2 = int(2 * B * (Ci * Wg * Hg * Hh + Ci * Hh * Wg * Wh + 3 * Ci * Hh * Wh
                            + Hh * Wh * W + H * Hh * W))
    bytes_k2 = int(2 * B * (Ci * Hh * Wh + Ci * Wg * Hg + H * W)
                   + 4 * (Hg * Hh + Wg * Wh + H * Hh + Wh * W + Ci + 1))
    ce2 = pl.CostEstimate(flops=flops_k2, transcendentals=int(B * Hh * Wh),
                          bytes_accessed=bytes_k2)

    alpha = pl.pallas_call(
        _gate_kernel,
        out_shape=jax.ShapeDtypeStruct((B, H, W), jnp.bfloat16),
        grid=(B,),
        in_specs=[
            pl.BlockSpec((1, Ci, Hh, Wh), lambda b: (b, 0, 0, 0)),
            pl.BlockSpec((1, Ci, Wg, Hg), lambda b: (b, 0, 0, 0)),
            pl.BlockSpec((Hg, Hh), lambda b: (0, 0)),
            pl.BlockSpec((Wg, Wh), lambda b: (0, 0)),
            pl.BlockSpec((H, Hh), lambda b: (0, 0)),
            pl.BlockSpec((Wh, W), lambda b: (0, 0)),
            pl.BlockSpec((Ci, 1, 1), lambda b: (0, 0, 0)),
            pl.BlockSpec((1, 1), lambda b: (0, 0)),
        ],
        out_specs=pl.BlockSpec((1, H, W), lambda b: (b, 0, 0)),
        compiler_params=pltpu.CompilerParams(
            dimension_semantics=("parallel",),
            vmem_limit_bytes=vmem_limit),
        cost_estimate=ce2,
    )(theta, phi_t, mhct, mwct, mhf, mwft, psiw, psib)

    # ---- K3: out = alpha * (W_out @ x) + b_out, native NCHW row tiles --------
    rows3 = _pick_rows(H, 2 * Cx * W * 4, block_budget, max_rows=32)
    nt3 = pl.cdiv(H, rows3)
    flops_k3 = int(2 * B * Cx * Cx * H * W + 3 * B * Cx * H * W)
    bytes_k3 = int(2 * B * Cx * H * W * itemsize + 2 * B * H * W
                   + 2 * Cx * Cx + 4 * Cx)
    ce3 = pl.CostEstimate(flops=flops_k3, transcendentals=0, bytes_accessed=bytes_k3)

    out = pl.pallas_call(
        _output_kernel,
        out_shape=jax.ShapeDtypeStruct((B, Cx, H, W), dt),
        grid=(B, nt3),
        in_specs=[
            pl.BlockSpec((1, Cx, rows3, W), lambda b, t: (b, 0, t, 0)),
            pl.BlockSpec((1, rows3, W), lambda b, t: (b, t, 0)),
            pl.BlockSpec((Cx, Cx), lambda b, t: (0, 0)),
            pl.BlockSpec((Cx, 1), lambda b, t: (0, 0)),
        ],
        out_specs=pl.BlockSpec((1, Cx, rows3, W), lambda b, t: (b, 0, t, 0)),
        compiler_params=pltpu.CompilerParams(
            dimension_semantics=("parallel", "parallel"),
            vmem_limit_bytes=vmem_limit),
        cost_estimate=ce3,
    )(x_nchw, alpha, wout, bout)

    return out


# ----------------------------------------------------------------------------
# Pure-JAX reference (lax.conv + dense bilinear) used to verify the kernels.
# ----------------------------------------------------------------------------
def attention_gate_reference(x, g, params, subsample: int = 2):
    k = subsample
    B, Cx, H, W = x.shape
    Hh, Wh = H // k, W // k
    Hg, Wg = g.shape[2], g.shape[3]
    dn = ("NCHW", "OIHW", "NCHW")

    theta = jax.lax.conv_general_dilated(x, params["wx_w"], (k, k), "VALID",
                                         dimension_numbers=dn)
    phi = jax.lax.conv_general_dilated(g, params["wg_w"], (1, 1), "VALID",
                                       dimension_numbers=dn)
    phi = phi + params["wg_b"][None, :, None, None]

    ag = jnp.asarray(bilinear_matrix_2d((Hh, Wh), (Hg, Wg)), jnp.float32)
    phi_up = jnp.einsum("pq,bcq->bcp", ag,
                        phi.reshape(B, -1, Hg * Wg)).reshape(B, -1, Hh, Wh)

    f = jax.nn.relu(theta + phi_up)
    q = jax.lax.conv_general_dilated(f, params["psi_w"], (1, 1), "VALID",
                                     dimension_numbers=dn)
    q = q + params["psi_b"][None, :, None, None]
    sig = jax.nn.sigmoid(q)

    aq = jnp.asarray(bilinear_matrix_2d((H, W), (Hh, Wh)), jnp.float32)
    alpha = jnp.einsum("pq,bcq->bcp", aq,
                       sig.reshape(B, 1, Hh * Wh)).reshape(B, 1, H, W)

    xhat = alpha * x
    out = jax.lax.conv_general_dilated(xhat, params["wout_w"], (1, 1), "VALID",
                                       dimension_numbers=dn)
    return out + params["wout_b"][None, :, None, None]


if __name__ == "__main__":
    key = jax.random.PRNGKey(0)
    B, Cx, Cg, Ci = 2, 4, 4, 4
    H = W = 16
    Hg = Wg = 6          # non-trivial bilinear resize of phi_g (6x6 -> 8x8)
    k = 2

    keys = jax.random.split(key, 9)
    x = jax.random.normal(keys[0], (B, Cx, H, W), jnp.float32)
    g = jax.random.normal(keys[1], (B, Cg, Hg, Wg), jnp.float32)

    # Deterministic synthetic parameters (shapes match the PyTorch module).
    params = {
        "wx_w":   0.3 * jax.random.normal(keys[2], (Ci, Cx, k, k), jnp.float32),
        "wg_w":   0.3 * jax.random.normal(keys[3], (Ci, Cg, 1, 1), jnp.float32),
        "wg_b":   0.1 * jax.random.normal(keys[4], (Ci,), jnp.float32),
        "psi_w":  0.3 * jax.random.normal(keys[5], (1, Ci, 1, 1), jnp.float32),
        "psi_b":  0.1 * jax.random.normal(keys[6], (1,), jnp.float32),
        "wout_w": 0.3 * jax.random.normal(keys[7], (Cx, Cx, 1, 1), jnp.float32),
        "wout_b": 0.1 * jax.random.normal(keys[8], (Cx,), jnp.float32),
    }

    out = attention_gate(x, g, params, subsample=k)
    out = jax.block_until_ready(out)

    ref = attention_gate_reference(x, g, params, subsample=k)
    # bf16 intermediates (theta / phi / alpha) -> relaxed tolerance vs f32 ref.
    np.testing.assert_allclose(np.asarray(out), np.asarray(ref),
                               rtol=2e-2, atol=2e-2)
    print("KERNEL_OK")
</pallas_src>

<mosaic_0001>
module attributes {stable_mosaic.version = 11 : i64} {
  func.func @_proj_kernel(%arg0: i32, %arg1: i32, %arg2: memref<1x4x16x16xf32, #tpu.memory_space<vmem>>, %arg3: memref<1x4x6x6xf32, #tpu.memory_space<vmem>>, %arg4: memref<2x8x4xbf16, #tpu.memory_space<vmem>>, %arg5: memref<4x4xf32, #tpu.memory_space<vmem>>, %arg6: memref<4x1xf32, #tpu.memory_space<vmem>>, %arg7: memref<2x16x8xbf16, #tpu.memory_space<vmem>>, %arg8: memref<1x4x8x8xbf16, #tpu.memory_space<vmem>>, %arg9: memref<1x4x6x6xbf16, #tpu.memory_space<vmem>>) attributes {dimension_semantics = [#tpu.dimension_semantics<parallel>, #tpu.dimension_semantics<arbitrary>], iteration_bounds = array<i64: 2, 1>, scalar_prefetch = 0 : i64, scratch_operands = 0 : i64, tpu.core_type = #tpu.core_type<tc>, window_params = [{transform_indices = @transform_0, window_bounds = array<i64: 1, 4, 16, 16>}, {transform_indices = @transform_1, window_bounds = array<i64: 1, 4, 6, 6>}, {pipeline_mode = #tpu.pipeline_mode<synchronous>, transform_indices = @transform_2, window_bounds = array<i64: 2, 8, 4>}, {pipeline_mode = #tpu.pipeline_mode<synchronous>, transform_indices = @transform_3, window_bounds = array<i64: 4, 4>}, {pipeline_mode = #tpu.pipeline_mode<synchronous>, transform_indices = @transform_4, window_bounds = array<i64: 4, 1>}, {pipeline_mode = #tpu.pipeline_mode<synchronous>, transform_indices = @transform_5, window_bounds = array<i64: 2, 16, 8>}, {transform_indices = @transform_6, window_bounds = array<i64: 1, 4, 8, 8>}, {transform_indices = @transform_7, window_bounds = array<i64: 1, 4, 6, 6>}]} {
    %c0 = arith.constant 0 : index
    %c0_0 = arith.constant 0 : index
    %c0_1 = arith.constant 0 : index
    %0 = vector.load %arg4[%c0, %c0_0, %c0_1] : memref<2x8x4xbf16, #tpu.memory_space<vmem>>, vector<1x8x4xbf16>
    %1 = vector.shape_cast %0 : vector<1x8x4xbf16> to vector<8x4xbf16>
    %c1 = arith.constant 1 : index
    %c0_2 = arith.constant 0 : index
    %c0_3 = arith.constant 0 : index
    %2 = vector.load %arg4[%c1, %c0_2, %c0_3] : memref<2x8x4xbf16, #tpu.memory_space<vmem>>, vector<1x8x4xbf16>
    %3 = vector.shape_cast %2 : vector<1x8x4xbf16> to vector<8x4xbf16>
    %c0_4 = arith.constant 0 : index
    %c0_5 = arith.constant 0 : index
    %c0_6 = arith.constant 0 : index
    %4 = vector.load %arg7[%c0_4, %c0_5, %c0_6] : memref<2x16x8xbf16, #tpu.memory_space<vmem>>, vector<1x16x8xbf16>
    %5 = vector.shape_cast %4 : vector<1x16x8xbf16> to vector<16x8xbf16>
    %c1_7 = arith.constant 1 : index
    %c0_8 = arith.constant 0 : index
    %c0_9 = arith.constant 0 : index
    %6 = vector.load %arg7[%c1_7, %c0_8, %c0_9] : memref<2x16x8xbf16, #tpu.memory_space<vmem>>, vector<1x16x8xbf16>
    %7 = vector.shape_cast %6 : vector<1x16x8xbf16> to vector<16x8xbf16>
    %c0_10 = arith.constant 0 : index
    %c0_11 = arith.constant 0 : index
    %c0_12 = arith.constant 0 : index
    %c0_13 = arith.constant 0 : index
    %8 = vector.load %arg2[%c0_10, %c0_11, %c0_12, %c0_13] : memref<1x4x16x16xf32, #tpu.memory_space<vmem>>, vector<1x4x1x16xf32>
    %9 = vector.shape_cast %8 : vector<1x4x1x16xf32> to vector<4x16xf32>
    %10 = arith.truncf %9 : vector<4x16xf32> to vector<4x16xbf16>
    %cst = arith.constant dense<0.000000e+00> : vector<8x16xf32>
    %11 = tpu.matmul %1, %10, %cst {dimension_numbers = #tpu.dot_dimension_numbers<[1], [0], [0], [1], [0, 0, 1, 1], [], []>} : vector<8x4xbf16>, vector<4x16xbf16>, vector<8x16xf32> -> vector<8x16xf32>
    %12 = arith.truncf %11 : vector<8x16xf32> to vector<8x16xbf16>
    %13 = vector.extract_strided_slice %12 {offsets = [0, 0], sizes = [4, 16], strides = [1, 1]} : vector<8x16xbf16> to vector<4x16xbf16>
    %cst_14 = arith.constant dense<0.000000e+00> : vector<4x8xf32>
    %14 = tpu.matmul %13, %5, %cst_14 {dimension_numbers = #tpu.dot_dimension_numbers<[1], [0], [0], [1], [0, 0, 1, 1], [], []>} : vector<4x16xbf16>, vector<16x8xbf16>, vector<4x8xf32> -> vector<4x8xf32>
    %15 = vector.extract_strided_slice %12 {offsets = [4, 0], sizes = [4, 16], strides = [1, 1]} : vector<8x16xbf16> to vector<4x16xbf16>
    %cst_15 = arith.constant dense<0.000000e+00> : vector<4x8xf32>
    %16 = tpu.matmul %15, %7, %cst_15 {dimension_numbers = #tpu.dot_dimension_numbers<[1], [0], [0], [1], [0, 0, 1, 1], [], []>} : vector<4x16xbf16>, vector<16x8xbf16>, vector<4x8xf32> -> vector<4x8xf32>
    %17 = arith.addf %14, %16 : vector<4x8xf32>
    %c0_16 = arith.constant 0 : index
    %c0_17 = arith.constant 0 : index
    %c1_18 = arith.constant 1 : index
    %c0_19 = arith.constant 0 : index
    %18 = vector.load %arg2[%c0_16, %c0_17, %c1_18, %c0_19] : memref<1x4x16x16xf32, #tpu.memory_space<vmem>>, vector<1x4x1x16xf32>
    %19 = vector.shape_cast %18 : vector<1x4x1x16xf32> to vector<4x16xf32>
    %20 = arith.truncf %19 : vector<4x16xf32> to vector<4x16xbf16>
    %cst_20 = arith.constant dense<0.000000e+00> : vector<8x16xf32>
    %21 = tpu.matmul %3, %20, %cst_20 {dimension_numbers = #tpu.dot_dimension_numbers<[1], [0], [0], [1], [0, 0, 1, 1], [], []>} : vector<8x4xbf16>, vector<4x16xbf16>, vector<8x16xf32> -> vector<8x16xf32>
    %22 = arith.truncf %21 : vector<8x16xf32> to vector<8x16xbf16>
    %23 = vector.extract_strided_slice %22 {offsets = [0, 0], sizes = [4, 16], strides = [1, 1]} : vector<8x16xbf16> to vector<4x16xbf16>
    %cst_21 = arith.constant dense<0.000000e+00> : vector<4x8xf32>
    %24 = tpu.matmul %23, %5, %cst_21 {dimension_numbers = #tpu.dot_dimension_numbers<[1], [0], [0], [1], [0, 0, 1, 1], [], []>} : vector<4x16xbf16>, vector<16x8xbf16>, vector<4x8xf32> -> vector<4x8xf32>
    %25 = arith.addf %17, %24 : vector<4x8xf32>
    %26 = vector.extract_strided_slice %22 {offsets = [4, 0], sizes = [4, 16], strides = [1, 1]} : vector<8x16xbf16> to vector<4x16xbf16>
    %cst_22 = arith.constant dense<0.000000e+00> : vector<4x8xf32>
    %27 = tpu.matmul %26, %7, %cst_22 {dimension_numbers = #tpu.dot_dimension_numbers<[1], [0], [0], [1], [0, 0, 1, 1], [], []>} : vector<4x16xbf16>, vector<16x8xbf16>, vector<4x8xf32> -> vector<4x8xf32>
    %28 = arith.addf %25, %27 : vector<4x8xf32>
    %29 = arith.truncf %28 : vector<4x8xf32> to vector<4x8xbf16>
    %c0_23 = arith.constant 0 : index
    %c0_24 = arith.constant 0 : index
    %c0_25 = arith.constant 0 : index
    %c0_26 = arith.constant 0 : index
    %30 = vector.load %arg8[%c0_23, %c0_24, %c0_25, %c0_26] : memref<1x4x8x8xbf16, #tpu.memory_space<vmem>>, vector<1x4x1x8xbf16>
    %31 = vector.shape_cast %30 : vector<1x4x1x8xbf16> to vector<4x8xbf16>
    %32 = vector.shape_cast %29 : vector<4x8xbf16> to vector<1x4x1x8xbf16>
    tpu.vector_store %arg8[%c0_23, %c0_24, %c0_25, %c0_26], %32 {strides = array<i32>} : memref<1x4x8x8xbf16, #tpu.memory_space<vmem>>, vector<1x4x1x8xbf16>,
    %c0_27 = arith.constant 0 : index
    %c0_28 = arith.constant 0 : index
    %c2 = arith.constant 2 : index
    %c0_29 = arith.constant 0 : index
    %33 = vector.load %arg2[%c0_27, %c0_28, %c2, %c0_29] : memref<1x4x16x16xf32, #tpu.memory_space<vmem>>, vector<1x4x1x16xf32>
    %34 = vector.shape_cast %33 : vector<1x4x1x16xf32> to vector<4x16xf32>
    %35 = arith.truncf %34 : vector<4x16xf32> to vector<4x16xbf16>
    %cst_30 = arith.constant dense<0.000000e+00> : vector<8x16xf32>
    %36 = tpu.matmul %1, %35, %cst_30 {dimension_numbers = #tpu.dot_dimension_numbers<[1], [0], [0], [1], [0, 0, 1, 1], [], []>} : vector<8x4xbf16>, vector<4x16xbf16>, vector<8x16xf32> -> vector<8x16xf32>
    %37 = arith.truncf %36 : vector<8x16xf32> to vector<8x16xbf16>
    %38 = vector.extract_strided_slice %37 {offsets = [0, 0], sizes = [4, 16], strides = [1, 1]} : vector<8x16xbf16> to vector<4x16xbf16>
    %cst_31 = arith.constant dense<0.000000e+00> : vector<4x8xf32>
    %39 = tpu.matmul %38, %5, %cst_31 {dimension_numbers = #tpu.dot_dimension_numbers<[1], [0], [0], [1], [0, 0, 1, 1], [], []>} : vector<4x16xbf16>, vector<16x8xbf16>, vector<4x8xf32> -> vector<4x8xf32>
    %40 = vector.extract_strided_slice %37 {offsets = [4, 0], sizes = [4, 16], strides = [1, 1]} : vector<8x16xbf16> to vector<4x16xbf16>
    %cst_32 = arith.constant dense<0.000000e+00> : vector<4x8xf32>
    %41 = tpu.matmul %40, %7, %cst_32 {dimension_numbers = #tpu.dot_dimension_numbers<[1], [0], [0], [1], [0, 0, 1, 1], [], []>} : vector<4x16xbf16>, vector<16x8xbf16>, vector<4x8xf32> -> vector<4x8xf32>
    %42 = arith.addf %39, %41 : vector<4x8xf32>
    %c0_33 = arith.constant 0 : index
    %c0_34 = arith.constant 0 : index
    %c3 = arith.constant 3 : index
    %c0_35 = arith.constant 0 : index
    %43 = vector.load %arg2[%c0_33, %c0_34, %c3, %c0_35] : memref<1x4x16x16xf32, #tpu.memory_space<vmem>>, vector<1x4x1x16xf32>
    %44 = vector.shape_cast %43 : vector<1x4x1x16xf32> to vector<4x16xf32>
    %45 = arith.truncf %44 : vector<4x16xf32> to vector<4x16xbf16>
    %cst_36 = arith.constant dense<0.000000e+00> : vector<8x16xf32>
    %46 = tpu.matmul %3, %45, %cst_36 {dimension_numbers = #tpu.dot_dimension_numbers<[1], [0], [0], [1], [0, 0, 1, 1], [], []>} : vector<8x4xbf16>, vector<4x16xbf16>, vector<8x16xf32> -> vector<8x16xf32>
    %47 = arith.truncf %46 : vector<8x16xf32> to vector<8x16xbf16>
    %48 = vector.extract_strided_slice %47 {offsets = [0, 0], sizes = [4, 16], strides = [1, 1]} : vector<8x16xbf16> to vector<4x16xbf16>
    %cst_37 = arith.constant dense<0.000000e+00> : vector<4x8xf32>
    %49 = tpu.matmul %48, %5, %cst_37 {dimension_numbers = #tpu.dot_dimension_numbers<[1], [0], [0], [1], [0, 0, 1, 1], [], []>} : vector<4x16xbf16>, vector<16x8xbf16>, vector<4x8xf32> -> vector<4x8xf32>
    %50 = arith.addf %42, %49 : vector<4x8xf32>
    %51 = vector.extract_strided_slice %47 {offsets = [4, 0], sizes = [4, 16], strides = [1, 1]} : vector<8x16xbf16> to vector<4x16xbf16>
    %cst_38 = arith.constant dense<0.000000e+00> : vector<4x8xf32>
    %52 = tpu.matmul %51, %7, %cst_38 {dimension_numbers = #tpu.dot_dimension_numbers<[1], [0], [0], [1], [0, 0, 1, 1], [], []>} : vector<4x16xbf16>, vector<16x8xbf16>, vector<4x8xf32> -> vector<4x8xf32>
    %53 = arith.addf %50, %52 : vector<4x8xf32>
    %54 = arith.truncf %53 : vector<4x8xf32> to vector<4x8xbf16>
    %c0_39 = arith.constant 0 : index
    %c0_40 = arith.constant 0 : index
    %c1_41 = arith.constant 1 : index
    %c0_42 = arith.constant 0 : index
    %55 = vector.load %arg8[%c0_39, %c0_40, %c1_41, %c0_42] : memref<1x4x8x8xbf16, #tpu.memory_space<vmem>>, vector<1x4x1x8xbf16>
    %56 = vector.shape_cast %55 : vector<1x4x1x8xbf16> to vector<4x8xbf16>
    %57 = vector.shape_cast %54 : vector<4x8xbf16> to vector<1x4x1x8xbf16>
    tpu.vector_store %arg8[%c0_39, %c0_40, %c1_41, %c0_42], %57 {strides = array<i32>} : memref<1x4x8x8xbf16, #tpu.memory_space<vmem>>, vector<1x4x1x8xbf16>,
    %c0_43 = arith.constant 0 : index
    %c0_44 = arith.constant 0 : index
    %c4 = arith.constant 4 : index
    %c0_45 = arith.constant 0 : index
    %58 = vector.load %arg2[%c0_43, %c0_44, %c4, %c0_45] : memref<1x4x16x16xf32, #tpu.memory_space<vmem>>, vector<1x4x1x16xf32>
    %59 = vector.shape_cast %58 : vector<1x4x1x16xf32> to vector<4x16xf32>
    %60 = arith.truncf %59 : vector<4x16xf32> to vector<4x16xbf16>
    %cst_46 = arith.constant dense<0.000000e+00> : vector<8x16xf32>
    %61 = tpu.matmul %1, %60, %cst_46 {dimension_numbers = #tpu.dot_dimension_numbers<[1], [0], [0], [1], [0, 0, 1, 1], [], []>} : vector<8x4xbf16>, vector<4x16xbf16>, vector<8x16xf32> -> vector<8x16xf32>
    %62 = arith.truncf %61 : vector<8x16xf32> to vector<8x16xbf16>
    %63 = vector.extract_strided_slice %62 {offsets = [0, 0], sizes = [4, 16], strides = [1, 1]} : vector<8x16xbf16> to vector<4x16xbf16>
    %cst_47 = arith.constant dense<0.000000e+00> : vector<4x8xf32>
    %64 = tpu.matmul %63, %5, %cst_47 {dimension_numbers = #tpu.dot_dimension_numbers<[1], [0], [0], [1], [0, 0, 1, 1], [], []>} : vector<4x16xbf16>, vector<16x8xbf16>, vector<4x8xf32> -> vector<4x8xf32>
    %65 = vector.extract_strided_slice %62 {offsets = [4, 0], sizes = [4, 16], strides = [1, 1]} : vector<8x16xbf16> to vector<4x16xbf16>
    %cst_48 = arith.constant dense<0.000000e+00> : vector<4x8xf32>
    %66 = tpu.matmul %65, %7, %cst_48 {dimension_numbers = #tpu.dot_dimension_numbers<[1], [0], [0], [1], [0, 0, 1, 1], [], []>} : vector<4x16xbf16>, vector<16x8xbf16>, vector<4x8xf32> -> vector<4x8xf32>
    %67 = arith.addf %64, %66 : vector<4x8xf32>
    %c0_49 = arith.constant 0 : index
    %c0_50 = arith.constant 0 : index
    %c5 = arith.constant 5 : index
    %c0_51 = arith.constant 0 : index
    %68 = vector.load %arg2[%c0_49, %c0_50, %c5, %c0_51] : memref<1x4x16x16xf32, #tpu.memory_space<vmem>>, vector<1x4x1x16xf32>
    %69 = vector.shape_cast %68 : vector<1x4x1x16xf32> to vector<4x16xf32>
    %70 = arith.truncf %69 : vector<4x16xf32> to vector<4x16xbf16>
    %cst_52 = arith.constant dense<0.000000e+00> : vector<8x16xf32>
    %71 = tpu.matmul %3, %70, %cst_52 {dimension_numbers = #tpu.dot_dimension_numbers<[1], [0], [0], [1], [0, 0, 1, 1], [], []>} : vector<8x4xbf16>, vector<4x16xbf16>, vector<8x16xf32> -> vector<8x16xf32>
    %72 = arith.truncf %71 : vector<8x16xf32> to vector<8x16xbf16>
    %73 = vector.extract_strided_slice %72 {offsets = [0, 0], sizes = [4, 16], strides = [1, 1]} : vector<8x16xbf16> to vector<4x16xbf16>
    %cst_53 = arith.constant dense<0.000000e+00> : vector<4x8xf32>
    %74 = tpu.matmul %73, %5, %cst_53 {dimension_numbers = #tpu.dot_dimension_numbers<[1], [0], [0], [1], [0, 0, 1, 1], [], []>} : vector<4x16xbf16>, vector<16x8xbf16>, vector<4x8xf32> -> vector<4x8xf32>
    %75 = arith.addf %67, %74 : vector<4x8xf32>
    %76 = vector.extract_strided_slice %72 {offsets = [4, 0], sizes = [4, 16], strides = [1, 1]} : vector<8x16xbf16> to vector<4x16xbf16>
    %cst_54 = arith.constant dense<0.000000e+00> : vector<4x8xf32>
    %77 = tpu.matmul %76, %7, %cst_54 {dimension_numbers = #tpu.dot_dimension_numbers<[1], [0], [0], [1], [0, 0, 1, 1], [], []>} : vector<4x16xbf16>, vector<16x8xbf16>, vector<4x8xf32> -> vector<4x8xf32>
    %78 = arith.addf %75, %77 : vector<4x8xf32>
    %79 = arith.truncf %78 : vector<4x8xf32> to vector<4x8xbf16>
    %c0_55 = arith.constant 0 : index
    %c0_56 = arith.constant 0 : index
    %c2_57 = arith.constant 2 : index
    %c0_58 = arith.constant 0 : index
    %80 = vector.load %arg8[%c0_55, %c0_56, %c2_57, %c0_58] : memref<1x4x8x8xbf16, #tpu.memory_space<vmem>>, vector<1x4x1x8xbf16>
    %81 = vector.shape_cast %80 : vector<1x4x1x8xbf16> to vector<4x8xbf16>
    %82 = vector.shape_cast %79 : vector<4x8xbf16> to vector<1x4x1x8xbf16>
    tpu.vector_store %arg8[%c0_55, %c0_56, %c2_57, %c0_58], %82 {strides = array<i32>} : memref<1x4x8x8xbf16, #tpu.memory_space<vmem>>, vector<1x4x1x8xbf16>,
    %c0_59 = arith.constant 0 : index
    %c0_60 = arith.constant 0 : index
    %c6 = arith.constant 6 : index
    %c0_61 = arith.constant 0 : index
    %83 = vector.load %arg2[%c0_59, %c0_60, %c6, %c0_61] : memref<1x4x16x16xf32, #tpu.memory_space<vmem>>, vector<1x4x1x16xf32>
    %84 = vector.shape_cast %83 : vector<1x4x1x16xf32> to vector<4x16xf32>
    %85 = arith.truncf %84 : vector<4x16xf32> to vector<4x16xbf16>
    %cst_62 = arith.constant dense<0.000000e+00> : vector<8x16xf32>
    %86 = tpu.matmul %1, %85, %cst_62 {dimension_numbers = #tpu.dot_dimension_numbers<[1], [0], [0], [1], [0, 0, 1, 1], [], []>} : vector<8x4xbf16>, vector<4x16xbf16>, vector<8x16xf32> -> vector<8x16xf32>
    %87 = arith.truncf %86 : vector<8x16xf32> to vector<8x16xbf16>
    %88 = vector.extract_strided_slice %87 {offsets = [0, 0], sizes = [4, 16], strides = [1, 1]} : vector<8x16xbf16> to vector<4x16xbf16>
    %cst_63 = arith.constant dense<0.000000e+00> : vector<4x8xf32>
    %89 = tpu.matmul %88, %5, %cst_63 {dimension_numbers = #tpu.dot_dimension_numbers<[1], [0], [0], [1], [0, 0, 1, 1], [], []>} : vector<4x16xbf16>, vector<16x8xbf16>, vector<4x8xf32> -> vector<4x8xf32>
    %90 = vector.extract_strided_slice %87 {offsets = [4, 0], sizes = [4, 16], strides = [1, 1]} : vector<8x16xbf16> to vector<4x16xbf16>
    %cst_64 = arith.constant dense<0.000000e+00> : vector<4x8xf32>
    %91 = tpu.matmul %90, %7, %cst_64 {dimension_numbers = #tpu.dot_dimension_numbers<[1], [0], [0], [1], [0, 0, 1, 1], [], []>} : vector<4x16xbf16>, vector<16x8xbf16>, vector<4x8xf32> -> vector<4x8xf32>
    %92 = arith.addf %89, %91 : vector<4x8xf32>
    %c0_65 = arith.constant 0 : index
    %c0_66 = arith.constant 0 : index
    %c7 = arith.constant 7 : index
    %c0_67 = arith.constant 0 : index
    %93 = vector.load %arg2[%c0_65, %c0_66, %c7, %c0_67] : memref<1x4x16x16xf32, #tpu.memory_space<vmem>>, vector<1x4x1x16xf32>
    %94 = vector.shape_cast %93 : vector<1x4x1x16xf32> to vector<4x16xf32>
    %95 = arith.truncf %94 : vector<4x16xf32> to vector<4x16xbf16>
    %cst_68 = arith.constant dense<0.000000e+00> : vector<8x16xf32>
    %96 = tpu.matmul %3, %95, %cst_68 {dimension_numbers = #tpu.dot_dimension_numbers<[1], [0], [0], [1], [0, 0, 1, 1], [], []>} : vector<8x4xbf16>, vector<4x16xbf16>, vector<8x16xf32> -> vector<8x16xf32>
    %97 = arith.truncf %96 : vector<8x16xf32> to vector<8x16xbf16>
    %98 = vector.extract_strided_slice %97 {offsets = [0, 0], sizes = [4, 16], strides = [1, 1]} : vector<8x16xbf16> to vector<4x16xbf16>
    %cst_69 = arith.constant dense<0.000000e+00> : vector<4x8xf32>
    %99 = tpu.matmul %98, %5, %cst_69 {dimension_numbers = #tpu.dot_dimension_numbers<[1], [0], [0], [1], [0, 0, 1, 1], [], []>} : vector<4x16xbf16>, vector<16x8xbf16>, vector<4x8xf32> -> vector<4x8xf32>
    %100 = arith.addf %92, %99 : vector<4x8xf32>
    %101 = vector.extract_strided_slice %97 {offsets = [4, 0], sizes = [4, 16], strides = [1, 1]} : vector<8x16xbf16> to vector<4x16xbf16>
    %cst_70 = arith.constant dense<0.000000e+00> : vector<4x8xf32>
    %102 = tpu.matmul %101, %7, %cst_70 {dimension_numbers = #tpu.dot_dimension_numbers<[1], [0], [0], [1], [0, 0, 1, 1], [], []>} : vector<4x16xbf16>, vector<16x8xbf16>, vector<4x8xf32> -> vector<4x8xf32>
    %103 = arith.addf %100, %102 : vector<4x8xf32>
    %104 = arith.truncf %103 : vector<4x8xf32> to vector<4x8xbf16>
    %c0_71 = arith.constant 0 : index
    %c0_72 = arith.constant 0 : index
    %c3_73 = arith.constant 3 : index
    %c0_74 = arith.constant 0 : index
    %105 = vector.load %arg8[%c0_71, %c0_72, %c3_73, %c0_74] : memref<1x4x8x8xbf16, #tpu.memory_space<vmem>>, vector<1x4x1x8xbf16>
    %106 = vector.shape_cast %105 : vector<1x4x1x8xbf16> to vector<4x8xbf16>
    %107 = vector.shape_cast %104 : vector<4x8xbf16> to vector<1x4x1x8xbf16>
    tpu.vector_store %arg8[%c0_71, %c0_72, %c3_73, %c0_74], %107 {strides = array<i32>} : memref<1x4x8x8xbf16, #tpu.memory_space<vmem>>, vector<1x4x1x8xbf16>,
    %c0_75 = arith.constant 0 : index
    %c0_76 = arith.constant 0 : index
    %c8 = arith.constant 8 : index
    %c0_77 = arith.constant 0 : index
    %108 = vector.load %arg2[%c0_75, %c0_76, %c8, %c0_77] : memref<1x4x16x16xf32, #tpu.memory_space<vmem>>, vector<1x4x1x16xf32>
    %109 = vector.shape_cast %108 : vector<1x4x1x16xf32> to vector<4x16xf32>
    %110 = arith.truncf %109 : vector<4x16xf32> to vector<4x16xbf16>
    %cst_78 = arith.constant dense<0.000000e+00> : vector<8x16xf32>
    %111 = tpu.matmul %1, %110, %cst_78 {dimension_numbers = #tpu.dot_dimension_numbers<[1], [0], [0], [1], [0, 0, 1, 1], [], []>} : vector<8x4xbf16>, vector<4x16xbf16>, vector<8x16xf32> -> vector<8x16xf32>
    %112 = arith.truncf %111 : vector<8x16xf32> to vector<8x16xbf16>
    %113 = vector.extract_strided_slice %112 {offsets = [0, 0], sizes = [4, 16], strides = [1, 1]} : vector<8x16xbf16> to vector<4x16xbf16>
    %cst_79 = arith.constant dense<0.000000e+00> : vector<4x8xf32>
    %114 = tpu.matmul %113, %5, %cst_79 {dimension_numbers = #tpu.dot_dimension_numbers<[1], [0], [0], [1], [0, 0, 1, 1], [], []>} : vector<4x16xbf16>, vector<16x8xbf16>, vector<4x8xf32> -> vector<4x8xf32>
    %115 = vector.extract_strided_slice %112 {offsets = [4, 0], sizes = [4, 16], strides = [1, 1]} : vector<8x16xbf16> to vector<4x16xbf16>
    %cst_80 = arith.constant dense<0.000000e+00> : vector<4x8xf32>
    %116 = tpu.matmul %115, %7, %cst_80 {dimension_numbers = #tpu.dot_dimension_numbers<[1], [0], [0], [1], [0, 0, 1, 1], [], []>} : vector<4x16xbf16>, vector<16x8xbf16>, vector<4x8xf32> -> vector<4x8xf32>
    %117 = arith.addf %114, %116 : vector<4x8xf32>
    %c0_81 = arith.constant 0 : index
    %c0_82 = arith.constant 0 : index
    %c9 = arith.constant 9 : index
    %c0_83 = arith.constant 0 : index
    %118 = vector.load %arg2[%c0_81, %c0_82, %c9, %c0_83] : memref<1x4x16x16xf32, #tpu.memory_space<vmem>>, vector<1x4x1x16xf32>
    %119 = vector.shape_cast %118 : vector<1x4x1x16xf32> to vector<4x16xf32>
    %120 = arith.truncf %119 : vector<4x16xf32> to vector<4x16xbf16>
    %cst_84 = arith.constant dense<0.000000e+00> : vector<8x16xf32>
    %121 = tpu.matmul %3, %120, %cst_84 {dimension_numbers = #tpu.dot_dimension_numbers<[1], [0], [0], [1], [0, 0, 1, 1], [], []>} : vector<8x4xbf16>, vector<4x16xbf16>, vector<8x16xf32> -> vector<8x16xf32>
    %122 = arith.truncf %121 : vector<8x16xf32> to vector<8x16xbf16>
    %123 = vector.extract_strided_slice %122 {offsets = [0, 0], sizes = [4, 16], strides = [1, 1]} : vector<8x16xbf16> to vector<4x16xbf16>
    %cst_85 = arith.constant dense<0.000000e+00> : vector<4x8xf32>
    %124 = tpu.matmul %123, %5, %cst_85 {dimension_numbers = #tpu.dot_dimension_numbers<[1], [0], [0], [1], [0, 0, 1, 1], [], []>} : vector<4x16xbf16>, vector<16x8xbf16>, vector<4x8xf32> -> vector<4x8xf32>
    %125 = arith.addf %117, %124 : vector<4x8xf32>
    %126 = vector.extract_strided_slice %122 {offsets = [4, 0], sizes = [4, 16], strides = [1, 1]} : vector<8x16xbf16> to vector<4x16xbf16>
    %cst_86 = arith.constant dense<0.000000e+00> : vector<4x8xf32>
    %127 = tpu.matmul %126, %7, %cst_86 {dimension_numbers = #tpu.dot_dimension_numbers<[1], [0], [0], [1], [0, 0, 1, 1], [], []>} : vector<4x16xbf16>, vector<16x8xbf16>, vector<4x8xf32> -> vector<4x8xf32>
    %128 = arith.addf %125, %127 : vector<4x8xf32>
    %129 = arith.truncf %128 : vector<4x8xf32> to vector<4x8xbf16>
    %c0_87 = arith.constant 0 : index
    %c0_88 = arith.constant 0 : index
    %c4_89 = arith.constant 4 : index
    %c0_90 = arith.constant 0 : index
    %130 = vector.load %arg8[%c0_87, %c0_88, %c4_89, %c0_90] : memref<1x4x8x8xbf16, #tpu.memory_space<vmem>>, vector<1x4x1x8xbf16>
    %131 = vector.shape_cast %130 : vector<1x4x1x8xbf16> to vector<4x8xbf16>
    %132 = vector.shape_cast %129 : vector<4x8xbf16> to vector<1x4x1x8xbf16>
    tpu.vector_store %arg8[%c0_87, %c0_88, %c4_89, %c0_90], %132 {strides = array<i32>} : memref<1x4x8x8xbf16, #tpu.memory_space<vmem>>, vector<1x4x1x8xbf16>,
    %c0_91 = arith.constant 0 : index
    %c0_92 = arith.constant 0 : index
    %c10 = arith.constant 10 : index
    %c0_93 = arith.constant 0 : index
    %133 = vector.load %arg2[%c0_91, %c0_92, %c10, %c0_93] : memref<1x4x16x16xf32, #tpu.memory_space<vmem>>, vector<1x4x1x16xf32>
    %134 = vector.shape_cast %133 : vector<1x4x1x16xf32> to vector<4x16xf32>
    %135 = arith.truncf %134 : vector<4x16xf32> to vector<4x16xbf16>
    %cst_94 = arith.constant dense<0.000000e+00> : vector<8x16xf32>
    %136 = tpu.matmul %1, %135, %cst_94 {dimension_numbers = #tpu.dot_dimension_numbers<[1], [0], [0], [1], [0, 0, 1, 1], [], []>} : vector<8x4xbf16>, vector<4x16xbf16>, vector<8x16xf32> -> vector<8x16xf32>
    %137 = arith.truncf %136 : vector<8x16xf32> to vector<8x16xbf16>
    %138 = vector.extract_strided_slice %137 {offsets = [0, 0], sizes = [4, 16], strides = [1, 1]} : vector<8x16xbf16> to vector<4x16xbf16>
    %cst_95 = arith.constant dense<0.000000e+00> : vector<4x8xf32>
    %139 = tpu.matmul %138, %5, %cst_95 {dimension_numbers = #tpu.dot_dimension_numbers<[1], [0], [0], [1], [0, 0, 1, 1], [], []>} : vector<4x16xbf16>, vector<16x8xbf16>, vector<4x8xf32> -> vector<4x8xf32>
    %140 = vector.extract_strided_slice %137 {offsets = [4, 0], sizes = [4, 16], strides = [1, 1]} : vector<8x16xbf16> to vector<4x16xbf16>
    %cst_96 = arith.constant dense<0.000000e+00> : vector<4x8xf32>
    %141 = tpu.matmul %140, %7, %cst_96 {dimension_numbers = #tpu.dot_dimension_numbers<[1], [0], [0], [1], [0, 0, 1, 1], [], []>} : vector<4x16xbf16>, vector<16x8xbf16>, vector<4x8xf32> -> vector<4x8xf32>
    %142 = arith.addf %139, %141 : vector<4x8xf32>
    %c0_97 = arith.constant 0 : index
    %c0_98 = arith.constant 0 : index
    %c11 = arith.constant 11 : index
    %c0_99 = arith.constant 0 : index
    %143 = vector.load %arg2[%c0_97, %c0_98, %c11, %c0_99] : memref<1x4x16x16xf32, #tpu.memory_space<vmem>>, vector<1x4x1x16xf32>
    %144 = vector.shape_cast %143 : vector<1x4x1x16xf32> to vector<4x16xf32>
    %145 = arith.truncf %144 : vector<4x16xf32> to vector<4x16xbf16>
    %cst_100 = arith.constant dense<0.000000e+00> : vector<8x16xf32>
    %146 = tpu.matmul %3, %145, %cst_100 {dimension_numbers = #tpu.dot_dimension_numbers<[1], [0], [0], [1], [0, 0, 1, 1], [], []>} : vector<8x4xbf16>, vector<4x16xbf16>, vector<8x16xf32> -> vector<8x16xf32>
    %147 = arith.truncf %146 : vector<8x16xf32> to vector<8x16xbf16>
    %148 = vector.extract_strided_slice %147 {offsets = [0, 0], sizes = [4, 16], strides = [1, 1]} : vector<8x16xbf16> to vector<4x16xbf16>
    %cst_101 = arith.constant dense<0.000000e+00> : vector<4x8xf32>
    %149 = tpu.matmul %148, %5, %cst_101 {dimension_numbers = #tpu.dot_dimension_numbers<[1], [0], [0], [1], [0, 0, 1, 1], [], []>} : vector<4x16xbf16>, vector<16x8xbf16>, vector<4x8xf32> -> vector<4x8xf32>
    %150 = arith.addf %142, %149 : vector<4x8xf32>
    %151 = vector.extract_strided_slice %147 {offsets = [4, 0], sizes = [4, 16], strides = [1, 1]} : vector<8x16xbf16> to vector<4x16xbf16>
    %cst_102 = arith.constant dense<0.000000e+00> : vector<4x8xf32>
    %152 = tpu.matmul %151, %7, %cst_102 {dimension_numbers = #tpu.dot_dimension_numbers<[1], [0], [0], [1], [0, 0, 1, 1], [], []>} : vector<4x16xbf16>, vector<16x8xbf16>, vector<4x8xf32> -> vector<4x8xf32>
    %153 = arith.addf %150, %152 : vector<4x8xf32>
    %154 = arith.truncf %153 : vector<4x8xf32> to vector<4x8xbf16>
    %c0_103 = arith.constant 0 : index
    %c0_104 = arith.constant 0 : index
    %c5_105 = arith.constant 5 : index
    %c0_106 = arith.constant 0 : index
    %155 = vector.load %arg8[%c0_103, %c0_104, %c5_105, %c0_106] : memref<1x4x8x8xbf16, #tpu.memory_space<vmem>>, vector<1x4x1x8xbf16>
    %156 = vector.shape_cast %155 : vector<1x4x1x8xbf16> to vector<4x8xbf16>
    %157 = vector.shape_cast %154 : vector<4x8xbf16> to vector<1x4x1x8xbf16>
    tpu.vector_store %arg8[%c0_103, %c0_104, %c5_105, %c0_106], %157 {strides = array<i32>} : memref<1x4x8x8xbf16, #tpu.memory_space<vmem>>, vector<1x4x1x8xbf16>,
    %c0_107 = arith.constant 0 : index
    %c0_108 = arith.constant 0 : index
    %c12 = arith.constant 12 : index
    %c0_109 = arith.constant 0 : index
    %158 = vector.load %arg2[%c0_107, %c0_108, %c12, %c0_109] : memref<1x4x16x16xf32, #tpu.memory_space<vmem>>, vector<1x4x1x16xf32>
    %159 = vector.shape_cast %158 : vector<1x4x1x16xf32> to vector<4x16xf32>
    %160 = arith.truncf %159 : vector<4x16xf32> to vector<4x16xbf16>
    %cst_110 = arith.constant dense<0.000000e+00> : vector<8x16xf32>
    %161 = tpu.matmul %1, %160, %cst_110 {dimension_numbers = #tpu.dot_dimension_numbers<[1], [0], [0], [1], [0, 0, 1, 1], [], []>} : vector<8x4xbf16>, vector<4x16xbf16>, vector<8x16xf32> -> vector<8x16xf32>
    %162 = arith.truncf %161 : vector<8x16xf32> to vector<8x16xbf16>
    %163 = vector.extract_strided_slice %162 {offsets = [0, 0], sizes = [4, 16], strides = [1, 1]} : vector<8x16xbf16> to vector<4x16xbf16>
    %cst_111 = arith.constant dense<0.000000e+00> : vector<4x8xf32>
    %164 = tpu.matmul %163, %5, %cst_111 {dimension_numbers = #tpu.dot_dimension_numbers<[1], [0], [0], [1], [0, 0, 1, 1], [], []>} : vector<4x16xbf16>, vector<16x8xbf16>, vector<4x8xf32> -> vector<4x8xf32>
    %165 = vector.extract_strided_slice %162 {offsets = [4, 0], sizes = [4, 16], strides = [1, 1]} : vector<8x16xbf16> to vector<4x16xbf16>
    %cst_112 = arith.constant dense<0.000000e+00> : vector<4x8xf32>
    %166 = tpu.matmul %165, %7, %cst_112 {dimension_numbers = #tpu.dot_dimension_numbers<[1], [0], [0], [1], [0, 0, 1, 1], [], []>} : vector<4x16xbf16>, vector<16x8xbf16>, vector<4x8xf32> -> vector<4x8xf32>
    %167 = arith.addf %164, %166 : vector<4x8xf32>
    %c0_113 = arith.constant 0 : index
    %c0_114 = arith.constant 0 : index
    %c13 = arith.constant 13 : index
    %c0_115 = arith.constant 0 : index
    %168 = vector.load %arg2[%c0_113, %c0_114, %c13, %c0_115] : memref<1x4x16x16xf32, #tpu.memory_space<vmem>>, vector<1x4x1x16xf32>
    %169 = vector.shape_cast %168 : vector<1x4x1x16xf32> to vector<4x16xf32>
    %170 = arith.truncf %169 : vector<4x16xf32> to vector<4x16xbf16>
    %cst_116 = arith.constant dense<0.000000e+00> : vector<8x16xf32>
    %171 = tpu.matmul %3, %170, %cst_116 {dimension_numbers = #tpu.dot_dimension_numbers<[1], [0], [0], [1], [0, 0, 1, 1], [], []>} : vector<8x4xbf16>, vector<4x16xbf16>, vector<8x16xf32> -> vector<8x16xf32>
    %172 = arith.truncf %171 : vector<8x16xf32> to vector<8x16xbf16>
    %173 = vector.extract_strided_slice %172 {offsets = [0, 0], sizes = [4, 16], strides = [1, 1]} : vector<8x16xbf16> to vector<4x16xbf16>
    %cst_117 = arith.constant dense<0.000000e+00> : vector<4x8xf32>
    %174 = tpu.matmul %173, %5, %cst_117 {dimension_numbers = #tpu.dot_dimension_numbers<[1], [0], [0], [1], [0, 0, 1, 1], [], []>} : vector<4x16xbf16>, vector<16x8xbf16>, vector<4x8xf32> -> vector<4x8xf32>
    %175 = arith.addf %167, %174 : vector<4x8xf32>
    %176 = vector.extract_strided_slice %172 {offsets = [4, 0], sizes = [4, 16], strides = [1, 1]} : vector<8x16xbf16> to vector<4x16xbf16>
    %cst_118 = arith.constant dense<0.000000e+00> : vector<4x8xf32>
    %177 = tpu.matmul %176, %7, %cst_118 {dimension_numbers = #tpu.dot_dimension_numbers<[1], [0], [0], [1], [0, 0, 1, 1], [], []>} : vector<4x16xbf16>, vector<16x8xbf16>, vector<4x8xf32> -> vector<4x8xf32>
    %178 = arith.addf %175, %177 : vector<4x8xf32>
    %179 = arith.truncf %178 : vector<4x8xf32> to vector<4x8xbf16>
    %c0_119 = arith.constant 0 : index
    %c0_120 = arith.constant 0 : index
    %c6_121 = arith.constant 6 : index
    %c0_122 = arith.constant 0 : index
    %180 = vector.load %arg8[%c0_119, %c0_120, %c6_121, %c0_122] : memref<1x4x8x8xbf16, #tpu.memory_space<vmem>>, vector<1x4x1x8xbf16>
    %181 = vector.shape_cast %180 : vector<1x4x1x8xbf16> to vector<4x8xbf16>
    %182 = vector.shape_cast %179 : vector<4x8xbf16> to vector<1x4x1x8xbf16>
    tpu.vector_store %arg8[%c0_119, %c0_120, %c6_121, %c0_122], %182 {strides = array<i32>} : memref<1x4x8x8xbf16, #tpu.memory_space<vmem>>, vector<1x4x1x8xbf16>,
    %c0_123 = arith.constant 0 : index
    %c0_124 = arith.constant 0 : index
    %c14 = arith.constant 14 : index
    %c0_125 = arith.constant 0 : index
    %183 = vector.load %arg2[%c0_123, %c0_124, %c14, %c0_125] : memref<1x4x16x16xf32, #tpu.memory_space<vmem>>, vector<1x4x1x16xf32>
    %184 = vector.shape_cast %183 : vector<1x4x1x16xf32> to vector<4x16xf32>
    %185 = arith.truncf %184 : vector<4x16xf32> to vector<4x16xbf16>
    %cst_126 = arith.constant dense<0.000000e+00> : vector<8x16xf32>
    %186 = tpu.matmul %1, %185, %cst_126 {dimension_numbers = #tpu.dot_dimension_numbers<[1], [0], [0], [1], [0, 0, 1, 1], [], []>} : vector<8x4xbf16>, vector<4x16xbf16>, vector<8x16xf32> -> vector<8x16xf32>
    %187 = arith.truncf %186 : vector<8x16xf32> to vector<8x16xbf16>
    %188 = vector.extract_strided_slice %187 {offsets = [0, 0], sizes = [4, 16], strides = [1, 1]} : vector<8x16xbf16> to vector<4x16xbf16>
    %cst_127 = arith.constant dense<0.000000e+00> : vector<4x8xf32>
    %189 = tpu.matmul %188, %5, %cst_127 {dimension_numbers = #tpu.dot_dimension_numbers<[1], [0], [0], [1], [0, 0, 1, 1], [], []>} : vector<4x16xbf16>, vector<16x8xbf16>, vector<4x8xf32> -> vector<4x8xf32>
    %190 = vector.extract_strided_slice %187 {offsets = [4, 0], sizes = [4, 16], strides = [1, 1]} : vector<8x16xbf16> to vector<4x16xbf16>
    %cst_128 = arith.constant dense<0.000000e+00> : vector<4x8xf32>
    %191 = tpu.matmul %190, %7, %cst_128 {dimension_numbers = #tpu.dot_dimension_numbers<[1], [0], [0], [1], [0, 0, 1, 1], [], []>} : vector<4x16xbf16>, vector<16x8xbf16>, vector<4x8xf32> -> vector<4x8xf32>
    %192 = arith.addf %189, %191 : vector<4x8xf32>
    %c0_129 = arith.constant 0 : index
    %c0_130 = arith.constant 0 : index
    %c15 = arith.constant 15 : index
    %c0_131 = arith.constant 0 : index
    %193 = vector.load %arg2[%c0_129, %c0_130, %c15, %c0_131] : memref<1x4x16x16xf32, #tpu.memory_space<vmem>>, vector<1x4x1x16xf32>
    %194 = vector.shape_cast %193 : vector<1x4x1x16xf32> to vector<4x16xf32>
    %195 = arith.truncf %194 : vector<4x16xf32> to vector<4x16xbf16>
    %cst_132 = arith.constant dense<0.000000e+00> : vector<8x16xf32>
    %196 = tpu.matmul %3, %195, %cst_132 {dimension_numbers = #tpu.dot_dimension_numbers<[1], [0], [0], [1], [0, 0, 1, 1], [], []>} : vector<8x4xbf16>, vector<4x16xbf16>, vector<8x16xf32> -> vector<8x16xf32>
    %197 = arith.truncf %196 : vector<8x16xf32> to vector<8x16xbf16>
    %198 = vector.extract_strided_slice %197 {offsets = [0, 0], sizes = [4, 16], strides = [1, 1]} : vector<8x16xbf16> to vector<4x16xbf16>
    %cst_133 = arith.constant dense<0.000000e+00> : vector<4x8xf32>
    %199 = tpu.matmul %198, %5, %cst_133 {dimension_numbers = #tpu.dot_dimension_numbers<[1], [0], [0], [1], [0, 0, 1, 1], [], []>} : vector<4x16xbf16>, vector<16x8xbf16>, vector<4x8xf32> -> vector<4x8xf32>
    %200 = arith.addf %192, %199 : vector<4x8xf32>
    %201 = vector.extract_strided_slice %197 {offsets = [4, 0], sizes = [4, 16], strides = [1, 1]} : vector<8x16xbf16> to vector<4x16xbf16>
    %cst_134 = arith.constant dense<0.000000e+00> : vector<4x8xf32>
    %202 = tpu.matmul %201, %7, %cst_134 {dimension_numbers = #tpu.dot_dimension_numbers<[1], [0], [0], [1], [0, 0, 1, 1], [], []>} : vector<4x16xbf16>, vector<16x8xbf16>, vector<4x8xf32> -> vector<4x8xf32>
    %203 = arith.addf %200, %202 : vector<4x8xf32>
    %204 = arith.truncf %203 : vector<4x8xf32> to vector<4x8xbf16>
    %c0_135 = arith.constant 0 : index
    %c0_136 = arith.constant 0 : index
    %c7_137 = arith.constant 7 : index
    %c0_138 = arith.constant 0 : index
    %205 = vector.load %arg8[%c0_135, %c0_136, %c7_137, %c0_138] : memref<1x4x8x8xbf16, #tpu.memory_space<vmem>>, vector<1x4x1x8xbf16>
    %206 = vector.shape_cast %205 : vector<1x4x1x8xbf16> to vector<4x8xbf16>
    %207 = vector.shape_cast %204 : vector<4x8xbf16> to vector<1x4x1x8xbf16>
    tpu.vector_store %arg8[%c0_135, %c0_136, %c7_137, %c0_138], %207 {strides = array<i32>} : memref<1x4x8x8xbf16, #tpu.memory_space<vmem>>, vector<1x4x1x8xbf16>,
    %c0_i32 = arith.constant 0 : i32
    %208 = arith.cmpi eq, %arg1, %c0_i32 : i32
    %209 = arith.extui %208 : i1 to i32
    %c0_i32_139 = arith.constant 0 : i32
    %210 = arith.cmpi ne, %209, %c0_i32_139 : i32
    scf.if %210 {
      %c0_140 = arith.constant 0 : index
      %c0_141 = arith.constant 0 : index
      %211 = vector.load %arg5[%c0_140, %c0_141] : memref<4x4xf32, #tpu.memory_space<vmem>>, vector<4x4xf32>
      %c0_142 = arith.constant 0 : index
      %c0_143 = arith.constant 0 : index
      %212 = vector.load %arg6[%c0_142, %c0_143] : memref<4x1xf32, #tpu.memory_space<vmem>>, vector<4x1xf32>
      %c0_144 = arith.constant 0 : index
      %c0_145 = arith.constant 0 : index
      %c0_146 = arith.constant 0 : index
      %c0_147 = arith.constant 0 : index
      %213 = vector.load %arg3[%c0_144, %c0_145, %c0_146, %c0_147] : memref<1x4x6x6xf32, #tpu.memory_space<vmem>>, vector<1x4x1x6xf32>
      %214 = vector.shape_cast %213 : vector<1x4x1x6xf32> to vector<4x6xf32>
      %cst_148 = arith.constant dense<0.000000e+00> : vector<4x6xf32>
      %215 = tpu.matmul %211, %214, %cst_148 {dimension_numbers = #tpu.dot_dimension_numbers<[1], [0], [0], [1], [0, 0, 1, 1], [], []>} : vector<4x4xf32>, vector<4x6xf32>, vector<4x6xf32> -> vector<4x6xf32>
      %216 = vector.broadcast %212 : vector<4x1xf32> to vector<4x6xf32>
      %217 = arith.addf %215, %216 : vector<4x6xf32>
      %218 = arith.truncf %217 : vector<4x6xf32> to vector<4x6xbf16>
      %c0_149 = arith.constant 0 : index
      %c0_150 = arith.constant 0 : index
      %c0_151 = arith.constant 0 : index
      %c0_152 = arith.constant 0 : index
      %219 = vector.load %arg9[%c0_149, %c0_150, %c0_151, %c0_152] : memref<1x4x6x6xbf16, #tpu.memory_space<vmem>>, vector<1x4x1x6xbf16>
      %220 = vector.shape_cast %219 : vector<1x4x1x6xbf16> to vector<4x6xbf16>
      %221 = vector.shape_cast %218 : vector<4x6xbf16> to vector<1x4x1x6xbf16>
      tpu.vector_store %arg9[%c0_149, %c0_150, %c0_151, %c0_152], %221 {strides = array<i32>} : memref<1x4x6x6xbf16, #tpu.memory_space<vmem>>, vector<1x4x1x6xbf16>,
      %c0_153 = arith.constant 0 : index
      %c0_154 = arith.constant 0 : index
      %c1_155 = arith.constant 1 : index
      %c0_156 = arith.constant 0 : index
      %222 = vector.load %arg3[%c0_153, %c0_154, %c1_155, %c0_156] : memref<1x4x6x6xf32, #tpu.memory_space<vmem>>, vector<1x4x1x6xf32>
      %223 = vector.shape_cast %222 : vector<1x4x1x6xf32> to vector<4x6xf32>
      %cst_157 = arith.constant dense<0.000000e+00> : vector<4x6xf32>
      %224 = tpu.matmul %211, %223, %cst_157 {dimension_numbers = #tpu.dot_dimension_numbers<[1], [0], [0], [1], [0, 0, 1, 1], [], []>} : vector<4x4xf32>, vector<4x6xf32>, vector<4x6xf32> -> vector<4x6xf32>
      %225 = vector.broadcast %212 : vector<4x1xf32> to vector<4x6xf32>
      %226 = arith.addf %224, %225 : vector<4x6xf32>
      %227 = arith.truncf %226 : vector<4x6xf32> to vector<4x6xbf16>
      %c0_158 = arith.constant 0 : index
      %c0_159 = arith.constant 0 : index
      %c1_160 = arith.constant 1 : index
      %c0_161 = arith.constant 0 : index
      %228 = vector.load %arg9[%c0_158, %c0_159, %c1_160, %c0_161] : memref<1x4x6x6xbf16, #tpu.memory_space<vmem>>, vector<1x4x1x6xbf16>
      %229 = vector.shape_cast %228 : vector<1x4x1x6xbf16> to vector<4x6xbf16>
      %230 = vector.shape_cast %227 : vector<4x6xbf16> to vector<1x4x1x6xbf16>
      tpu.vector_store %arg9[%c0_158, %c0_159, %c1_160, %c0_161], %230 {strides = array<i32>} : memref<1x4x6x6xbf16, #tpu.memory_space<vmem>>, vector<1x4x1x6xbf16>,
      %c0_162 = arith.constant 0 : index
      %c0_163 = arith.constant 0 : index
      %c2_164 = arith.constant 2 : index
      %c0_165 = arith.constant 0 : index
      %231 = vector.load %arg3[%c0_162, %c0_163, %c2_164, %c0_165] : memref<1x4x6x6xf32, #tpu.memory_space<vmem>>, vector<1x4x1x6xf32>
      %232 = vector.shape_cast %231 : vector<1x4x1x6xf32> to vector<4x6xf32>
      %cst_166 = arith.constant dense<0.000000e+00> : vector<4x6xf32>
      %233 = tpu.matmul %211, %232, %cst_166 {dimension_numbers = #tpu.dot_dimension_numbers<[1], [0], [0], [1], [0, 0, 1, 1], [], []>} : vector<4x4xf32>, vector<4x6xf32>, vector<4x6xf32> -> vector<4x6xf32>
      %234 = vector.broadcast %212 : vector<4x1xf32> to vector<4x6xf32>
      %235 = arith.addf %233, %234 : vector<4x6xf32>
      %236 = arith.truncf %235 : vector<4x6xf32> to vector<4x6xbf16>
      %c0_167 = arith.constant 0 : index
      %c0_168 = arith.constant 0 : index
      %c2_169 = arith.constant 2 : index
      %c0_170 = arith.constant 0 : index
      %237 = vector.load %arg9[%c0_167, %c0_168, %c2_169, %c0_170] : memref<1x4x6x6xbf16, #tpu.memory_space<vmem>>, vector<1x4x1x6xbf16>
      %238 = vector.shape_cast %237 : vector<1x4x1x6xbf16> to vector<4x6xbf16>
      %239 = vector.shape_cast %236 : vector<4x6xbf16> to vector<1x4x1x6xbf16>
      tpu.vector_store %arg9[%c0_167, %c0_168, %c2_169, %c0_170], %239 {strides = array<i32>} : memref<1x4x6x6xbf16, #tpu.memory_space<vmem>>, vector<1x4x1x6xbf16>,
      %c0_171 = arith.constant 0 : index
      %c0_172 = arith.constant 0 : index
      %c3_173 = arith.constant 3 : index
      %c0_174 = arith.constant 0 : index
      %240 = vector.load %arg3[%c0_171, %c0_172, %c3_173, %c0_174] : memref<1x4x6x6xf32, #tpu.memory_space<vmem>>, vector<1x4x1x6xf32>
      %241 = vector.shape_cast %240 : vector<1x4x1x6xf32> to vector<4x6xf32>
      %cst_175 = arith.constant dense<0.000000e+00> : vector<4x6xf32>
      %242 = tpu.matmul %211, %241, %cst_175 {dimension_numbers = #tpu.dot_dimension_numbers<[1], [0], [0], [1], [0, 0, 1, 1], [], []>} : vector<4x4xf32>, vector<4x6xf32>, vector<4x6xf32> -> vector<4x6xf32>
      %243 = vector.broadcast %212 : vector<4x1xf32> to vector<4x6xf32>
      %244 = arith.addf %242, %243 : vector<4x6xf32>
      %245 = arith.truncf %244 : vector<4x6xf32> to vector<4x6xbf16>
      %c0_176 = arith.constant 0 : index
      %c0_177 = arith.constant 0 : index
      %c3_178 = arith.constant 3 : index
      %c0_179 = arith.constant 0 : index
      %246 = vector.load %arg9[%c0_176, %c0_177, %c3_178, %c0_179] : memref<1x4x6x6xbf16, #tpu.memory_space<vmem>>, vector<1x4x1x6xbf16>
      %247 = vector.shape_cast %246 : vector<1x4x1x6xbf16> to vector<4x6xbf16>
      %248 = vector.shape_cast %245 : vector<4x6xbf16> to vector<1x4x1x6xbf16>
      tpu.vector_store %arg9[%c0_176, %c0_177, %c3_178, %c0_179], %248 {strides = array<i32>} : memref<1x4x6x6xbf16, #tpu.memory_space<vmem>>, vector<1x4x1x6xbf16>,
      %c0_180 = arith.constant 0 : index
      %c0_181 = arith.constant 0 : index
      %c4_182 = arith.constant 4 : index
      %c0_183 = arith.constant 0 : index
      %249 = vector.load %arg3[%c0_180, %c0_181, %c4_182, %c0_183] : memref<1x4x6x6xf32, #tpu.memory_space<vmem>>, vector<1x4x1x6xf32>
      %250 = vector.shape_cast %249 : vector<1x4x1x6xf32> to vector<4x6xf32>
      %cst_184 = arith.constant dense<0.000000e+00> : vector<4x6xf32>
      %251 = tpu.matmul %211, %250, %cst_184 {dimension_numbers = #tpu.dot_dimension_numbers<[1], [0], [0], [1], [0, 0, 1, 1], [], []>} : vector<4x4xf32>, vector<4x6xf32>, vector<4x6xf32> -> vector<4x6xf32>
      %252 = vector.broadcast %212 : vector<4x1xf32> to vector<4x6xf32>
      %253 = arith.addf %251, %252 : vector<4x6xf32>
      %254 = arith.truncf %253 : vector<4x6xf32> to vector<4x6xbf16>
      %c0_185 = arith.constant 0 : index
      %c0_186 = arith.constant 0 : index
      %c4_187 = arith.constant 4 : index
      %c0_188 = arith.constant 0 : index
      %255 = vector.load %arg9[%c0_185, %c0_186, %c4_187, %c0_188] : memref<1x4x6x6xbf16, #tpu.memory_space<vmem>>, vector<1x4x1x6xbf16>
      %256 = vector.shape_cast %255 : vector<1x4x1x6xbf16> to vector<4x6xbf16>
      %257 = vector.shape_cast %254 : vector<4x6xbf16> to vector<1x4x1x6xbf16>
      tpu.vector_store %arg9[%c0_185, %c0_186, %c4_187, %c0_188], %257 {strides = array<i32>} : memref<1x4x6x6xbf16, #tpu.memory_space<vmem>>, vector<1x4x1x6xbf16>,
      %c0_189 = arith.constant 0 : index
      %c0_190 = arith.constant 0 : index
      %c5_191 = arith.constant 5 : index
      %c0_192 = arith.constant 0 : index
      %258 = vector.load %arg3[%c0_189, %c0_190, %c5_191, %c0_192] : memref<1x4x6x6xf32, #tpu.memory_space<vmem>>, vector<1x4x1x6xf32>
      %259 = vector.shape_cast %258 : vector<1x4x1x6xf32> to vector<4x6xf32>
      %cst_193 = arith.constant dense<0.000000e+00> : vector<4x6xf32>
      %260 = tpu.matmul %211, %259, %cst_193 {dimension_numbers = #tpu.dot_dimension_numbers<[1], [0], [0], [1], [0, 0, 1, 1], [], []>} : vector<4x4xf32>, vector<4x6xf32>, vector<4x6xf32> -> vector<4x6xf32>
      %261 = vector.broadcast %212 : vector<4x1xf32> to vector<4x6xf32>
      %262 = arith.addf %260, %261 : vector<4x6xf32>
      %263 = arith.truncf %262 : vector<4x6xf32> to vector<4x6xbf16>
      %c0_194 = arith.constant 0 : index
      %c0_195 = arith.constant 0 : index
      %c5_196 = arith.constant 5 : index
      %c0_197 = arith.constant 0 : index
      %264 = vector.load %arg9[%c0_194, %c0_195, %c5_196, %c0_197] : memref<1x4x6x6xbf16, #tpu.memory_space<vmem>>, vector<1x4x1x6xbf16>
      %265 = vector.shape_cast %264 : vector<1x4x1x6xbf16> to vector<4x6xbf16>
      %266 = vector.shape_cast %263 : vector<4x6xbf16> to vector<1x4x1x6xbf16>
      tpu.vector_store %arg9[%c0_194, %c0_195, %c5_196, %c0_197], %266 {strides = array<i32>} : memref<1x4x6x6xbf16, #tpu.memory_space<vmem>>, vector<1x4x1x6xbf16>,
    } else {
    }
    return
  }
  func.func @transform_0(%arg0: i32, %arg1: i32) -> (i32, i32, i32, i32) {
    %c0_i32 = arith.constant 0 : i32
    %c0_i32_0 = arith.constant 0 : i32
    %c0_i32_1 = arith.constant 0 : i32
    return %arg0, %c0_i32, %arg1, %c0_i32_0 : i32, i32, i32, i32
  }
  func.func @transform_1(%arg0: i32, %arg1: i32) -> (i32, i32, i32, i32) {
    %c0_i32 = arith.constant 0 : i32
    %c0_i32_0 = arith.constant 0 : i32
    %c0_i32_1 = arith.constant 0 : i32
    %c0_i32_2 = arith.constant 0 : i32
    return %arg0, %c0_i32, %c0_i32_0, %c0_i32_1 : i32, i32, i32, i32
  }
  func.func @transform_2(%arg0: i32, %arg1: i32) -> (i32, i32, i32) {
    %c0_i32 = arith.constant 0 : i32
    %c0_i32_0 = arith.constant 0 : i32
    %c0_i32_1 = arith.constant 0 : i32
    %c0_i32_2 = arith.constant 0 : i32
    return %c0_i32, %c0_i32_0, %c0_i32_1 : i32, i32, i32
  }
  func.func @transform_3(%arg0: i32, %arg1: i32) -> (i32, i32) {
    %c0_i32 = arith.constant 0 : i32
    %c0_i32_0 = arith.constant 0 : i32
    %c0_i32_1 = arith.constant 0 : i32
    return %c0_i32, %c0_i32_0 : i32, i32
  }
  func.func @transform_4(%arg0: i32, %arg1: i32) -> (i32, i32) {
    %c0_i32 = arith.constant 0 : i32
    %c0_i32_0 = arith.constant 0 : i32
    %c0_i32_1 = arith.constant 0 : i32
    return %c0_i32, %c0_i32_0 : i32, i32
  }
  func.func @transform_5(%arg0: i32, %arg1: i32) -> (i32, i32, i32) {
    %c0_i32 = arith.constant 0 : i32
    %c0_i32_0 = arith.constant 0 : i32
    %c0_i32_1 = arith.constant 0 : i32
    %c0_i32_2 = arith.constant 0 : i32
    return %c0_i32, %c0_i32_0, %c0_i32_1 : i32, i32, i32
  }
  func.func @transform_6(%arg0: i32, %arg1: i32) -> (i32, i32, i32, i32) {
    %c0_i32 = arith.constant 0 : i32
    %c0_i32_0 = arith.constant 0 : i32
    %c0_i32_1 = arith.constant 0 : i32
    return %arg0, %c0_i32, %arg1, %c0_i32_0 : i32, i32, i32, i32
  }
  func.func @transform_7(%arg0: i32, %arg1: i32) -> (i32, i32, i32, i32) {
    %c0_i32 = arith.constant 0 : i32
    %c0_i32_0 = arith.constant 0 : i32
    %c0_i32_1 = arith.constant 0 : i32
    %c0_i32_2 = arith.constant 0 : i32
    return %arg0, %c0_i32, %c0_i32_0, %c0_i32_1 : i32, i32, i32, i32
  }
}

</mosaic_0001>

<bundles_post_ra>
// kernel: tpu_custom_call.1
= control target key start
LH: loop header
LB: loop body
LE: loop exit
PB: predicated region body
PF: predicated region fallthrough
CT: control target
= control target key end

     0   :  { %13 = vsyncpa [#allocation3], 0  ;;  %s6410_s0 = inlined_call_operand.vmem [shape: f32[2,4,16,16], index: 0, kind: input, shape index: {}]   ;;  %s6411_s1 = inlined_call_operand.vmem [shape: f32[2,4,6,6], index: 1, kind: input, shape index: {}]   ;;  %s6412_s2 = inlined_call_operand.vmem [shape: bf16[2,8,4], index: 2, kind: input, shape index: {}]   ;;  %s6413_s3 = inlined_call_operand.vmem [shape: f32[4,4], index: 3, kind: input, shape index: {}]   ;;  %s6414_s4 = inlined_call_operand.vmem [shape: f32[4,1], index: 4, kind: input, shape index: {}]   ;;  %s6415_s5 = inlined_call_operand.vmem [shape: bf16[2,16,8], index: 5, kind: input, shape index: {}]   ;;  %s6416_s6 = inlined_call_operand.hbm [shape: bf16[2,4,8,8], index: 6, kind: output, shape index: {0}]   ;;  %s6417_s7 = inlined_call_operand.vmem [shape: bf16[2,4,6,6], index: 7, kind: output, shape index: {1}]  }
   0x1   :  { %15 = vsyncpa [#allocation3 + $0x1], 0  ;;  %s5366_s24 = smov 0   ;;  %s5368_s25 = smov 0  }
   0x2   :  { %s5370_s26 = smov 0   ;;  %s5372_s27 = smov 0  }
   0x3   :  { %s5374_s28 = smov 0   ;;  %s5376_s29 = smov 0  }
   0x4 LB: > { %s4631_s30 = sadd.s32 4294967295, %s5316_s29   ;;  %s4632_s8 = sadd.s32 4294967294, %s5316_s29   ;;  %s5316_s29 = sphi %s5376_s29, %s21_s29   ;;  %s5312_s28 = sphi %s5374_s28, %s6450_s28   ;;  %s5308_s27 = sphi %s5372_s27, %s6449_s27   ;;  %s5304_s26 = sphi %s5370_s26, %s6448_s26   ;;  %s5300_s25 = sphi %s5368_s25, %s6447_s25   ;;  %s5296_s24 = sphi %s5366_s24, %s6446_s24  }
   0x5   : > { %s33_s9 = sadd.s32 1, %s5312_s28  ;;  %s180_s10 = sadd.s32 1, %s5304_s26 }
   0x6   : > { %p35_p0 = scmp.ge.s32.totalorder %s33_s9, 2  ;;  %p190_p1 = scmp.ne.s32.totalorder %s5304_s26, %s5300_s25 }
   0x7   : > { %p191_p2 = scmp.eq.s32.totalorder %s4631_s30, 1  ;;  %p196_p3 = scmp.ne.s32.totalorder %s5300_s25, %s5296_s24 }
   0x8   : > { %s6452_s9 = smov (%p35_p0, %s33_s9), 0  ;;  %p197_p5 = scmp.eq.s32.totalorder %s4632_s8, 1 }
   0x9   : > { %p5406_p4 = por %p191_p2, %p190_p1  ;;  %s175_s12 = ssub.s32 %s5312_s28, %s6452_s9 }
   0xa   : > { %p4635_p6 = scmp.ge.s32.totalorder %s5316_s29, 1  ;;  %p178_p7 = scmp.eq.s32.totalorder %s175_s12, 0 }
   0xb   : > { %p5413_p8 = por %p197_p5, %p196_p3  ;;  %p274_p9 = scmp.lt.s32.totalorder %s5316_s29, 3 }
   0xc   : > { %s5419_s14 = scalar_select %p178_p7, %s5304_s26, %s180_s10  }
   0xd   : > { %p275_p10 = pnand %p4635_p6, %p274_p9 }
   0xe   : > { %p321_p11 = scmp.lt.s32.totalorder (!%p275_p10), %s5308_s27, 1  ;;  %s4744_s12 = sshll.u32 (!%p275_p10), %s5308_s27, 8 }
   0xf   : > { %278 = sbr.rel (%p275_p10) target bundleno = 3562 (0xdea), region = 44  ;;  %s6183_s22 = scalar_lea.hbm (!%p275_p10), %s6416_s6, %s4744_s12 }
  0x14   : > { %v5318_v0 = vmov 0.0   ;;  %s5425_s15 = scalar_select %p321_p11, %s5308_s27, 1  ;;  %vm5319_vm0 = vmmov 0   ;;  %vm366_vm1 = vcmask 1041409   ;;  %vm369_vm2 = vcmask 1042434   ;;  %v5458_v22 = vld [vmem:[%s6415_s5] sm:$0xff]  }
  0x15   : > { %4853 = vmatprep.subr.bf16.mxu0 %v5318_v0  ;;  %4859 = vmatprep.subr.bf16.mxu1 %v5318_v0  ;;  %vm372_vm3 = vcmask 1043459   ;;  %vm379_vm4 = vcmask 1041408   ;;  %v5448_v21 = vld [vmem:[%s6412_s2] sm:$0xf]  ;;  %vm375_vm5 = vcmask 31744   ;;  %v5464_v23 = vld [vmem:[%s6415_s5 + $0x8] sm:$0xff]  }
  0x16   : > { %4855 = vmatprep.mubr.msk.bf16.mxu0 %vm5319_vm0, %v5318_v0  ;;  %4861 = vmatprep.mubr.msk.bf16.mxu1 %vm5319_vm0, %v5318_v0  ;;  %s4741_s16 = sshll.u32 %s5425_s15, 6  ;;  %vm432_vm6 = vcmask 130048   ;;  %v5489_v50 = vld [vmem:[%s6412_s2 + $0x4] sm:$0xf]  ;;  %vm749_vm7 = vcmask 57344   ;;  %vm1530_vm12 = vcmask 58369  }
  0x17   : > { %s5435_s19 = scalar_lea.vmem %s6410_s0, %s4741_s16  ;;  %4860 = vmatpush3.bf16.msra.mxu1 %v5464_v23  ;;  %s310_s16 = sand.u32 1, %s5300_s25   ;;  %vm750_vm8 = vsmask.f32 256  ;;  %vm1140_vm10 = vsmask.f32 7938 }
  0x18   : > { %v349_v1 = vld [vmem:[%s5435_s19] sm:$0x1]  ;;  %v350_v2 = vld [vmem:[%s5435_s19 + $0x10] sm:$0x1]  ;;  %4871 = vmatprep.subr.bf16.mxu1 %v5318_v0  ;;  %v526_v24 = vld [vmem:[%s5435_s19 + $0x11] sm:$0x1] }
  0x19   : > { %v351_v3 = vld [vmem:[%s5435_s19 + $0x20] sm:$0x1]  ;;  %v352_v4 = vld [vmem:[%s5435_s19 + $0x30] sm:$0x1]  ;;  %v353_v5 = vpack.c.bf16 %v349_v1, %v349_v1  ;;  %v354_v6 = vpack.c.bf16 %v350_v2, %v350_v2  ;;  %v527_v25 = vld [vmem:[%s5435_s19 + $0x21] sm:$0x1]  ;;  %v530_v26 = vpack.c.bf16 %v526_v24, %v526_v24 }
  0x1a   : > { %v355_v7 = vpack.c.bf16 %v351_v3, %v351_v3  ;;  %v356_v8 = vpack.c.bf16 %v352_v4, %v352_v4  ;;  %v525_v27 = vld [vmem:[%s5435_s19 + $0x1] sm:$0x1]  ;;  %v528_v28 = vld [vmem:[%s5435_s19 + $0x31] sm:$0x1]  ;;  %v531_v29 = vpack.c.bf16 %v527_v25, %v527_v25  ;;  %v765_v51 = vld [vmem:[%s5435_s19 + $0x12] sm:$0x1] }
  0x1b   : > { %v361_v9 = vunpack.c.l.b16 %v353_v5  ;;  %v362_v10 = vunpack.c.l.b16 %v354_v6  ;;  %v529_v30 = vpack.c.bf16 %v525_v27, %v525_v27  ;;  %v538_v31 = vunpack.c.l.b16 %v530_v26  ;;  %v766_v52 = vld [vmem:[%s5435_s19 + $0x22] sm:$0x1]  ;;  %v767_v55 = vld [vmem:[%s5435_s19 + $0x32] sm:$0x1]  ;;  %v920_v26 = vld [vmem:[%s5435_s19 + $0x13] sm:$0x1] }
  0x1c   : > { %v363_v11 = vunpack.c.l.b16 %v355_v7  ;;  %v364_v12 = vunpack.c.l.b16 %v356_v8  ;;  %v532_v32 = vpack.c.bf16 %v528_v28, %v528_v28  ;;  %v539_v33 = vunpack.c.l.b16 %v531_v29  ;;  %v764_v54 = vld [vmem:[%s5435_s19 + $0x2] sm:$0x1]  ;;  %v921_v27 = vld [vmem:[%s5435_s19 + $0x23] sm:$0x1]  ;;  %s4636_s17 = sshll.u32 %s310_s16, 4  ;;  %vm5541_vm9 = vmand %vm749_vm7, %vm750_vm8  ;;  %s4742_s20 = sshll.u32 %s5425_s15, 5 }
  0x1d   : > { %v365_v13 = vrot.slane %v362_v10, 7  ;;  %v537_v34 = vunpack.c.l.b16 %v529_v30  ;;  %v541_v35 = vrot.slane %v538_v31, 7  ;;  %v769_v53 = vpack.c.bf16 %v765_v51, %v765_v51  ;;  %v919_v29 = vld [vmem:[%s5435_s19 + $0x3] sm:$0x1]  ;;  %v922_v30 = vld [vmem:[%s5435_s19 + $0x33] sm:$0x1]  ;;  %vm5618_vm11 = vmand %vm749_vm7, %vm1140_vm10  ;;  %s6057_s23 = scalar_lea.vmem %s6411_s1, %s4742_s20 }
  0x1e   : > { %v368_v14 = vrot.slane %v363_v11, 6  ;;  %v371_v15 = vrot.slane %v364_v12, 5  ;;  %v540_v36 = vunpack.c.l.b16 %v532_v32  ;;  %v543_v37 = vrot.slane %v539_v33, 6  ;;  %s5545_s18 = scalar_lea.vmem [#allocation2], %s4636_s17  ;;  %s4743_s10 = sshll.u32 %s5425_s15, 4 }
  0x1f   : > { %v367_v16 = vsel %vm366_vm1, %v365_v13, %v361_v9  ;;  %v542_v38 = vsel %vm366_vm1, %v541_v35, %v537_v34  ;;  %v770_v56 = vpack.c.bf16 %v766_v52, %v766_v52  ;;  %v768_v57 = vpack.c.bf16 %v764_v54, %v764_v54  ;;  %s6166_s20 = scalar_lea.vmem %s6417_s7, %s4743_s10 }
  0x20   : > { %v370_v17 = vsel %vm369_vm2, %v368_v14, %v367_v16  ;;  %v545_v39 = vrot.slane %v540_v36, 5  ;;  %v544_v40 = vsel %vm369_vm2, %v543_v37, %v542_v38  ;;  %v777_v58 = vunpack.c.l.b16 %v769_v53 }
  0x21   : > { %v373_v18 = vsel %vm372_vm3, %v371_v15, %v370_v17  ;;  %v771_v59 = vpack.c.bf16 %v767_v55, %v767_v55  ;;  %v778_v60 = vunpack.c.l.b16 %v770_v56  ;;  %v776_v61 = vunpack.c.l.b16 %v768_v57 }
  0x22   : > { %v374_v19 = vpack.c.b16 %v373_v18, %v373_v18  ;;  %v546_v41 = vsel %vm372_vm3, %v545_v39, %v544_v40  ;;  %v780_v62 = vrot.slane %v777_v58, 7  ;;  %v924_v28 = vpack.c.bf16 %v920_v26, %v920_v26  ;;  %v758_v26 = vld [vmem:[%s5545_s18 + $0x8] sm:$0x1] }
  0x23   : > { %v547_v42 = vpack.c.b16 %v546_v41, %v546_v41  ;;  %v779_v63 = vunpack.c.l.b16 %v771_v59  ;;  %v782_v1 = vrot.slane %v778_v60, 6  ;;  %v925_v31 = vpack.c.bf16 %v921_v27, %v921_v27 }
  0x24   : > { %v381_v20 = vsel %vm379_vm4, %v374_v19, 0  ;;  %v781_v2 = vsel %vm366_vm1, %v780_v62, %v776_v61  ;;  %v923_v32 = vpack.c.bf16 %v919_v29, %v919_v29  ;;  %v932_v33 = vunpack.c.l.b16 %v924_v28 }
  0x25   : > { %4854 = vmatpush3.bf16.msra.mxu0 %v381_v20  ;;  %v552_v47 = vsel %vm379_vm4, %v547_v42, 0  ;;  %v784_v4 = vrot.slane %v779_v63, 5  ;;  %v783_v5 = vsel %vm369_vm2, %v782_v1, %v781_v2  ;;  %v926_v34 = vpack.c.bf16 %v922_v30, %v922_v30 }
  0x26   : > { %4865 = vmatprep.subr.bf16.mxu0 %v5318_v0  ;;  %v933_v35 = vunpack.c.l.b16 %v925_v31  ;;  %v931_v36 = vunpack.c.l.b16 %v923_v32  ;;  %v935_v37 = vrot.slane %v932_v33, 7  ;;  %v5320_v38 = vmov 1966171168   ;;  %v761_v32 = vld [vmem:[%s5545_s18 + $0xc] sm:$0x1] }
  0x27   : > { %v785_v11 = vsel %vm372_vm3, %v784_v4, %v783_v5  ;;  %v688_v39 = vunpack.c.l.s4 %v5320_v38  ;;  %v690_v40 = vlaneseq  ;;  %v934_v41 = vunpack.c.l.b16 %v926_v34  ;;  %v1156_v38 = vld [vmem:[%s5435_s19 + $0x24] sm:$0x1] }
  0x28   : > { %4856 = vmatmul.mubr.msk.bf16.vlgmr.msra.gmra.mxu0 %vm375_vm5, %v5448_v21  ;;  %v786_v14 = vpack.c.b16 %v785_v11, %v785_v11  ;;  %v937_v42 = vrot.slane %v933_v35, 6  ;;  %vm1531_vm13 = vsmask.f32 1280  ;;  %vm1921_vm15 = vsmask.f32 7942 }
  0x29   : > { %4867 = vmatprep.mubr.msk.bf16.mxu0 %vm5319_vm0, %v5318_v0  ;;  %4866 = vmatpush3.bf16.msra.mxu0 %v5458_v22  ;;  %vm5693_vm14 = vmand %vm1530_vm12, %vm1531_vm13 }
  0x2a   : > { %4877 = vmatprep.subr.bf16.mxu0 %v5318_v0  ;;  %v788_v18 = vsel %vm379_vm4, %v786_v14, 0  ;;  %vm5768_vm7 = vmand %vm1530_vm12, %vm1921_vm15 }
  0xe8   : > { %v417_v43 = vpop.f32.mrf.mxu0 }
  0xe9   : > { %v423_v44 = vpack.c.bf16 %v417_v43, %v417_v43  ;;  %v936_v43 = vsel %vm366_vm1, %v935_v37, %v931_v36  ;;  %v1155_v37 = vld [vmem:[%s5435_s19 + $0x14] sm:$0x1] }
  0xea   : > { %v4857_v45 = vpop.f32.mrf.mxu0  ;;  %v938_v51 = vsel %vm369_vm2, %v937_v42, %v936_v43  ;;  %v1160_v42 = vpack.c.bf16 %v1156_v38, %v1156_v38 }
  0xeb   : > { %v425_v46 = vrot.slane %v423_v44, 2  ;;  %4868 = vmatmul.mubr.msk.bf16.vlgmr.msra.gmra.mxu0 %vm432_vm6, %v423_v44  ;;  %v689_v44 = vunpack.c.0.s8 %v688_v39  ;;  %v691_v45 = vshrl.u32 %v690_v40, 7  ;;  %v1159_v39 = vpack.c.bf16 %v1155_v37, %v1155_v37  ;;  %v1154_v40 = vld [vmem:[%s5435_s19 + $0x4] sm:$0x1] }
  0xec   : > { %v420_v48 = vpop.f32.mrf.mxu0  ;;  %4878 = vmatpush3.bf16.msra.mxu0 %v5458_v22  ;;  %4879 = vmatprep.mubr.msk.bf16.mxu0 %vm5319_vm0, %v5318_v0  ;;  %v1158_v43 = vpack.c.bf16 %v1154_v40, %v1154_v40 }
  0xed   : > { %4862 = vmatmul.mubr.msk.bf16.vlgmr.msra.gmra.mxu1 %vm432_vm6, %v425_v46  ;;  %4889 = vmatprep.subr.bf16.mxu0 %v5318_v0  ;;  %v939_v46 = vrot.slane %v934_v41, 5  ;;  %v5321_v48 = vmov 286326784   ;;  %v5527_v56 = vsub.s32 %v689_v44, %v691_v45  ;;  %v1157_v41 = vld [vmem:[%s5435_s19 + $0x34] sm:$0x1]  ;;  %v1167_v44 = vunpack.c.l.b16 %v1159_v39 }
  0xee   : > { %4872 = vmatpush3.bf16.msra.mxu1 %v552_v47  ;;  %v4858_v49 = vpop.f32.mrf.mxu0  ;;  %4873 = vmatprep.mubr.msk.bf16.mxu1 %vm5319_vm0, %v5318_v0 }
  0xef   : > { %4883 = vmatprep.subr.bf16.mxu1 %v5318_v0  ;;  %v718_v49 = vunpack.c.l.s4 %v5321_v48  ;;  %v940_v57 = vsel %vm372_vm3, %v939_v46, %v938_v51  ;;  %v1168_v46 = vunpack.c.l.b16 %v1160_v42  ;;  %v1170_v48 = vrot.slane %v1167_v44, 7 }
  0xf0   : > { %v941_v1 = vpack.c.b16 %v940_v57, %v940_v57 }
  0xf1   : > { %v719_v58 = vunpack.c.0.s8 %v718_v49  ;;  %v1172_v51 = vrot.slane %v1168_v46, 6 }
  0xf5   : > { %4874 = vmatmul.mubr.msk.bf16.vlgmr.msra.gmra.mxu1 %vm375_vm5, %v5489_v50 }
  0xf6   : > { %4884 = vmatpush3.bf16.msra.mxu1 %v5464_v23  ;;  %4885 = vmatprep.mubr.msk.bf16.mxu1 %vm5319_vm0, %v5318_v0 }
  0xf7   : > { %4895 = vmatprep.subr.bf16.mxu1 %v5318_v0 }
 0x1ab   : > { %v519_v3 = vpop.f32.mrf.mxu0 }
 0x1ad   : > { %v470_v6 = vpop.f32.mrf.mxu1  ;;  %v4869_v7 = vpop.f32.mrf.mxu0 }
 0x1ae   : > { %v520_v8 = vadd.f32 %v519_v3, %v470_v6  ;;  %v5533_v3 = vsub.s32 %v719_v58, %v691_v45  ;;  %v1161_v45 = vpack.c.bf16 %v1157_v41, %v1157_v41 }
 0x1af   : > { %v4863_v9 = vpop.f32.mrf.mxu1  ;;  %v522_v10 = vpop.f32.mrf.mxu0 }
 0x1b0   : > { %v943_v10 = vsel %vm379_vm4, %v941_v1, 0  ;;  %v1169_v49 = vunpack.c.l.b16 %v1161_v45 }
 0x1b1   : > { %v473_v12 = vpop.f32.mrf.mxu1  ;;  %v4870_v13 = vpop.f32.mrf.mxu0 }
 0x1b3   : > { %v4864_v15 = vpop.f32.mrf.mxu1 }
 0x1b4   : > { %v1309_v15 = vld [vmem:[%s5435_s19 + $0x5] sm:$0x1] }
 0x1b5   : > { %v588_v16 = vpop.f32.mrf.mxu1 }
 0x1b6   : > { %v594_v17 = vpack.c.bf16 %v588_v16, %v588_v16  ;;  %v752_v16 = vld [vmem:[%s5545_s18] sm:$0x1] }
 0x1b7   : > { %v4875_v19 = vpop.f32.mrf.mxu1 }
 0x1b8   : > { %v640_v20 = vrot.slane %v594_v17, 2  ;;  %4880 = vmatmul.mubr.msk.bf16.vlgmr.msra.gmra.mxu0 %vm432_vm6, %v594_v17 }
 0x1b9   : > { %4890 = vmatpush3.bf16.msra.mxu0 %v788_v18  ;;  %v591_v24 = vpop.f32.mrf.mxu1  ;;  %4891 = vmatprep.mubr.msk.bf16.mxu0 %vm5319_vm0, %v5318_v0 }
 0x1ba   : > { %4886 = vmatmul.mubr.msk.bf16.vlgmr.msra.gmra.mxu1 %vm432_vm6, %v640_v20  ;;  %4901 = vmatprep.subr.bf16.mxu0 %v5318_v0 }
 0x1bb   : > { %v4876_v25 = vpop.f32.mrf.mxu1  ;;  %4896 = vmatpush3.bf16.msra.mxu1 %v5464_v23  ;;  %4897 = vmatprep.mubr.msk.bf16.mxu1 %vm5319_vm0, %v5318_v0 }
 0x1bc   : > { %4907 = vmatprep.subr.bf16.mxu1 %v5318_v0  ;;  %v755_v25 = vld [vmem:[%s5545_s18 + $0x4] sm:$0x1] }
 0x1c0   : > { %4892 = vmatmul.mubr.msk.bf16.vlgmr.msra.gmra.mxu0 %vm375_vm5, %v5448_v21 }
 0x1c1   : > { %4902 = vmatpush3.bf16.msra.mxu0 %v5458_v22  ;;  %4903 = vmatprep.mubr.msk.bf16.mxu0 %vm5319_vm0, %v5318_v0 }
 0x1c2   : > { %4913 = vmatprep.subr.bf16.mxu0 %v5318_v0 }
 0x278   : > { %v632_v47 = vpop.f32.mrf.mxu0 }
 0x279   : > { %v638_v52 = vadd.f32 %v632_v47, %v520_v8  ;;  %v1166_v47 = vunpack.c.l.b16 %v1158_v43 }
 0x27a   : > { %v4881_v53 = vpop.f32.mrf.mxu0  ;;  %v678_v54 = vpop.f32.mrf.mxu1 }
 0x27b   : > { %v684_v55 = vadd.f32 %v678_v54, %v638_v52  ;;  %v1171_v52 = vsel %vm366_vm1, %v1170_v48, %v1166_v47  ;;  %v1174_v54 = vrot.slane %v1169_v49, 5 }
 0x27c   : > { %v635_v59 = vpop.f32.mrf.mxu0  ;;  %v4887_v60 = vpop.f32.mrf.mxu1 }
 0x27d   : > { %v685_v61 = vpack.c.bf16 %v684_v55, %v684_v55  ;;  %v1173_v55 = vsel %vm369_vm2, %v1172_v51, %v1171_v52 }
 0x27e   : > { %v4882_v62 = vpop.f32.mrf.mxu0  ;;  %v681_v63 = vpop.f32.mrf.mxu1 }
 0x27f   : > { %v693_v2 = vrot.slane %v685_v61, %v5527_v56  ;;  %v1175_v62 = vsel %vm372_vm3, %v1174_v54, %v1173_v55 }
 0x280   : > { %v4888_v4 = vpop.f32.mrf.mxu1  ;;  %v824_v5 = vpop.f32.mrf.mxu0 }
 0x281   : > { %v694_v6 = vcombine.high %v693_v2, %v693_v2  ;;  %v701_v7 = vrot.slane %v693_v2, %v5527_v56  ;;  %v830_v8 = vpack.c.bf16 %v824_v5, %v824_v5  ;;  %v1176_v2 = vpack.c.b16 %v1175_v62, %v1175_v62 }
 0x282   : > { %v4893_v9 = vpop.f32.mrf.mxu0 }
 0x283   : > { %v708_v11 = vrot.slane %v694_v6, %v5527_v56  ;;  %v710_v12 = vunpack.i.h.s16 %v701_v7  ;;  %v4654_v13 = vpack.i.b16 %v701_v7, %v701_v7  ;;  %v832_v14 = vrot.slane %v830_v8, 2  ;;  %4904 = vmatmul.mubr.msk.bf16.vlgmr.msra.gmra.mxu0 %vm432_vm6, %v830_v8 }
 0x284   : > { %v827_v17 = vpop.f32.mrf.mxu0  ;;  %4914 = vmatpush3.bf16.msra.mxu0 %v5458_v22  ;;  %4915 = vmatprep.mubr.msk.bf16.mxu0 %vm5319_vm0, %v5318_v0  ;;  %v1178_v7 = vsel %vm379_vm4, %v1176_v2, 0 }
 0x285   : > { %v712_v18 = vunpack.i.h.s16 %v708_v11  ;;  %v714_v19 = vpack.i.b16 %v710_v12, %v710_v12  ;;  %v4655_v20 = vpack.i.b16 %v708_v11, %v708_v11  ;;  %v723_v24 = vrot.slane %v4654_v13, %v5533_v3  ;;  %4898 = vmatmul.mubr.msk.bf16.vlgmr.msra.gmra.mxu1 %vm432_vm6, %v832_v14  ;;  %4925 = vmatprep.subr.bf16.mxu0 %v5318_v0  ;;  %v1310_v12 = vld [vmem:[%s5435_s19 + $0x15] sm:$0x1]  ;;  %v1311_v13 = vld [vmem:[%s5435_s19 + $0x25] sm:$0x1] }
 0x286   : > { %4908 = vmatpush3.bf16.msra.mxu1 %v943_v10  ;;  %v4894_v27 = vpop.f32.mrf.mxu0  ;;  %4909 = vmatprep.mubr.msk.bf16.mxu1 %vm5319_vm0, %v5318_v0  ;;  %v1314_v14 = vpack.c.bf16 %v1310_v12, %v1310_v12  ;;  %v1315_v17 = vpack.c.bf16 %v1311_v13, %v1311_v13 }
 0x287   : > { %v716_v28 = vpack.i.b16 %v712_v18, %v712_v18  ;;  %v730_v29 = vrot.slane %v714_v19, %v5533_v3  ;;  %v737_v30 = vrot.slane %v4655_v20, %v5533_v3  ;;  %v753_v31 = vsel %vm5541_vm9, %v723_v24, %v752_v16  ;;  %4919 = vmatprep.subr.bf16.mxu1 %v5318_v0  ;;  %v1312_v16 = vld [vmem:[%s5435_s19 + $0x35] sm:$0x1] }
 0x288   : > { %754 = vst [vmem:[%s5545_s18] sm:$0x1] %v753_v31  ;;  %v1313_v18 = vpack.c.bf16 %v1309_v15, %v1309_v15  ;;  %v1322_v19 = vunpack.c.l.b16 %v1314_v14  ;;  %v1316_v20 = vpack.c.bf16 %v1312_v16, %v1312_v16  ;;  %v1323_v24 = vunpack.c.l.b16 %v1315_v17  ;;  %v1546_v15 = vld [vmem:[%s5435_s19 + $0x16] sm:$0x1]  ;;  %v1547_v16 = vld [vmem:[%s5435_s19 + $0x26] sm:$0x1] }
 0x289   : > { %v744_v33 = vrot.slane %v716_v28, %v5533_v3  ;;  %v756_v34 = vsel %vm5541_vm9, %v730_v29, %v755_v25  ;;  %v759_v35 = vsel %vm5541_vm9, %v737_v30, %v758_v26  ;;  %v1550_v17 = vpack.c.bf16 %v1546_v15, %v1546_v15 }
 0x28a   : > { %757 = vst [vmem:[%s5545_s18 + $0x4] sm:$0x1] %v756_v34  ;;  %760 = vst [vmem:[%s5545_s18 + $0x8] sm:$0x1] %v759_v35  ;;  %v1321_v25 = vunpack.c.l.b16 %v1313_v18  ;;  %v1325_v26 = vrot.slane %v1322_v19, 7  ;;  %v1324_v27 = vunpack.c.l.b16 %v1316_v20  ;;  %v1327_v28 = vrot.slane %v1323_v24, 6 }
 0x28b   : > { %v762_v36 = vsel %vm5541_vm9, %v744_v33, %v761_v32  ;;  %v1545_v18 = vld [vmem:[%s5435_s19 + $0x6] sm:$0x1]  ;;  %v1548_v19 = vld [vmem:[%s5435_s19 + $0x36] sm:$0x1]  ;;  %v1551_v20 = vpack.c.bf16 %v1547_v16, %v1547_v16  ;;  %vm2311_vm9 = vcmask 59394  }
 0x28c   : > { %763 = vst [vmem:[%s5545_s18 + $0xc] sm:$0x1] %v762_v36  ;;  %v1326_v29 = vsel %vm366_vm1, %v1325_v26, %v1321_v25  ;;  %v1329_v30 = vrot.slane %v1324_v27, 5  ;;  %v1549_v24 = vpack.c.bf16 %v1545_v18, %v1545_v18  ;;  %v1558_v25 = vunpack.c.l.b16 %v1550_v17 }
 0x28d   : > { %4910 = vmatmul.mubr.msk.bf16.vlgmr.msra.gmra.mxu1 %vm375_vm5, %v5489_v50  ;;  %v1328_v32 = vsel %vm369_vm2, %v1327_v28, %v1326_v29  ;;  %v1552_v26 = vpack.c.bf16 %v1548_v19, %v1548_v19  ;;  %v1559_v27 = vunpack.c.l.b16 %v1551_v20 }
 0x28e   : > { %4920 = vmatpush3.bf16.msra.mxu1 %v5464_v23  ;;  %4921 = vmatprep.mubr.msk.bf16.mxu1 %vm5319_vm0, %v5318_v0  ;;  %v1330_v37 = vsel %vm372_vm3, %v1329_v30, %v1328_v32  ;;  %v1557_v28 = vunpack.c.l.b16 %v1549_v24  ;;  %v1561_v29 = vrot.slane %v1558_v25, 7 }
 0x28f   : > { %4931 = vmatprep.subr.bf16.mxu1 %v5318_v0  ;;  %v1331_v43 = vpack.c.b16 %v1330_v37, %v1330_v37  ;;  %v1560_v30 = vunpack.c.l.b16 %v1552_v26 }
 0x290   : > { %v1562_v32 = vsel %vm366_vm1, %v1561_v29, %v1557_v28 }
 0x291   : > { %v1333_v52 = vsel %vm379_vm4, %v1331_v43, 0 }
 0x293   : > { %v1151_v13 = vld [vmem:[%s5545_s18 + $0xc] sm:$0x1] }
 0x343   : > { %v913_v53 = vpop.f32.mrf.mxu0 }
 0x345   : > { %v870_v57 = vpop.f32.mrf.mxu1  ;;  %v4905_v58 = vpop.f32.mrf.mxu0 }
 0x346   : > { %v914_v59 = vadd.f32 %v913_v53, %v870_v57  ;;  %v1700_v58 = vld [vmem:[%s5435_s19 + $0x7] sm:$0x1] }
 0x347   : > { %v4899_v60 = vpop.f32.mrf.mxu1  ;;  %v916_v61 = vpop.f32.mrf.mxu0 }
 0x349   : > { %v873_v63 = vpop.f32.mrf.mxu1  ;;  %v4906_v1 = vpop.f32.mrf.mxu0 }
 0x34a   : > { %v1142_v1 = vld [vmem:[%s5545_s18] sm:$0x1] }
 0x34b   : > { %v4900_v4 = vpop.f32.mrf.mxu1 }
 0x34d   : > { %v979_v5 = vpop.f32.mrf.mxu1 }
 0x34e   : > { %v985_v6 = vpack.c.bf16 %v979_v5, %v979_v5 }
 0x34f   : > { %v4911_v8 = vpop.f32.mrf.mxu1 }
 0x350   : > { %v1031_v9 = vrot.slane %v985_v6, 2  ;;  %4916 = vmatmul.mubr.msk.bf16.vlgmr.msra.gmra.mxu0 %vm432_vm6, %v985_v6  ;;  %v1145_v8 = vld [vmem:[%s5545_s18 + $0x4] sm:$0x1] }
 0x351   : > { %4926 = vmatpush3.bf16.msra.mxu0 %v1178_v7  ;;  %v982_v10 = vpop.f32.mrf.mxu1  ;;  %4927 = vmatprep.mubr.msk.bf16.mxu0 %vm5319_vm0, %v5318_v0 }
 0x352   : > { %4922 = vmatmul.mubr.msk.bf16.vlgmr.msra.gmra.mxu1 %vm432_vm6, %v1031_v9  ;;  %4937 = vmatprep.subr.bf16.mxu0 %v5318_v0  ;;  %v1148_v9 = vld [vmem:[%s5545_s18 + $0x8] sm:$0x1] }
 0x353   : > { %v4912_v11 = vpop.f32.mrf.mxu1  ;;  %4932 = vmatpush3.bf16.msra.mxu1 %v5464_v23  ;;  %4933 = vmatprep.mubr.msk.bf16.mxu1 %vm5319_vm0, %v5318_v0 }
 0x354   : > { %4943 = vmatprep.subr.bf16.mxu1 %v5318_v0 }
 0x358   : > { %4928 = vmatmul.mubr.msk.bf16.vlgmr.msra.gmra.mxu0 %vm375_vm5, %v5448_v21 }
 0x359   : > { %4938 = vmatpush3.bf16.msra.mxu0 %v5458_v22  ;;  %4939 = vmatprep.mubr.msk.bf16.mxu0 %vm5319_vm0, %v5318_v0 }
 0x35a   : > { %4949 = vmatprep.subr.bf16.mxu0 %v5318_v0 }
 0x410   : > { %v1023_v31 = vpop.f32.mrf.mxu0 }
 0x411   : > { %v1029_v33 = vadd.f32 %v1023_v31, %v914_v59  ;;  %v1563_v31 = vrot.slane %v1559_v27, 6 }
 0x412   : > { %v4917_v34 = vpop.f32.mrf.mxu0  ;;  %v1069_v35 = vpop.f32.mrf.mxu1 }
 0x413   : > { %v1075_v36 = vadd.f32 %v1069_v35, %v1029_v33  ;;  %v1565_v34 = vrot.slane %v1560_v30, 5  ;;  %v1564_v35 = vsel %vm369_vm2, %v1563_v31, %v1562_v32 }
 0x414   : > { %v1026_v38 = vpop.f32.mrf.mxu0  ;;  %v4923_v39 = vpop.f32.mrf.mxu1 }
 0x415   : > { %v1076_v40 = vpack.c.bf16 %v1075_v36, %v1075_v36 }
 0x416   : > { %v4918_v41 = vpop.f32.mrf.mxu0  ;;  %v1072_v42 = vpop.f32.mrf.mxu1 }
 0x417   : > { %v1084_v44 = vrot.slane %v1076_v40, %v5527_v56  ;;  %v1566_v41 = vsel %vm372_vm3, %v1565_v34, %v1564_v35 }
 0x418   : > { %v4924_v45 = vpop.f32.mrf.mxu1  ;;  %v1214_v46 = vpop.f32.mrf.mxu0 }
 0x419   : > { %v1085_v47 = vcombine.high %v1084_v44, %v1084_v44  ;;  %v1092_v48 = vrot.slane %v1084_v44, %v5527_v56  ;;  %v1220_v49 = vpack.c.bf16 %v1214_v46, %v1214_v46  ;;  %v1567_v44 = vpack.c.b16 %v1566_v41, %v1566_v41 }
 0x41a   : > { %v4929_v51 = vpop.f32.mrf.mxu0 }
 0x41b   : > { %v1099_v53 = vrot.slane %v1085_v47, %v5527_v56  ;;  %v1101_v54 = vunpack.i.h.s16 %v1092_v48  ;;  %v4662_v55 = vpack.i.b16 %v1092_v48, %v1092_v48  ;;  %v1222_v57 = vrot.slane %v1220_v49, 2  ;;  %4940 = vmatmul.mubr.msk.bf16.vlgmr.msra.gmra.mxu0 %vm432_vm6, %v1220_v49 }
 0x41c   : > { %v1217_v59 = vpop.f32.mrf.mxu0  ;;  %4950 = vmatpush3.bf16.msra.mxu0 %v5458_v22  ;;  %4951 = vmatprep.mubr.msk.bf16.mxu0 %vm5319_vm0, %v5318_v0  ;;  %v1569_v48 = vsel %vm379_vm4, %v1567_v44, 0  ;;  %v1536_v44 = vld [vmem:[%s5545_s18 + $0x4] sm:$0x2] }
 0x41d   : > { %v1103_v60 = vunpack.i.h.s16 %v1099_v53  ;;  %v1105_v61 = vpack.i.b16 %v1101_v54, %v1101_v54  ;;  %v4663_v62 = vpack.i.b16 %v1099_v53, %v1099_v53  ;;  %v1114_v63 = vrot.slane %v4662_v55, %v5533_v3  ;;  %4934 = vmatmul.mubr.msk.bf16.vlgmr.msra.gmra.mxu1 %vm432_vm6, %v1222_v57  ;;  %4961 = vmatprep.subr.bf16.mxu0 %v5318_v0  ;;  %v1701_v54 = vld [vmem:[%s5435_s19 + $0x17] sm:$0x1]  ;;  %v1702_v55 = vld [vmem:[%s5435_s19 + $0x27] sm:$0x1] }
 0x41e   : > { %4944 = vmatpush3.bf16.msra.mxu1 %v1333_v52  ;;  %v4930_v2 = vpop.f32.mrf.mxu0  ;;  %4945 = vmatprep.mubr.msk.bf16.mxu1 %vm5319_vm0, %v5318_v0  ;;  %v1705_v57 = vpack.c.bf16 %v1701_v54, %v1701_v54  ;;  %v1703_v59 = vld [vmem:[%s5435_s19 + $0x37] sm:$0x1] }
 0x41f   : > { %v1107_v4 = vpack.i.b16 %v1103_v60, %v1103_v60  ;;  %v1121_v5 = vrot.slane %v1105_v61, %v5533_v3  ;;  %v1128_v6 = vrot.slane %v4663_v62, %v5533_v3  ;;  %v1143_v7 = vsel %vm5618_vm11, %v1114_v63, %v1142_v1  ;;  %4955 = vmatprep.subr.bf16.mxu1 %v5318_v0 }
 0x420   : > { %1144 = vst [vmem:[%s5545_s18] sm:$0x1] %v1143_v7  ;;  %v1706_v60 = vpack.c.bf16 %v1702_v55, %v1702_v55  ;;  %v1704_v61 = vpack.c.bf16 %v1700_v58, %v1700_v58  ;;  %v1713_v62 = vunpack.c.l.b16 %v1705_v57  ;;  %v1707_v63 = vpack.c.bf16 %v1703_v59, %v1703_v59  ;;  %v1936_v58 = vld [vmem:[%s5435_s19 + $0x18] sm:$0x1]  ;;  %v1937_v59 = vld [vmem:[%s5435_s19 + $0x28] sm:$0x1] }
 0x421   : > { %v1135_v10 = vrot.slane %v1107_v4, %v5533_v3  ;;  %v1146_v11 = vsel %vm5618_vm11, %v1121_v5, %v1145_v8  ;;  %v1149_v12 = vsel %vm5618_vm11, %v1128_v6, %v1148_v9 }
 0x422   : > { %1147 = vst [vmem:[%s5545_s18 + $0x4] sm:$0x1] %v1146_v11  ;;  %1150 = vst [vmem:[%s5545_s18 + $0x8] sm:$0x1] %v1149_v12  ;;  %v1714_v1 = vunpack.c.l.b16 %v1706_v60  ;;  %v1712_v2 = vunpack.c.l.b16 %v1704_v61  ;;  %v1716_v4 = vrot.slane %v1713_v62, 7  ;;  %v1715_v5 = vunpack.c.l.b16 %v1707_v63 }
 0x423   : > { %v1152_v14 = vsel %vm5618_vm11, %v1135_v10, %v1151_v13  ;;  %v1940_v60 = vpack.c.bf16 %v1936_v58, %v1936_v58  ;;  %v1935_v61 = vld [vmem:[%s5435_s19 + $0x8] sm:$0x1]  ;;  %v1938_v62 = vld [vmem:[%s5435_s19 + $0x38] sm:$0x1]  ;;  %v1941_v63 = vpack.c.bf16 %v1937_v59, %v1937_v59  ;;  %vm2312_vm11 = vsmask.f32 2304 }
 0x424   : > { %1153 = vst [vmem:[%s5545_s18 + $0xc] sm:$0x1] %v1152_v14  ;;  %v1718_v6 = vrot.slane %v1714_v1, 6  ;;  %v1717_v7 = vsel %vm366_vm1, %v1716_v4, %v1712_v2  ;;  %v1720_v8 = vrot.slane %v1715_v5, 5  ;;  %v1939_v1 = vpack.c.bf16 %v1935_v61, %v1935_v61  ;;  %vm5863_vm12 = vmand %vm2311_vm9, %vm2312_vm11 }
 0x425   : > { %4946 = vmatmul.mubr.msk.bf16.vlgmr.msra.gmra.mxu1 %vm375_vm5, %v5489_v50  ;;  %v1948_v2 = vunpack.c.l.b16 %v1940_v60  ;;  %v1942_v4 = vpack.c.bf16 %v1938_v62, %v1938_v62  ;;  %v1949_v5 = vunpack.c.l.b16 %v1941_v63 }
 0x426   : > { %4956 = vmatpush3.bf16.msra.mxu1 %v5464_v23  ;;  %4957 = vmatprep.mubr.msk.bf16.mxu1 %vm5319_vm0, %v5318_v0  ;;  %v1719_v10 = vsel %vm369_vm2, %v1718_v6, %v1717_v7  ;;  %v1947_v6 = vunpack.c.l.b16 %v1939_v1 }
 0x427   : > { %4967 = vmatprep.subr.bf16.mxu1 %v5318_v0  ;;  %v1721_v15 = vsel %vm372_vm3, %v1720_v8, %v1719_v10  ;;  %v1951_v7 = vrot.slane %v1948_v2, 7  ;;  %v1953_v8 = vrot.slane %v1949_v5, 6 }
 0x428   : > { %v1722_v24 = vpack.c.b16 %v1721_v15, %v1721_v15 }
 0x42a   : > { %v1724_v32 = vsel %vm379_vm4, %v1722_v24, 0 }
 0x4db   : > { %v1303_v33 = vpop.f32.mrf.mxu0 }
 0x4dd   : > { %v1260_v36 = vpop.f32.mrf.mxu1  ;;  %v4941_v37 = vpop.f32.mrf.mxu0 }
 0x4de   : > { %v1304_v38 = vadd.f32 %v1303_v33, %v1260_v36 }
 0x4df   : > { %v4935_v39 = vpop.f32.mrf.mxu1  ;;  %v1306_v40 = vpop.f32.mrf.mxu0 }
 0x4e1   : > { %v1263_v42 = vpop.f32.mrf.mxu1  ;;  %v4942_v43 = vpop.f32.mrf.mxu0 }
 0x4e3   : > { %v4936_v45 = vpop.f32.mrf.mxu1 }
 0x4e4   : > { %v1539_v45 = vld [vmem:[%s5545_s18 + $0x8] sm:$0x2] }
 0x4e5   : > { %v1369_v46 = vpop.f32.mrf.mxu1 }
 0x4e6   : > { %v1375_v47 = vpack.c.bf16 %v1369_v46, %v1369_v46 }
 0x4e7   : > { %v4947_v49 = vpop.f32.mrf.mxu1 }
 0x4e8   : > { %v1421_v51 = vrot.slane %v1375_v47, 2  ;;  %4952 = vmatmul.mubr.msk.bf16.vlgmr.msra.gmra.mxu0 %vm432_vm6, %v1375_v47 }
 0x4e9   : > { %4962 = vmatpush3.bf16.msra.mxu0 %v1569_v48  ;;  %v1372_v52 = vpop.f32.mrf.mxu1  ;;  %4963 = vmatprep.mubr.msk.bf16.mxu0 %vm5319_vm0, %v5318_v0 }
 0x4ea   : > { %4958 = vmatmul.mubr.msk.bf16.vlgmr.msra.gmra.mxu1 %vm432_vm6, %v1421_v51  ;;  %4973 = vmatprep.subr.bf16.mxu0 %v5318_v0  ;;  %v1542_v52 = vld [vmem:[%s5545_s18 + $0xc] sm:$0x2] }
 0x4eb   : > { %v4948_v53 = vpop.f32.mrf.mxu1  ;;  %4968 = vmatpush3.bf16.msra.mxu1 %v5464_v23  ;;  %4969 = vmatprep.mubr.msk.bf16.mxu1 %vm5319_vm0, %v5318_v0 }
 0x4ec   : > { %4979 = vmatprep.subr.bf16.mxu1 %v5318_v0 }
 0x4f0   : > { %4964 = vmatmul.mubr.msk.bf16.vlgmr.msra.gmra.mxu0 %vm375_vm5, %v5448_v21 }
 0x4f1   : > { %4974 = vmatpush3.bf16.msra.mxu0 %v5458_v22  ;;  %4975 = vmatprep.mubr.msk.bf16.mxu0 %vm5319_vm0, %v5318_v0 }
 0x4f2   : > { %4985 = vmatprep.subr.bf16.mxu0 %v5318_v0 }
 0x5a8   : > { %v1413_v9 = vpop.f32.mrf.mxu0 }
 0x5a9   : > { %v1419_v11 = vadd.f32 %v1413_v9, %v1304_v38  ;;  %v1533_v38 = vld [vmem:[%s5545_s18] sm:$0x2]  ;;  %v1952_v9 = vsel %vm366_vm1, %v1951_v7, %v1947_v6 }
 0x5aa   : > { %v4953_v12 = vpop.f32.mrf.mxu0  ;;  %v1459_v13 = vpop.f32.mrf.mxu1 }
 0x5ab   : > { %v1465_v14 = vadd.f32 %v1459_v13, %v1419_v11  ;;  %v1954_v12 = vsel %vm369_vm2, %v1953_v8, %v1952_v9 }
 0x5ac   : > { %v1416_v16 = vpop.f32.mrf.mxu0  ;;  %v4959_v17 = vpop.f32.mrf.mxu1 }
 0x5ad   : > { %v1466_v18 = vpack.c.bf16 %v1465_v14, %v1465_v14 }
 0x5ae   : > { %v4954_v19 = vpop.f32.mrf.mxu0  ;;  %v1462_v20 = vpop.f32.mrf.mxu1 }
 0x5af   : > { %v1474_v25 = vrot.slane %v1466_v18, %v5527_v56 }
 0x5b0   : > { %v4960_v26 = vpop.f32.mrf.mxu1  ;;  %v1605_v27 = vpop.f32.mrf.mxu0 }
 0x5b1   : > { %v1475_v28 = vcombine.high %v1474_v25, %v1474_v25  ;;  %v1482_v29 = vrot.slane %v1474_v25, %v5527_v56  ;;  %v1611_v30 = vpack.c.bf16 %v1605_v27, %v1605_v27 }
 0x5b2   : > { %v4965_v31 = vpop.f32.mrf.mxu0 }
 0x5b3   : > { %v1489_v33 = vrot.slane %v1475_v28, %v5527_v56  ;;  %v1491_v34 = vunpack.i.h.s16 %v1482_v29  ;;  %v4670_v35 = vpack.i.b16 %v1482_v29, %v1482_v29  ;;  %v1613_v36 = vrot.slane %v1611_v30, 2  ;;  %4976 = vmatmul.mubr.msk.bf16.vlgmr.msra.gmra.mxu0 %vm432_vm6, %v1611_v30 }
 0x5b4   : > { %v1608_v39 = vpop.f32.mrf.mxu0  ;;  %4986 = vmatpush3.bf16.msra.mxu0 %v5458_v22  ;;  %4987 = vmatprep.mubr.msk.bf16.mxu0 %vm5319_vm0, %v5318_v0 }
 0x5b5   : > { %v1493_v40 = vunpack.i.h.s16 %v1489_v33  ;;  %v1495_v41 = vpack.i.b16 %v1491_v34, %v1491_v34  ;;  %v4671_v42 = vpack.i.b16 %v1489_v33, %v1489_v33  ;;  %v1504_v43 = vrot.slane %v4670_v35, %v5533_v3  ;;  %4970 = vmatmul.mubr.msk.bf16.vlgmr.msra.gmra.mxu1 %vm432_vm6, %v1613_v36  ;;  %4997 = vmatprep.subr.bf16.mxu0 %v5318_v0  ;;  %v2091_v33 = vld [vmem:[%s5435_s19 + $0x19] sm:$0x1]  ;;  %v2092_v34 = vld [vmem:[%s5435_s19 + $0x29] sm:$0x1] }
 0x5b6   : > { %4980 = vmatpush3.bf16.msra.mxu1 %v1724_v32  ;;  %v4966_v46 = vpop.f32.mrf.mxu0  ;;  %4981 = vmatprep.mubr.msk.bf16.mxu1 %vm5319_vm0, %v5318_v0  ;;  %v2095_v35 = vpack.c.bf16 %v2091_v33, %v2091_v33  ;;  %v2090_v36 = vld [vmem:[%s5435_s19 + $0x9] sm:$0x1]  ;;  %v2096_v37 = vpack.c.bf16 %v2092_v34, %v2092_v34  ;;  %v5808_v33 = vld [vmem:[%s6412_s2 + $0x4] sm:$0xf] }
 0x5b7   : > { %v1497_v47 = vpack.i.b16 %v1493_v40, %v1493_v40  ;;  %v1511_v48 = vrot.slane %v1495_v41, %v5533_v3  ;;  %v1518_v49 = vrot.slane %v4671_v42, %v5533_v3  ;;  %v1534_v51 = vsel %vm5693_vm14, %v1504_v43, %v1533_v38  ;;  %4991 = vmatprep.subr.bf16.mxu1 %v5318_v0  ;;  %v5815_v34 = vld [vmem:[%s6415_s5 + $0x8] sm:$0xff]  }
 0x5b8   : > { %1535 = vst [vmem:[%s5545_s18] sm:$0x2] %v1534_v51  ;;  %v2094_v38 = vpack.c.bf16 %v2090_v36, %v2090_v36  ;;  %v2103_v39 = vunpack.c.l.b16 %v2095_v35  ;;  %v2104_v41 = vunpack.c.l.b16 %v2096_v37  ;;  %v2327_v35 = vld [vmem:[%s5435_s19 + $0x1a] sm:$0x1]  ;;  %v2328_v36 = vld [vmem:[%s5435_s19 + $0x2a] sm:$0x1] }
 0x5b9   : > { %v1525_v53 = vrot.slane %v1497_v47, %v5533_v3  ;;  %v1537_v54 = vsel %vm5693_vm14, %v1511_v48, %v1536_v44  ;;  %v1540_v55 = vsel %vm5693_vm14, %v1518_v49, %v1539_v45  ;;  %v2326_v37 = vld [vmem:[%s5435_s19 + $0xa] sm:$0x1] }
 0x5ba   : > { %1538 = vst [vmem:[%s5545_s18 + $0x4] sm:$0x2] %v1537_v54  ;;  %1541 = vst [vmem:[%s5545_s18 + $0x8] sm:$0x2] %v1540_v55  ;;  %v2102_v42 = vunpack.c.l.b16 %v2094_v38  ;;  %v2106_v43 = vrot.slane %v2103_v39, 7  ;;  %v2108_v44 = vrot.slane %v2104_v41, 6  ;;  %v2332_v39 = vpack.c.bf16 %v2328_v36, %v2328_v36 }
 0x5bb   : > { %v1543_v57 = vsel %vm5693_vm14, %v1525_v53, %v1542_v52  ;;  %v2329_v38 = vld [vmem:[%s5435_s19 + $0x3a] sm:$0x1]  ;;  %vm2702_vm14 = vsmask.f32 7946 }
 0x5bc   : > { %1544 = vst [vmem:[%s5545_s18 + $0xc] sm:$0x2] %v1543_v57 }
 0x5bd   : > { %4982 = vmatmul.mubr.msk.bf16.vlgmr.msra.gmra.mxu1 %vm375_vm5, %v5489_v50  ;;  %v1950_v50 = vunpack.c.l.b16 %v1942_v4 }
 0x5be   : > { %4992 = vmatpush3.bf16.msra.mxu1 %v5464_v23  ;;  %4993 = vmatprep.mubr.msk.bf16.mxu1 %vm5319_vm0, %v5318_v0 }
 0x5bf   : > { %5003 = vmatprep.subr.bf16.mxu1 %v5318_v0  ;;  %v1955_v11 = vrot.slane %v1950_v50, 5 }
 0x5c1   : > { %v1956_v18 = vsel %vm372_vm3, %v1955_v11, %v1954_v12  ;;  %v5775_v12 = vld [vmem:[%s6415_s5] sm:$0xff]  }
 0x5c2   : > { %v1957_v24 = vpack.c.b16 %v1956_v18, %v1956_v18 }
 0x5c4   : > { %v1959_v28 = vsel %vm379_vm4, %v1957_v24, 0 }
 0x673   : > { %v1694_v10 = vpop.f32.mrf.mxu0 }
 0x675   : > { %v1651_v13 = vpop.f32.mrf.mxu1  ;;  %v4977_v14 = vpop.f32.mrf.mxu0 }
 0x676   : > { %v1695_v15 = vadd.f32 %v1694_v10, %v1651_v13  ;;  %v2481_v10 = vld [vmem:[%s5435_s19 + $0xb] sm:$0x1] }
 0x677   : > { %v4971_v16 = vpop.f32.mrf.mxu1  ;;  %v1697_v17 = vpop.f32.mrf.mxu0 }
 0x678   : > { %v1923_v17 = vld [vmem:[%s5545_s18] sm:$0x2] }
 0x679   : > { %v1654_v19 = vpop.f32.mrf.mxu1  ;;  %v4978_v20 = vpop.f32.mrf.mxu0 }
 0x67b   : > { %v4972_v25 = vpop.f32.mrf.mxu1 }
 0x67d   : > { %v1760_v26 = vpop.f32.mrf.mxu1 }
 0x67e   : > { %v1766_v27 = vpack.c.bf16 %v1760_v26, %v1760_v26  ;;  %v1926_v26 = vld [vmem:[%s5545_s18 + $0x4] sm:$0x2] }
 0x67f   : > { %v4983_v29 = vpop.f32.mrf.mxu1 }
 0x680   : > { %v1812_v30 = vrot.slane %v1766_v27, 2  ;;  %4988 = vmatmul.mubr.msk.bf16.vlgmr.msra.gmra.mxu0 %vm432_vm6, %v1766_v27  ;;  %v1929_v27 = vld [vmem:[%s5545_s18 + $0x8] sm:$0x2] }
 0x681   : > { %4998 = vmatpush3.bf16.msra.mxu0 %v1959_v28  ;;  %v1763_v31 = vpop.f32.mrf.mxu1  ;;  %4999 = vmatprep.mubr.msk.bf16.mxu0 %vm5319_vm0, %v5318_v0 }
 0x682   : > { %4994 = vmatmul.mubr.msk.bf16.vlgmr.msra.gmra.mxu1 %vm432_vm6, %v1812_v30  ;;  %5009 = vmatprep.subr.bf16.mxu0 %v5318_v0  ;;  %v1932_v31 = vld [vmem:[%s5545_s18 + $0xc] sm:$0x2] }
 0x683   : > { %v4984_v32 = vpop.f32.mrf.mxu1  ;;  %5004 = vmatpush3.bf16.msra.mxu1 %v5464_v23  ;;  %5005 = vmatprep.mubr.msk.bf16.mxu1 %vm5319_vm0, %v5318_v0  ;;  %v2093_v23 = vld [vmem:[%s5435_s19 + $0x39] sm:$0x1] }
 0x684   : > { %5015 = vmatprep.subr.bf16.mxu1 %v5318_v0  ;;  %v2097_v40 = vpack.c.bf16 %v2093_v23, %v2093_v23  ;;  %v2331_v23 = vpack.c.bf16 %v2327_v35, %v2327_v35 }
 0x686   : > { %v2339_v41 = vunpack.c.l.b16 %v2331_v23 }
 0x688   : > { %5000 = vmatmul.mubr.msk.bf16.vlgmr.msra.gmra.mxu0 %vm375_vm5, %v5448_v21  ;;  %v2105_v21 = vunpack.c.l.b16 %v2097_v40  ;;  %v2330_v40 = vpack.c.bf16 %v2326_v37, %v2326_v37 }
 0x689   : > { %5010 = vmatpush3.bf16.msra.mxu0 %v5458_v22  ;;  %5011 = vmatprep.mubr.msk.bf16.mxu0 %vm5319_vm0, %v5318_v0  ;;  %v2107_v22 = vsel %vm366_vm1, %v2106_v43, %v2102_v42  ;;  %v2333_v42 = vpack.c.bf16 %v2329_v38, %v2329_v38  ;;  %v2340_v43 = vunpack.c.l.b16 %v2332_v39 }
 0x68a   : > { %5021 = vmatprep.subr.bf16.mxu0 %v5318_v0  ;;  %v2110_v45 = vrot.slane %v2105_v21, 5  ;;  %v2109_v47 = vsel %vm369_vm2, %v2108_v44, %v2107_v22  ;;  %v2338_v21 = vunpack.c.l.b16 %v2330_v40  ;;  %v2342_v44 = vrot.slane %v2339_v41, 7 }
 0x68b   : > { %v2341_v22 = vunpack.c.l.b16 %v2333_v42 }
 0x68c   : > { %v2111_v53 = vsel %vm372_vm3, %v2110_v45, %v2109_v47  ;;  %v2344_v45 = vrot.slane %v2340_v43, 6 }
 0x68d   : > { %v2112_v60 = vpack.c.b16 %v2111_v53, %v2111_v53 }
 0x68f   : > { %v2114_v6 = vsel %vm379_vm4, %v2112_v60, 0 }
 0x740   : > { %v1804_v46 = vpop.f32.mrf.mxu0 }
 0x741   : > { %v1810_v48 = vadd.f32 %v1804_v46, %v1695_v15  ;;  %v2343_v46 = vsel %vm366_vm1, %v2342_v44, %v2338_v21 }
 0x742   : > { %v4989_v49 = vpop.f32.mrf.mxu0  ;;  %v1850_v51 = vpop.f32.mrf.mxu1 }
 0x743   : > { %v1856_v52 = vadd.f32 %v1850_v51, %v1810_v48  ;;  %v2346_v48 = vrot.slane %v2341_v22, 5  ;;  %v2345_v49 = vsel %vm369_vm2, %v2344_v45, %v2343_v46 }
 0x744   : > { %v1807_v54 = vpop.f32.mrf.mxu0  ;;  %v4995_v55 = vpop.f32.mrf.mxu1 }
 0x745   : > { %v1857_v57 = vpack.c.bf16 %v1856_v52, %v1856_v52 }
 0x746   : > { %v4990_v58 = vpop.f32.mrf.mxu0  ;;  %v1853_v59 = vpop.f32.mrf.mxu1 }
 0x747   : > { %v1865_v61 = vrot.slane %v1857_v57, %v5527_v56  ;;  %v2347_v57 = vsel %vm372_vm3, %v2346_v48, %v2345_v49 }
 0x748   : > { %v4996_v62 = vpop.f32.mrf.mxu1  ;;  %v1995_v63 = vpop.f32.mrf.mxu0  ;;  %v2348_v60 = vpack.c.b16 %v2347_v57, %v2347_v57 }
 0x749   : > { %v1866_v1 = vcombine.high %v1865_v61, %v1865_v61  ;;  %v1873_v2 = vrot.slane %v1865_v61, %v5527_v56  ;;  %v2001_v4 = vpack.c.bf16 %v1995_v63, %v1995_v63 }
 0x74a   : > { %v5001_v5 = vpop.f32.mrf.mxu0 }
 0x74b   : > { %v1880_v7 = vrot.slane %v1866_v1, %v5527_v56  ;;  %v1882_v50 = vunpack.i.h.s16 %v1873_v2  ;;  %v4678_v8 = vpack.i.b16 %v1873_v2, %v1873_v2  ;;  %v2003_v9 = vrot.slane %v2001_v4, 2  ;;  %5012 = vmatmul.mubr.msk.bf16.vlgmr.msra.gmra.mxu0 %vm432_vm6, %v2001_v4 }
 0x74c   : > { %v1998_v11 = vpop.f32.mrf.mxu0  ;;  %5022 = vmatpush3.bf16.msra.mxu0 %v5775_v12  ;;  %5023 = vmatprep.mubr.msk.bf16.mxu0 %vm5319_vm0, %v5318_v0  ;;  %v2350_v1 = vsel %vm379_vm4, %v2348_v60, 0  ;;  %v2317_v60 = vld [vmem:[%s5545_s18 + $0x4] sm:$0x4] }
 0x74d   : > { %v1884_v13 = vunpack.i.h.s16 %v1880_v7  ;;  %v1886_v14 = vpack.i.b16 %v1882_v50, %v1882_v50  ;;  %v4679_v15 = vpack.i.b16 %v1880_v7, %v1880_v7  ;;  %v1895_v16 = vrot.slane %v4678_v8, %v5533_v3  ;;  %5006 = vmatmul.mubr.msk.bf16.vlgmr.msra.gmra.mxu1 %vm432_vm6, %v2003_v9  ;;  %5033 = vmatprep.subr.bf16.mxu0 %v5318_v0  ;;  %v5841_v7 = vld [vmem:[%s6412_s2] sm:$0xf]  ;;  %v2482_v50 = vld [vmem:[%s5435_s19 + $0x1b] sm:$0x1]  ;;  %v2483_v8 = vld [vmem:[%s5435_s19 + $0x2b] sm:$0x1] }
 0x74e   : > { %5016 = vmatpush3.bf16.msra.mxu1 %v2114_v6  ;;  %v5002_v18 = vpop.f32.mrf.mxu0  ;;  %5017 = vmatprep.mubr.msk.bf16.mxu1 %vm5319_vm0, %v5318_v0  ;;  %v2486_v9 = vpack.c.bf16 %v2482_v50, %v2482_v50  ;;  %v2484_v11 = vld [vmem:[%s5435_s19 + $0x3b] sm:$0x1] }
 0x74f   : > { %v1888_v19 = vpack.i.b16 %v1884_v13, %v1884_v13  ;;  %v1902_v20 = vrot.slane %v1886_v14, %v5533_v3  ;;  %v1909_v24 = vrot.slane %v4679_v15, %v5533_v3  ;;  %v1924_v25 = vsel %vm5768_vm7, %v1895_v16, %v1923_v17  ;;  %5027 = vmatprep.subr.bf16.mxu1 %v5318_v0 }
 0x750   : > { %1925 = vst [vmem:[%s5545_s18] sm:$0x2] %v1924_v25  ;;  %v2487_v13 = vpack.c.bf16 %v2483_v8, %v2483_v8  ;;  %v2485_v14 = vpack.c.bf16 %v2481_v10, %v2481_v10  ;;  %v2494_v15 = vunpack.c.l.b16 %v2486_v9  ;;  %v2488_v16 = vpack.c.bf16 %v2484_v11, %v2484_v11  ;;  %v2717_v10 = vld [vmem:[%s5435_s19 + $0x1c] sm:$0x1]  ;;  %v2718_v11 = vld [vmem:[%s5435_s19 + $0x2c] sm:$0x1] }
 0x751   : > { %v1916_v28 = vrot.slane %v1888_v19, %v5533_v3  ;;  %v1927_v29 = vsel %vm5768_vm7, %v1902_v20, %v1926_v26  ;;  %v1930_v30 = vsel %vm5768_vm7, %v1909_v24, %v1929_v27 }
 0x752   : > { %1928 = vst [vmem:[%s5545_s18 + $0x4] sm:$0x2] %v1927_v29  ;;  %1931 = vst [vmem:[%s5545_s18 + $0x8] sm:$0x2] %v1930_v30  ;;  %v2495_v17 = vunpack.c.l.b16 %v2487_v13  ;;  %v2493_v18 = vunpack.c.l.b16 %v2485_v14  ;;  %v2497_v19 = vrot.slane %v2494_v15, 7  ;;  %v2496_v20 = vunpack.c.l.b16 %v2488_v16 }
 0x753   : > { %v1933_v32 = vsel %vm5768_vm7, %v1916_v28, %v1932_v31  ;;  %v2721_v13 = vpack.c.bf16 %v2717_v10, %v2717_v10  ;;  %v2716_v14 = vld [vmem:[%s5435_s19 + $0xc] sm:$0x1]  ;;  %v2719_v15 = vld [vmem:[%s5435_s19 + $0x3c] sm:$0x1]  ;;  %v2722_v16 = vpack.c.bf16 %v2718_v11, %v2718_v11  ;;  %vm5938_vm7 = vmand %vm2311_vm9, %vm2702_vm14  ;;  %vm3092_vm9 = vcmask 60419  }
 0x754   : > { %1934 = vst [vmem:[%s5545_s18 + $0xc] sm:$0x2] %v1933_v32  ;;  %v2499_v24 = vrot.slane %v2495_v17, 6  ;;  %v2498_v25 = vsel %vm366_vm1, %v2497_v19, %v2493_v18  ;;  %v2501_v26 = vrot.slane %v2496_v20, 5  ;;  %v2720_v17 = vpack.c.bf16 %v2716_v14, %v2716_v14 }
 0x755   : > { %5018 = vmatmul.mubr.msk.bf16.vlgmr.msra.gmra.mxu1 %vm375_vm5, %v5808_v33  ;;  %v2729_v18 = vunpack.c.l.b16 %v2721_v13  ;;  %v2723_v19 = vpack.c.bf16 %v2719_v15, %v2719_v15  ;;  %v2730_v20 = vunpack.c.l.b16 %v2722_v16 }
 0x756   : > { %5028 = vmatpush3.bf16.msra.mxu1 %v5815_v34  ;;  %5029 = vmatprep.mubr.msk.bf16.mxu1 %vm5319_vm0, %v5318_v0  ;;  %v2500_v28 = vsel %vm369_vm2, %v2499_v24, %v2498_v25  ;;  %v2728_v24 = vunpack.c.l.b16 %v2720_v17 }
 0x757   : > { %5039 = vmatprep.subr.bf16.mxu1 %v5318_v0  ;;  %v2502_v35 = vsel %vm372_vm3, %v2501_v26, %v2500_v28  ;;  %v2732_v25 = vrot.slane %v2729_v18, 7  ;;  %v2731_v26 = vunpack.c.l.b16 %v2723_v19 }
 0x758   : > { %v2503_v40 = vpack.c.b16 %v2502_v35, %v2502_v35 }
 0x759   : > { %v2733_v28 = vsel %vm366_vm1, %v2732_v25, %v2728_v24 }
 0x75a   : > { %v2505_v46 = vsel %vm379_vm4, %v2503_v40, 0 }
 0x80b   : > { %v2084_v47 = vpop.f32.mrf.mxu0 }
 0x80d   : > { %v2041_v51 = vpop.f32.mrf.mxu1  ;;  %v5013_v52 = vpop.f32.mrf.mxu0 }
 0x80e   : > { %v2085_v53 = vadd.f32 %v2084_v47, %v2041_v51  ;;  %v2871_v52 = vld [vmem:[%s5435_s19 + $0xd] sm:$0x1] }
 0x80f   : > { %v5007_v54 = vpop.f32.mrf.mxu1  ;;  %v2087_v55 = vpop.f32.mrf.mxu0 }
 0x811   : > { %v2044_v58 = vpop.f32.mrf.mxu1  ;;  %v5014_v59 = vpop.f32.mrf.mxu0 }
 0x813   : > { %v5008_v61 = vpop.f32.mrf.mxu1 }
 0x814   : > { %v2320_v61 = vld [vmem:[%s5545_s18 + $0x8] sm:$0x4] }
 0x815   : > { %v2150_v62 = vpop.f32.mrf.mxu1 }
 0x816   : > { %v2156_v63 = vpack.c.bf16 %v2150_v62, %v2150_v62 }
 0x817   : > { %v5019_v2 = vpop.f32.mrf.mxu1 }
 0x818   : > { %v2202_v4 = vrot.slane %v2156_v63, 2  ;;  %5024 = vmatmul.mubr.msk.bf16.vlgmr.msra.gmra.mxu0 %vm432_vm6, %v2156_v63 }
 0x819   : > { %5034 = vmatpush3.bf16.msra.mxu0 %v2350_v1  ;;  %v2153_v5 = vpop.f32.mrf.mxu1  ;;  %5035 = vmatprep.mubr.msk.bf16.mxu0 %vm5319_vm0, %v5318_v0 }
 0x81a   : > { %5030 = vmatmul.mubr.msk.bf16.vlgmr.msra.gmra.mxu1 %vm432_vm6, %v2202_v4  ;;  %5045 = vmatprep.subr.bf16.mxu0 %v5318_v0  ;;  %v2323_v5 = vld [vmem:[%s5545_s18 + $0xc] sm:$0x4] }
 0x81b   : > { %v5020_v6 = vpop.f32.mrf.mxu1  ;;  %5040 = vmatpush3.bf16.msra.mxu1 %v5815_v34  ;;  %5041 = vmatprep.mubr.msk.bf16.mxu1 %vm5319_vm0, %v5318_v0 }
 0x81c   : > { %5051 = vmatprep.subr.bf16.mxu1 %v5318_v0 }
 0x820   : > { %5036 = vmatmul.mubr.msk.bf16.vlgmr.msra.gmra.mxu0 %vm375_vm5, %v5841_v7 }
 0x821   : > { %5046 = vmatpush3.bf16.msra.mxu0 %v5775_v12  ;;  %5047 = vmatprep.mubr.msk.bf16.mxu0 %vm5319_vm0, %v5318_v0 }
 0x822   : > { %5057 = vmatprep.subr.bf16.mxu0 %v5318_v0 }
 0x8d8   : > { %v2194_v27 = vpop.f32.mrf.mxu0 }
 0x8d9   : > { %v2200_v29 = vadd.f32 %v2194_v27, %v2085_v53  ;;  %v2314_v53 = vld [vmem:[%s5545_s18] sm:$0x4]  ;;  %v2734_v27 = vrot.slane %v2730_v20, 6 }
 0x8da   : > { %v5025_v30 = vpop.f32.mrf.mxu0  ;;  %v2240_v31 = vpop.f32.mrf.mxu1 }
 0x8db   : > { %v2246_v32 = vadd.f32 %v2240_v31, %v2200_v29  ;;  %v2736_v30 = vrot.slane %v2731_v26, 5  ;;  %v2735_v31 = vsel %vm369_vm2, %v2734_v27, %v2733_v28 }
 0x8dc   : > { %v2197_v36 = vpop.f32.mrf.mxu0  ;;  %v5031_v23 = vpop.f32.mrf.mxu1 }
 0x8dd   : > { %v2247_v37 = vpack.c.bf16 %v2246_v32, %v2246_v32 }
 0x8de   : > { %v5026_v38 = vpop.f32.mrf.mxu0  ;;  %v2243_v39 = vpop.f32.mrf.mxu1 }
 0x8df   : > { %v2255_v41 = vrot.slane %v2247_v37, %v5527_v56  ;;  %v2737_v38 = vsel %vm372_vm3, %v2736_v30, %v2735_v31 }
 0x8e0   : > { %v5032_v42 = vpop.f32.mrf.mxu1  ;;  %v2386_v43 = vpop.f32.mrf.mxu0 }
 0x8e1   : > { %v2256_v21 = vcombine.high %v2255_v41, %v2255_v41  ;;  %v2263_v44 = vrot.slane %v2255_v41, %v5527_v56  ;;  %v2392_v22 = vpack.c.bf16 %v2386_v43, %v2386_v43  ;;  %v2738_v41 = vpack.c.b16 %v2737_v38, %v2737_v38 }
 0x8e2   : > { %v5037_v45 = vpop.f32.mrf.mxu0 }
 0x8e3   : > { %v2270_v47 = vrot.slane %v2256_v21, %v5527_v56  ;;  %v2272_v48 = vunpack.i.h.s16 %v2263_v44  ;;  %v4686_v49 = vpack.i.b16 %v2263_v44, %v2263_v44  ;;  %v2394_v51 = vrot.slane %v2392_v22, 2  ;;  %5048 = vmatmul.mubr.msk.bf16.vlgmr.msra.gmra.mxu0 %vm432_vm6, %v2392_v22 }
 0x8e4   : > { %v2389_v54 = vpop.f32.mrf.mxu0  ;;  %5058 = vmatpush3.bf16.msra.mxu0 %v5775_v12  ;;  %5059 = vmatprep.mubr.msk.bf16.mxu0 %vm5319_vm0, %v5318_v0  ;;  %v2740_v44 = vsel %vm379_vm4, %v2738_v41, 0 }
 0x8e5   : > { %v2274_v55 = vunpack.i.h.s16 %v2270_v47  ;;  %v2276_v57 = vpack.i.b16 %v2272_v48, %v2272_v48  ;;  %v4687_v58 = vpack.i.b16 %v2270_v47, %v2270_v47  ;;  %v2285_v59 = vrot.slane %v4686_v49, %v5533_v3  ;;  %5042 = vmatmul.mubr.msk.bf16.vlgmr.msra.gmra.mxu1 %vm432_vm6, %v2394_v51  ;;  %5069 = vmatprep.subr.bf16.mxu0 %v5318_v0  ;;  %v2872_v48 = vld [vmem:[%s5435_s19 + $0x1d] sm:$0x1]  ;;  %v2873_v49 = vld [vmem:[%s5435_s19 + $0x2d] sm:$0x1] }
 0x8e6   : > { %5052 = vmatpush3.bf16.msra.mxu1 %v2505_v46  ;;  %v5038_v62 = vpop.f32.mrf.mxu0  ;;  %5053 = vmatprep.mubr.msk.bf16.mxu1 %vm5319_vm0, %v5318_v0  ;;  %v2876_v51 = vpack.c.bf16 %v2872_v48, %v2872_v48  ;;  %v2877_v54 = vpack.c.bf16 %v2873_v49, %v2873_v49 }
 0x8e7   : > { %v2278_v63 = vpack.i.b16 %v2274_v55, %v2274_v55  ;;  %v2292_v1 = vrot.slane %v2276_v57, %v5533_v3  ;;  %v2299_v2 = vrot.slane %v4687_v58, %v5533_v3  ;;  %v2315_v4 = vsel %vm5863_vm12, %v2285_v59, %v2314_v53  ;;  %5063 = vmatprep.subr.bf16.mxu1 %v5318_v0  ;;  %v2874_v53 = vld [vmem:[%s5435_s19 + $0x3d] sm:$0x1] }
 0x8e8   : > { %2316 = vst [vmem:[%s5545_s18] sm:$0x4] %v2315_v4  ;;  %v2875_v55 = vpack.c.bf16 %v2871_v52, %v2871_v52  ;;  %v2884_v57 = vunpack.c.l.b16 %v2876_v51  ;;  %v2878_v58 = vpack.c.bf16 %v2874_v53, %v2874_v53  ;;  %v2885_v59 = vunpack.c.l.b16 %v2877_v54  ;;  %v3108_v52 = vld [vmem:[%s5435_s19 + $0x1e] sm:$0x1]  ;;  %v3109_v53 = vld [vmem:[%s5435_s19 + $0x2e] sm:$0x1] }
 0x8e9   : > { %v2306_v6 = vrot.slane %v2278_v63, %v5533_v3  ;;  %v2318_v50 = vsel %vm5863_vm12, %v2292_v1, %v2317_v60  ;;  %v2321_v8 = vsel %vm5863_vm12, %v2299_v2, %v2320_v61  ;;  %v3112_v54 = vpack.c.bf16 %v3108_v52, %v3108_v52 }
 0x8ea   : > { %2319 = vst [vmem:[%s5545_s18 + $0x4] sm:$0x4] %v2318_v50  ;;  %2322 = vst [vmem:[%s5545_s18 + $0x8] sm:$0x4] %v2321_v8  ;;  %v2883_v60 = vunpack.c.l.b16 %v2875_v55  ;;  %v2887_v61 = vrot.slane %v2884_v57, 7  ;;  %v2886_v62 = vunpack.c.l.b16 %v2878_v58  ;;  %v2889_v63 = vrot.slane %v2885_v59, 6 }
 0x8eb   : > { %v2324_v9 = vsel %vm5863_vm12, %v2306_v6, %v2323_v5  ;;  %v3107_v55 = vld [vmem:[%s5435_s19 + $0xe] sm:$0x1]  ;;  %v3110_v57 = vld [vmem:[%s5435_s19 + $0x3e] sm:$0x1]  ;;  %v3113_v58 = vpack.c.bf16 %v3109_v53, %v3109_v53  ;;  %vm3093_vm12 = vsmask.f32 3328 }
 0x8ec   : > { %2325 = vst [vmem:[%s5545_s18 + $0xc] sm:$0x4] %v2324_v9  ;;  %v2888_v1 = vsel %vm366_vm1, %v2887_v61, %v2883_v60  ;;  %v2891_v2 = vrot.slane %v2886_v62, 5  ;;  %v3111_v59 = vpack.c.bf16 %v3107_v55, %v3107_v55  ;;  %v3120_v60 = vunpack.c.l.b16 %v3112_v54 }
 0x8ed   : > { %5054 = vmatmul.mubr.msk.bf16.vlgmr.msra.gmra.mxu1 %vm375_vm5, %v5808_v33  ;;  %v2890_v5 = vsel %vm369_vm2, %v2889_v63, %v2888_v1  ;;  %v3114_v61 = vpack.c.bf16 %v3110_v57, %v3110_v57  ;;  %v3121_v62 = vunpack.c.l.b16 %v3113_v58 }
 0x8ee   : > { %5064 = vmatpush3.bf16.msra.mxu1 %v5815_v34  ;;  %5065 = vmatprep.mubr.msk.bf16.mxu1 %vm5319_vm0, %v5318_v0  ;;  %v2892_v10 = vsel %vm372_vm3, %v2891_v2, %v2890_v5  ;;  %v3119_v63 = vunpack.c.l.b16 %v3111_v59  ;;  %v3123_v1 = vrot.slane %v3120_v60, 7 }
 0x8ef   : > { %5075 = vmatprep.subr.bf16.mxu1 %v5318_v0  ;;  %v2893_v17 = vpack.c.b16 %v2892_v10, %v2892_v10  ;;  %v3122_v2 = vunpack.c.l.b16 %v3114_v61 }
 0x8f0   : > { %v3124_v5 = vsel %vm366_vm1, %v3123_v1, %v3119_v63 }
 0x8f1   : > { %v2895_v28 = vsel %vm379_vm4, %v2893_v17, 0 }
 0x8f3   : > { %v2713_v49 = vld [vmem:[%s5545_s18 + $0xc] sm:$0x4] }
 0x9a3   : > { %v2475_v29 = vpop.f32.mrf.mxu0 }
 0x9a5   : > { %v2432_v32 = vpop.f32.mrf.mxu1  ;;  %v5049_v35 = vpop.f32.mrf.mxu0 }
 0x9a6   : > { %v2476_v36 = vadd.f32 %v2475_v29, %v2432_v32  ;;  %v3262_v35 = vld [vmem:[%s5435_s19 + $0xf] sm:$0x1] }
 0x9a7   : > { %v5043_v23 = vpop.f32.mrf.mxu1  ;;  %v2478_v37 = vpop.f32.mrf.mxu0 }
 0x9a9   : > { %v2435_v39 = vpop.f32.mrf.mxu1  ;;  %v5050_v40 = vpop.f32.mrf.mxu0 }
 0x9aa   : > { %v2704_v40 = vld [vmem:[%s5545_s18] sm:$0x4] }
 0x9ab   : > { %v5044_v42 = vpop.f32.mrf.mxu1 }
 0x9ad   : > { %v2541_v43 = vpop.f32.mrf.mxu1 }
 0x9ae   : > { %v2547_v21 = vpack.c.bf16 %v2541_v43, %v2541_v43 }
 0x9af   : > { %v5055_v22 = vpop.f32.mrf.mxu1 }
 0x9b0   : > { %v2593_v45 = vrot.slane %v2547_v21, 2  ;;  %5060 = vmatmul.mubr.msk.bf16.vlgmr.msra.gmra.mxu0 %vm432_vm6, %v2547_v21  ;;  %v2707_v22 = vld [vmem:[%s5545_s18 + $0x4] sm:$0x4] }
 0x9b1   : > { %5070 = vmatpush3.bf16.msra.mxu0 %v2740_v44  ;;  %v2544_v46 = vpop.f32.mrf.mxu1  ;;  %5071 = vmatprep.mubr.msk.bf16.mxu0 %vm5319_vm0, %v5318_v0 }
 0x9b2   : > { %5066 = vmatmul.mubr.msk.bf16.vlgmr.msra.gmra.mxu1 %vm432_vm6, %v2593_v45  ;;  %5081 = vmatprep.subr.bf16.mxu0 %v5318_v0  ;;  %v2710_v45 = vld [vmem:[%s5545_s18 + $0x8] sm:$0x4] }
 0x9b3   : > { %v5056_v47 = vpop.f32.mrf.mxu1  ;;  %5076 = vmatpush3.bf16.msra.mxu1 %v5815_v34  ;;  %5077 = vmatprep.mubr.msk.bf16.mxu1 %vm5319_vm0, %v5318_v0 }
 0x9b4   : > { %5087 = vmatprep.subr.bf16.mxu1 %v5318_v0 }
 0x9b8   : > { %5072 = vmatmul.mubr.msk.bf16.vlgmr.msra.gmra.mxu0 %vm375_vm5, %v5841_v7 }
 0x9b9   : > { %5082 = vmatpush3.bf16.msra.mxu0 %v5775_v12  ;;  %5083 = vmatprep.mubr.msk.bf16.mxu0 %vm5319_vm0, %v5318_v0 }
 0x9ba   : > { %5093 = vmatprep.subr.bf16.mxu0 %v5318_v0 }
 0xa70   : > { %v2585_v4 = vpop.f32.mrf.mxu0 }
 0xa71   : > { %v2591_v6 = vadd.f32 %v2585_v4, %v2476_v36  ;;  %v3125_v4 = vrot.slane %v3121_v62, 6 }
 0xa72   : > { %v5061_v50 = vpop.f32.mrf.mxu0  ;;  %v2631_v8 = vpop.f32.mrf.mxu1 }
 0xa73   : > { %v2637_v9 = vadd.f32 %v2631_v8, %v2591_v6  ;;  %v3127_v50 = vrot.slane %v3122_v2, 5  ;;  %v3126_v8 = vsel %vm369_vm2, %v3125_v4, %v3124_v5 }
 0xa74   : > { %v2588_v11 = vpop.f32.mrf.mxu0  ;;  %v5067_v13 = vpop.f32.mrf.mxu1 }
 0xa75   : > { %v2638_v14 = vpack.c.bf16 %v2637_v9, %v2637_v9 }
 0xa76   : > { %v5062_v15 = vpop.f32.mrf.mxu0  ;;  %v2634_v16 = vpop.f32.mrf.mxu1 }
 0xa77   : > { %v2646_v18 = vrot.slane %v2638_v14, %v5527_v56  ;;  %v3128_v15 = vsel %vm372_vm3, %v3127_v50, %v3126_v8 }
 0xa78   : > { %v5068_v19 = vpop.f32.mrf.mxu1  ;;  %v2776_v20 = vpop.f32.mrf.mxu0 }
 0xa79   : > { %v2647_v24 = vcombine.high %v2646_v18, %v2646_v18  ;;  %v2654_v25 = vrot.slane %v2646_v18, %v5527_v56  ;;  %v2782_v26 = vpack.c.bf16 %v2776_v20, %v2776_v20  ;;  %v3129_v18 = vpack.c.b16 %v3128_v15, %v3128_v15 }
 0xa7a   : > { %v5073_v27 = vpop.f32.mrf.mxu0 }
 0xa7b   : > { %v2661_v29 = vrot.slane %v2647_v24, %v5527_v56  ;;  %v2663_v30 = vunpack.i.h.s16 %v2654_v25  ;;  %v4694_v31 = vpack.i.b16 %v2654_v25, %v2654_v25  ;;  %v2784_v32 = vrot.slane %v2782_v26, 2  ;;  %5084 = vmatmul.mubr.msk.bf16.vlgmr.msra.gmra.mxu0 %vm432_vm6, %v2782_v26 }
 0xa7c   : > { %v2779_v36 = vpop.f32.mrf.mxu0  ;;  %5094 = vmatpush3.bf16.msra.mxu0 %v5775_v12  ;;  %5095 = vmatprep.mubr.msk.bf16.mxu0 %vm5319_vm0, %v5318_v0  ;;  %v3131_v25 = vsel %vm379_vm4, %v3129_v18, 0  ;;  %v3101_v18 = vld [vmem:[%s5545_s18 + $0x8] sm:$0x8] }
 0xa7d   : > { %v2665_v23 = vunpack.i.h.s16 %v2661_v29  ;;  %v2667_v37 = vpack.i.b16 %v2663_v30, %v2663_v30  ;;  %v4695_v38 = vpack.i.b16 %v2661_v29, %v2661_v29  ;;  %v2676_v39 = vrot.slane %v4694_v31, %v5533_v3  ;;  %5078 = vmatmul.mubr.msk.bf16.vlgmr.msra.gmra.mxu1 %vm432_vm6, %v2784_v32  ;;  %5105 = vmatprep.subr.bf16.mxu0 %v5318_v0  ;;  %v3263_v30 = vld [vmem:[%s5435_s19 + $0x1f] sm:$0x1]  ;;  %v3264_v31 = vld [vmem:[%s5435_s19 + $0x2f] sm:$0x1] }
 0xa7e   : > { %5088 = vmatpush3.bf16.msra.mxu1 %v2895_v28  ;;  %v5074_v41 = vpop.f32.mrf.mxu0  ;;  %5089 = vmatprep.mubr.msk.bf16.mxu1 %vm5319_vm0, %v5318_v0  ;;  %v3267_v32 = vpack.c.bf16 %v3263_v30, %v3263_v30  ;;  %v3265_v36 = vld [vmem:[%s5435_s19 + $0x3f] sm:$0x1]  ;;  %s4513_s19 = sshll.u32 %s5545_s18, 4  ;;  %s6185_s19 = int_to_ptr.vmem [resolvable:$true] %s4513_s19 }
 0xa7f   : > { %v2669_v42 = vpack.i.b16 %v2665_v23, %v2665_v23  ;;  %v2683_v43 = vrot.slane %v2667_v37, %v5533_v3  ;;  %v2690_v21 = vrot.slane %v4695_v38, %v5533_v3  ;;  %v2705_v44 = vsel %vm5938_vm7, %v2676_v39, %v2704_v40  ;;  %5099 = vmatprep.subr.bf16.mxu1 %v5318_v0  ;;  %s5240_s30 = scalar_lea.vmem %s6185_s19, 256 }
 0xa80   : > { %2706 = vst [vmem:[%s5545_s18] sm:$0x4] %v2705_v44  ;;  %v3268_v23 = vpack.c.bf16 %v3264_v31, %v3264_v31  ;;  %v3266_v37 = vpack.c.bf16 %v3262_v35, %v3262_v35  ;;  %v3275_v38 = vunpack.c.l.b16 %v3267_v32  ;;  %v3269_v39 = vpack.c.bf16 %v3265_v36, %v3265_v36  ;;  %v3502_v31 = vld [vmem:[%s6414_s4] sm:$0xf]  ;;  %v3677_v35 = vld [vmem:[%s6057_s23 + $0x9] sm:$0x1]  ;;  %p5241_p12 = scmp.ne.s32.totalorder %s6185_s19, %s5240_s30 }
 0xa81   : > { %v2697_v46 = vrot.slane %v2669_v42, %v5533_v3  ;;  %v2708_v47 = vsel %vm5938_vm7, %v2683_v43, %v2707_v22  ;;  %v2711_v48 = vsel %vm5938_vm7, %v2690_v21, %v2710_v45  ;;  %v5322_v32 = vmov 0   ;;  %v3505_v36 = vld [vmem:[%s6057_s23 + $0x10] sm:$0x1] }
 0xa82   : > { %2709 = vst [vmem:[%s5545_s18 + $0x4] sm:$0x4] %v2708_v47  ;;  %2712 = vst [vmem:[%s5545_s18 + $0x8] sm:$0x4] %v2711_v48  ;;  %v3276_v40 = vunpack.c.l.b16 %v3268_v23  ;;  %v3274_v41 = vunpack.c.l.b16 %v3266_v37  ;;  %v3278_v42 = vrot.slane %v3275_v38, 7  ;;  %5233 = vset.pattern.permute.xlu0 %v5322_v32  ;;  %p5242_p13 = pnand %p5241_p12, %p5406_p4 }
 0xa83   : > { %v2714_v51 = vsel %vm5938_vm7, %v2697_v46, %v2713_v49  ;;  %vm6012_vm7 = vmand %vm3092_vm9, %vm3093_vm12  ;;  %3509 = vperm.xlu0 %5233, %v3502_v31   ;;  %v4330_v32 = vld [vmem:[%s6057_s23 + $0x5] sm:$0x1] }
 0xa84   : > { %2715 = vst [vmem:[%s5545_s18 + $0xc] sm:$0x4] %v2714_v51  ;;  %v3280_v43 = vrot.slane %v3276_v40, 6  ;;  %v3279_v21 = vsel %vm366_vm1, %v3278_v42, %v3274_v41  ;;  %v3678_v41 = vld [vmem:[%s6057_s23 + $0x11] sm:$0x1]  ;;  %v3684_v42 = vrot.slane %v3677_v35, 7  ;;  %p5243_p0 = pneg %p5242_p13 }
 0xa85   : > { %5090 = vmatmul.mubr.msk.bf16.vlgmr.msra.gmra.mxu1 %vm375_vm5, %v5808_v33  ;;  %v3501_v35 = vld [vmem:[%s6413_s3] sm:$0xf] }
 0xa86   : > { %5100 = vmatpush3.bf16.msra.mxu1 %v5815_v34  ;;  %5101 = vmatprep.mubr.msk.bf16.mxu1 %vm5319_vm0, %v5318_v0  ;;  %v3281_v45 = vsel %vm369_vm2, %v3280_v43, %v3279_v21  ;;  %v3506_v21 = vld [vmem:[%s6057_s23 + $0x18] sm:$0x1] }
 0xa87   : > { %5111 = vmatprep.subr.bf16.mxu1 %v5318_v0 }
 0xb3b   : > { %v2865_v6 = vpop.f32.mrf.mxu0 }
 0xb3d   : > { %v2822_v9 = vpop.f32.mrf.mxu1  ;;  %v5085_v10 = vpop.f32.mrf.mxu0 }
 0xb3e   : > { %v2866_v11 = vadd.f32 %v2865_v6, %v2822_v9  ;;  %v3095_v10 = vld [vmem:[%s5545_s18] sm:$0x8] }
 0xb3f   : > { %v5079_v13 = vpop.f32.mrf.mxu1  ;;  %v2868_v14 = vpop.f32.mrf.mxu0 }
 0xb41   : > { %v2825_v16 = vpop.f32.mrf.mxu1  ;;  %v5086_v17 = vpop.f32.mrf.mxu0 }
 0xb42   : > { %v3098_v17 = vld [vmem:[%s5545_s18 + $0x4] sm:$0x8] }
 0xb43   : > { %v5080_v19 = vpop.f32.mrf.mxu1 }
 0xb45   : > { %v2931_v20 = vpop.f32.mrf.mxu1 }
 0xb46   : > { %v2937_v24 = vpack.c.bf16 %v2931_v20, %v2931_v20 }
 0xb47   : > { %v5091_v26 = vpop.f32.mrf.mxu1 }
 0xb48   : > { %v2983_v27 = vrot.slane %v2937_v24, 2  ;;  %5096 = vmatmul.mubr.msk.bf16.vlgmr.msra.gmra.mxu0 %vm432_vm6, %v2937_v24  ;;  %v3104_v26 = vld [vmem:[%s5545_s18 + $0xc] sm:$0x8] }
 0xb49   : > { %5106 = vmatpush3.bf16.msra.mxu0 %v3131_v25  ;;  %v2934_v28 = vpop.f32.mrf.mxu1  ;;  %5107 = vmatprep.mubr.msk.bf16.mxu0 %vm5319_vm0, %v5318_v0 }
 0xb4a   : > { %5102 = vmatmul.mubr.msk.bf16.vlgmr.msra.gmra.mxu1 %vm432_vm6, %v2983_v27  ;;  %5117 = vmatprep.subr.bf16.mxu0 %v5318_v0 }
 0xb4b   : > { %v5092_v29 = vpop.f32.mrf.mxu1  ;;  %5112 = vmatpush3.bf16.msra.mxu1 %v5815_v34  ;;  %5113 = vmatprep.mubr.msk.bf16.mxu1 %vm5319_vm0, %v5318_v0 }
 0xb4c   : > { %5123 = vmatprep.subr.bf16.mxu1 %v5318_v0 }
 0xb50   : > { %5108 = vmatmul.mubr.msk.bf16.vlgmr.msra.gmra.mxu0 %vm375_vm5, %v5841_v7  ;;  %v3277_v7 = vunpack.c.l.b16 %v3269_v39  ;;  %v3503_v39 = vld [vmem:[%s6057_s23] sm:$0x1] }
 0xb51   : > { %5118 = vmatpush3.bf16.msra.mxu0 %v5775_v12  ;;  %5119 = vmatprep.mubr.msk.bf16.mxu0 %vm5319_vm0, %v5318_v0 }
 0xb52   : > { %5129 = vmatprep.subr.bf16.mxu0 %v5318_v0  ;;  %v3282_v44 = vrot.slane %v3277_v7, 5 }
 0xb54   : > { %v3283_v51 = vsel %vm372_vm3, %v3282_v44, %v3281_v45  ;;  %v3518_v44 = vrot.slane %v3505_v36, 6 }
 0xb55   : > { %v3284_v58 = vpack.c.b16 %v3283_v51, %v3283_v51  ;;  %v3686_v51 = vrot.slane %v3678_v41, 6 }
 0xb57   : > { %v3286_v4 = vsel %vm379_vm4, %v3284_v58, 0  ;;  %v3841_v58 = vld [vmem:[%s6057_s23 + $0x12] sm:$0x1]  ;;  %vm3525_vm4 = vcmask 1043456  }
 0xb58   : > { %v3849_v9 = vrot.slane %v3841_v58, 6 }
 0xc08   : > { %v2975_v22 = vpop.f32.mrf.mxu0 }
 0xc09   : > { %v2981_v46 = vadd.f32 %v2975_v22, %v2866_v11  ;;  %v3676_v22 = vld [vmem:[%s6057_s23 + $0x1] sm:$0x1] }
 0xc0a   : > { %v5097_v47 = vpop.f32.mrf.mxu0  ;;  %v3021_v48 = vpop.f32.mrf.mxu1 }
 0xc0b   : > { %v3027_v49 = vadd.f32 %v3021_v48, %v2981_v46  ;;  %v3840_v48 = vld [vmem:[%s6057_s23 + $0xa] sm:$0x1] }
 0xc0c   : > { %v2978_v52 = vpop.f32.mrf.mxu0  ;;  %v5103_v53 = vpop.f32.mrf.mxu1 }
 0xc0d   : > { %v3028_v54 = vpack.c.bf16 %v3027_v49, %v3027_v49  ;;  %v3679_v49 = vld [vmem:[%s6057_s23 + $0x19] sm:$0x1]  ;;  %v3520_v52 = vrot.slane %v3506_v21, 5  ;;  %v3685_v53 = vsel %vm366_vm1, %v3684_v42, %v3676_v22 }
 0xc0e   : > { %v5098_v55 = vpop.f32.mrf.mxu0  ;;  %v3024_v57 = vpop.f32.mrf.mxu1 }
 0xc0f   : > { %v3036_v59 = vrot.slane %v3028_v54, %v5527_v56  ;;  %v4004_v57 = vld [vmem:[%s6057_s23 + $0xb] sm:$0x1] }
 0xc10   : > { %v5104_v60 = vpop.f32.mrf.mxu1  ;;  %v3167_v61 = vpop.f32.mrf.mxu0 }
 0xc11   : > { %v3037_v62 = vcombine.high %v3036_v59, %v3036_v59  ;;  %v3044_v63 = vrot.slane %v3036_v59, %v5527_v56  ;;  %v3173_v1 = vpack.c.bf16 %v3167_v61, %v3167_v61  ;;  %v3847_v59 = vrot.slane %v3840_v48, 7 }
 0xc12   : > { %v5109_v2 = vpop.f32.mrf.mxu0  ;;  %v3688_v60 = vrot.slane %v3679_v49, 5 }
 0xc13   : > { %v3051_v5 = vrot.slane %v3037_v62, %v5527_v56  ;;  %v3053_v6 = vunpack.i.h.s16 %v3044_v63  ;;  %v4702_v50 = vpack.i.b16 %v3044_v63, %v3044_v63  ;;  %v3175_v8 = vrot.slane %v3173_v1, 2  ;;  %5120 = vmatmul.mubr.msk.bf16.vlgmr.msra.gmra.mxu0 %vm432_vm6, %v3173_v1  ;;  %v3839_v62 = vld [vmem:[%s6057_s23 + $0x2] sm:$0x1]  ;;  %v4167_v1 = vld [vmem:[%s6057_s23 + $0xc] sm:$0x1] }
 0xc14   : > { %v3170_v11 = vpop.f32.mrf.mxu0  ;;  %5130 = vmatpush3.bf16.msra.mxu0 %v5775_v12  ;;  %5131 = vmatprep.mubr.msk.bf16.mxu0 %vm5319_vm0, %v5318_v0  ;;  %v3687_v63 = vsel %vm369_vm2, %v3686_v51, %v3685_v53 }
 0xc15   : > { %v3055_v13 = vunpack.i.h.s16 %v3051_v5  ;;  %v3057_v14 = vpack.i.b16 %v3053_v6, %v3053_v6  ;;  %v4703_v15 = vpack.i.b16 %v3051_v5, %v3051_v5  ;;  %v3066_v16 = vrot.slane %v4702_v50, %v5533_v3  ;;  %5114 = vmatmul.mubr.msk.bf16.vlgmr.msra.gmra.mxu1 %vm432_vm6, %v3175_v8  ;;  %5141 = vmatprep.subr.mxu0 %v5318_v0  ;;  %v3842_v5 = vld [vmem:[%s6057_s23 + $0x1a] sm:$0x1]  ;;  %v4005_v6 = vld [vmem:[%s6057_s23 + $0x13] sm:$0x1]  ;;  %v4331_v11 = vld [vmem:[%s6057_s23 + $0xd] sm:$0x1] }
 0xc16   : > { %5124 = vmatpush3.bf16.msra.mxu1 %v3286_v4  ;;  %v5110_v12 = vpop.f32.mrf.mxu0  ;;  %5125 = vmatprep.mubr.msk.bf16.mxu1 %vm5319_vm0, %v5318_v0  ;;  %v4011_v50 = vrot.slane %v4004_v57, 7 }
 0xc17   : > { %v3059_v19 = vpack.i.b16 %v3055_v13, %v3055_v13  ;;  %v3073_v20 = vrot.slane %v3057_v14, %v5533_v3  ;;  %v3080_v24 = vrot.slane %v4703_v15, %v5533_v3  ;;  %v3096_v25 = vsel %vm6012_vm7, %v3066_v16, %v3095_v10  ;;  %5135 = vmatprep.subr.bf16.mxu1 %v5318_v0  ;;  %v4003_v10 = vld [vmem:[%s6057_s23 + $0x3] sm:$0x1]  ;;  %v4168_v16 = vld [vmem:[%s6057_s23 + $0x14] sm:$0x1]  ;;  %v4166_v12 = vld [vmem:[%s6057_s23 + $0x4] sm:$0x1] }
 0xc18   : > { %3097 = vst [vmem:[%s5545_s18] sm:$0x8] %v3096_v25  ;;  %v3848_v14 = vsel %vm366_vm1, %v3847_v59, %v3839_v62  ;;  %v3689_v15 = vsel %vm372_vm3, %v3688_v60, %v3687_v63  ;;  %v4012_v25 = vsel %vm366_vm1, %v4011_v50, %v4003_v10  ;;  %v4176_v31 = vrot.slane %v4168_v16, 6 }
 0xc19   : > { %v3087_v27 = vrot.slane %v3059_v19, %v5533_v3  ;;  %v3099_v28 = vsel %vm6012_vm7, %v3073_v20, %v3098_v17  ;;  %v3102_v29 = vsel %vm6012_vm7, %v3080_v24, %v3101_v18  ;;  %v4174_v17 = vrot.slane %v4167_v1, 7  ;;  %v4006_v19 = vld [vmem:[%s6057_s23 + $0x1b] sm:$0x1] }
 0xc1a   : > { %3100 = vst [vmem:[%s5545_s18 + $0x4] sm:$0x8] %v3099_v28  ;;  %3103 = vst [vmem:[%s5545_s18 + $0x8] sm:$0x8] %v3102_v29  ;;  %v4013_v20 = vrot.slane %v4005_v6, 6  ;;  %v3851_v24 = vrot.slane %v3842_v5, 5  ;;  %v3850_v29 = vsel %vm369_vm2, %v3849_v9, %v3848_v14 }
 0xc1b   : > { %v3105_v30 = vsel %vm6012_vm7, %v3087_v27, %v3104_v26  ;;  %v4332_v26 = vld [vmem:[%s6057_s23 + $0x15] sm:$0x1]  ;;  %v4338_v27 = vrot.slane %v4331_v11, 7 }
 0xc1c   : > { %3106 = vst [vmem:[%s5545_s18 + $0xc] sm:$0x8] %v3105_v30  ;;  %v4169_v30 = vld [vmem:[%s6057_s23 + $0x1c] sm:$0x1]  ;;  %v4014_v36 = vsel %vm369_vm2, %v4013_v20, %v4012_v25 }
 0xc1d   : > { %5126 = vmatmul.mubr.msk.bf16.vlgmr.msra.gmra.mxu1 %vm375_vm5, %v5808_v33  ;;  %v3504_v33 = vld [vmem:[%s6057_s23 + $0x8] sm:$0x1]  ;;  %v4339_v41 = vsel %vm366_vm1, %v4338_v27, %v4330_v32 }
 0xc1e   : > { %5136 = vmatpush3.bf16.msra.mxu1 %v5815_v34  ;;  %5137 = vmatprep.mubr.msk.bf16.mxu1 %vm5319_vm0, %v5318_v0  ;;  %v3516_v23 = vrot.slane %v3504_v33, 7  ;;  %v4175_v33 = vsel %vm366_vm1, %v4174_v17, %v4166_v12 }
 0xc1f   : > { %5146 = vmatprep.subr.mxu1 %v5318_v0  ;;  %v4177_v42 = vsel %vm369_vm2, %v4176_v31, %v4175_v33 }
 0xc20   : > { %v3517_v45 = vsel %vm366_vm1, %v3516_v23, %v3503_v39  ;;  %v4333_v23 = vld [vmem:[%s6057_s23 + $0x1d] sm:$0x1]  ;;  %v4178_v39 = vrot.slane %v4169_v30, 5  ;;  %s6213_s23 = scalar_lea.sflag [#allocation3], %s310_s16 }
 0xc21   : > { %v3519_v55 = vsel %vm369_vm2, %v3518_v44, %v3517_v45  ;;  %v3488_v27 = vld [vmem:[%s5545_s18 + $0x4] sm:$0x8] }
 0xc22   : > { %v3521_v4 = vsel %vm372_vm3, %v3520_v52, %v3519_v55  ;;  %v4179_v44 = vsel %vm372_vm3, %v4178_v39, %v4177_v42 }
 0xcd3   : > { %v3256_v34 = vpop.f32.mrf.mxu0 }
 0xcd5   : > { %v3213_v37 = vpop.f32.mrf.mxu1  ;;  %v5121_v38 = vpop.f32.mrf.mxu0 }
 0xcd6   : > { %v6063_v40 = vadd.f32 %v3256_v34, %v3213_v37  ;;  %v4015_v34 = vrot.slane %v4006_v19, 5  ;;  %v4340_v37 = vrot.slane %v4332_v26, 6  ;;  %v3852_v38 = vsel %vm372_vm3, %v3851_v24, %v3850_v29 }
 0xcd7   : > { %v5115_v7 = vpop.f32.mrf.mxu1  ;;  %v3259_v43 = vpop.f32.mrf.mxu0 }
 0xcd8   : > { %v4016_v7 = vsel %vm372_vm3, %v4015_v34, %v4014_v36  ;;  %v4342_v43 = vrot.slane %v4333_v23, 5  ;;  %v4341_v21 = vsel %vm369_vm2, %v4340_v37, %v4339_v41  ;;  %vm3662_vm2 = vcmask 40960  }
 0xcd9   : > { %v3216_v46 = vpop.f32.mrf.mxu1  ;;  %v5122_v47 = vpop.f32.mrf.mxu0 }
 0xcda   : > { %v4343_v22 = vsel %vm372_vm3, %v4342_v43, %v4341_v21  ;;  %vm6197_vm3 = vmand %vm3662_vm2, %vm750_vm8 }
 0xcdb   : > { %v5116_v54 = vpop.f32.mrf.mxu1 }
 0xcdc   : > { %v6137_v54 = vpop.permute.xlu0 %3509 }
 0xcdd   : > { %v3322_v61 = vpop.f32.mrf.mxu1 }
 0xcde   : > { %v3328_v2 = vpack.c.bf16 %v3322_v61, %v3322_v61 }
 0xcdf   : > { %v5127_v8 = vpop.f32.mrf.mxu1 }
 0xce0   : > { %v3374_v13 = vrot.slane %v3328_v2, 2  ;;  %5132 = vmatmul.mubr.msk.bf16.vlgmr.msra.gmra.mxu0 %vm432_vm6, %v3328_v2 }
 0xce1   : > { %5142 = vmatpush3.msk.msra.mxu0 %vm3525_vm4, %v3521_v4  ;;  %v3325_v18 = vpop.f32.mrf.mxu1  ;;  %5143 = vmatprep.mubr.msk.f32.mxu0 %vm5319_vm0, %v5318_v0 }
 0xce2   : > { %5138 = vmatmul.mubr.msk.bf16.vlgmr.msra.gmra.mxu1 %vm432_vm6, %v3374_v13  ;;  %5151 = vmatprep.subr.mxu0 %v5318_v0 }
 0xce3   : > { %v5128_v28 = vpop.f32.mrf.mxu1  ;;  %5147 = vmatpush3.msk.msra.mxu1 %vm3525_vm4, %v3689_v15  ;;  %5148 = vmatprep.mubr.msk.f32.mxu1 %vm5319_vm0, %v5318_v0  ;;  %v3485_v15 = vld [vmem:[%s5545_s18] sm:$0x8] }
 0xce4   : > { %5156 = vmatprep.subr.mxu1 %v5318_v0  ;;  %v3491_v28 = vld [vmem:[%s5545_s18 + $0x8] sm:$0x8] }
 0xce8   : > { %5144 = vmatmul.mubr.msk.f32.vlgmr.msra.gmra.mxu0 %vm375_vm5, %v3501_v35 }
 0xce9   : > { %5152 = vmatpush3.msk.msra.mxu0 %vm3525_vm4, %v3852_v38  ;;  %5153 = vmatprep.mubr.msk.f32.mxu0 %vm5319_vm0, %v5318_v0  ;;  %v3494_v38 = vld [vmem:[%s5545_s18 + $0xc] sm:$0x8] }
 0xcea   : > { %5149 = vmatmul.mubr.msk.f32.vlgmr.msra.gmra.mxu1 %vm375_vm5, %v3501_v35  ;;  %5161 = vmatprep.subr.mxu0 %v5318_v0 }
 0xceb   : > { %5157 = vmatpush3.msk.msra.mxu1 %vm3525_vm4, %v4016_v7  ;;  %5158 = vmatprep.mubr.msk.f32.mxu1 %vm5319_vm0, %v5318_v0 }
 0xcec   : > { %5154 = vmatmul.mubr.msk.f32.vlgmr.msra.gmra.mxu0 %vm375_vm5, %v3501_v35  ;;  %5166 = vmatprep.subr.mxu1 %v5318_v0 }
 0xced   : > { %5162 = vmatpush3.msk.msra.mxu0 %vm3525_vm4, %v4179_v44  ;;  %5163 = vmatprep.mubr.msk.f32.mxu0 %vm5319_vm0, %v5318_v0 }
 0xcee   : > { %5159 = vmatmul.mubr.msk.f32.vlgmr.msra.gmra.mxu1 %vm375_vm5, %v3501_v35 }
 0xcef   : > { %5167 = vmatpush3.msk.msra.mxu1 %vm3525_vm4, %v4343_v22  ;;  %5168 = vmatprep.mubr.msk.f32.mxu1 %vm5319_vm0, %v5318_v0  ;;  %vm3483_vm0 = vsmask.f32 7950 }
 0xcf0   : > { %5164 = vmatmul.mubr.msk.f32.vlgmr.msra.gmra.mxu0 %vm375_vm5, %v3501_v35  ;;  %vm6144_vm1 = vmand %vm3092_vm9, %vm3483_vm0 }
 0xcf2   : > { %5169 = vmatmul.mubr.msk.f32.vlgmr.msra.gmra.mxu1 %vm375_vm5, %v3501_v35 }
 0xda0   : > { %v3366_v45 = vpop.f32.mrf.mxu0 }
 0xda1   : > { %v3372_v46 = vadd.f32 %v3366_v45, %v6063_v40  ;;  %v3664_v45 = vld [vmem:[%s6166_s20] sm:$0x1] }
 0xda2   : > { %v5133_v47 = vpop.f32.mrf.mxu0  ;;  %v3412_v48 = vpop.f32.mrf.mxu1 }
 0xda3   : > { %v3418_v49 = vadd.f32 %v3412_v48, %v3372_v46 }
 0xda4   : > { %v3369_v51 = vpop.f32.mrf.mxu0  ;;  %v5139_v52 = vpop.f32.mrf.mxu1 }
 0xda5   : > { %v3419_v53 = vpack.c.bf16 %v3418_v49, %v3418_v49 }
 0xda6   : > { %v5134_v55 = vpop.f32.mrf.mxu0  ;;  %v3415_v57 = vpop.f32.mrf.mxu1 }
 0xda7   : > { %v3427_v58 = vrot.slane %v3419_v53, %v5527_v56  ;;  %v3667_v55 = vld [vmem:[%s6166_s20 + $0x4] sm:$0x1]  ;;  %v3670_v57 = vld [vmem:[%s6166_s20 + $0x8] sm:$0x1] }
 0xda8   : > { %v5140_v0 = vpop.f32.mrf.mxu1  ;;  %v3594_v59 = vpop.f32.mrf.mxu0 }
 0xda9   : > { %v3428_v60 = vcombine.high %v3427_v58, %v3427_v58  ;;  %v3435_v61 = vrot.slane %v3427_v58, %v5527_v56  ;;  %v3595_v40 = vadd.f32 %v3594_v59, %v6137_v54 }
 0xdaa   : > { %v5145_v62 = vpop.f32.mrf.mxu0  ;;  %v3758_v63 = vpop.f32.mrf.mxu1 }
 0xdab   : > { %v3442_v1 = vrot.slane %v3428_v60, %v5527_v56  ;;  %v3444_v2 = vunpack.i.h.s16 %v3435_v61  ;;  %v4710_v4 = vpack.i.b16 %v3435_v61, %v3435_v61  ;;  %v3598_v5 = vpack.c.bf16 %v3595_v40, %v3595_v40 }
 0xdac   : > { %v3759_v50 = vadd.f32 %v3758_v63, %v6137_v54  ;;  %v5150_v8 = vpop.f32.mrf.mxu1  ;;  %v3921_v9 = vpop.f32.mrf.mxu0 }
 0xdad   : > { %v3446_v10 = vunpack.i.h.s16 %v3442_v1  ;;  %v3448_v11 = vpack.i.b16 %v3444_v2, %v3444_v2  ;;  %v4711_v13 = vpack.i.b16 %v3442_v1, %v3442_v1  ;;  %v3457_v14 = vrot.slane %v4710_v4, %v5533_v3 }
 0xdae   : > { %v3606_v16 = vrot.slane %v3598_v5, %v5527_v56  ;;  %v3762_v17 = vpack.c.bf16 %v3759_v50, %v3759_v50  ;;  %v3922_v18 = vadd.f32 %v3921_v9, %v6137_v54  ;;  %v5155_v12 = vpop.f32.mrf.mxu0  ;;  %v4085_v19 = vpop.f32.mrf.mxu1 }
 0xdaf   : > { %v3450_v20 = vpack.i.b16 %v3446_v10, %v3446_v10  ;;  %v3464_v24 = vrot.slane %v3448_v11, %v5533_v3  ;;  %v3471_v25 = vrot.slane %v4711_v13, %v5533_v3  ;;  %v3486_v26 = vsel %vm6144_vm1, %v3457_v14, %v3485_v15 }
 0xdb0   : > { %3487 = vst [vmem:[%s5545_s18] sm:$0x8] %v3486_v26  ;;  %v3607_v29 = vcombine.high %v3606_v16, %v3606_v16  ;;  %v3614_v30 = vrot.slane %v3606_v16, %v5527_v56  ;;  %v3770_v31 = vrot.slane %v3762_v17, %v5527_v56  ;;  %v3925_v32 = vpack.c.bf16 %v3922_v18, %v3922_v18  ;;  %v5160_v33 = vpop.f32.mrf.mxu1  ;;  %v6170_v34 = vpop.f32.mrf.mxu0 }
 0xdb1   : > { %v3478_v35 = vrot.slane %v3450_v20, %v5533_v3  ;;  %v3489_v36 = vsel %vm6144_vm1, %v3464_v24, %v3488_v27  ;;  %v3492_v23 = vsel %vm6144_vm1, %v3471_v25, %v3491_v28  ;;  %v6178_v37 = vadd.f32 %v4085_v19, %v6137_v54 }
 0xdb2   : > { %3490 = vst [vmem:[%s5545_s18 + $0x4] sm:$0x8] %v3489_v36  ;;  %3493 = vst [vmem:[%s5545_s18 + $0x8] sm:$0x8] %v3492_v23  ;;  %v3621_v39 = vrot.slane %v3607_v29, %v5527_v56  ;;  %v3623_v41 = vunpack.i.h.s16 %v3614_v30  ;;  %v4714_v42 = vpack.i.b16 %v3614_v30, %v3614_v30  ;;  %v3771_v7 = vcombine.high %v3770_v31, %v3770_v31  ;;  %v5165_v43 = vpop.f32.mrf.mxu0  ;;  %v6191_v21 = vpop.f32.mrf.mxu1 }
 0xdb3   : > { %v3495_v44 = vsel %vm6144_vm1, %v3478_v35, %v3494_v38  ;;  %v3778_v46 = vrot.slane %v3770_v31, %v5527_v56  ;;  %v3933_v47 = vrot.slane %v3925_v32, %v5527_v56  ;;  %v4089_v48 = vpack.c.bf16 %v6178_v37, %v6178_v37 }
 0xdb4   : > { %3496 = vst [vmem:[%s5545_s18 + $0xc] sm:$0x8] %v3495_v44  ;;  %v3625_v49 = vunpack.i.h.s16 %v3621_v39  ;;  %v3627_v51 = vpack.i.b16 %v3623_v41, %v3623_v41  ;;  %v4715_v52 = vpack.i.b16 %v3621_v39, %v3621_v39  ;;  %v3636_v53 = vrot.slane %v4714_v42, %v5533_v3  ;;  %v5170_v58 = vpop.f32.mrf.mxu1  ;;  %s5323_s18 = smov [#allocation2]  }
 0xdb5   : > { %v3785_v0 = vrot.slane %v3771_v7, %v5527_v56  ;;  %v3787_v59 = vunpack.i.h.s16 %v3778_v46  ;;  %v4718_v60 = vpack.i.b16 %v3778_v46, %v3778_v46  ;;  %v3934_v61 = vcombine.high %v3933_v47, %v3933_v47  ;;  %s5244_s8 = sshll.u32 %s5323_s18, 4  ;;  %s5245_s8 = int_to_ptr.vmem [resolvable:$false] %s5244_s8 }
 0xdb6   : > { %s5246_s10 = scalar_lea.vmem %s5245_s8, 512  ;;  %p5247_p1 = scmp.lt.s32.totalorder %s6185_s19, %s5245_s8 }
 0xdb7   : > { %p5248_p2 = scmp.lt.s32.totalorder %s5246_s10, %s5240_s30 }
 0xdb9   : > { %p5249_p3 = por %p5248_p2, %p5247_p1 }
 0xdbb   : > { %p5250_p5 = pnand %p5249_p3, %p5243_p0 }
 0xdbd   : > { %5253 = shalt.err (!%p5250_p5)
}
 0xdbe   : > { %s5254_s16 = scalar_lea.hbm %s6183_s22, 256  ;;  %s5258_s17 = scalar_lea.hbm %s6416_s6, 512 }
 0xdbf   : > { %p5255_p6 = scmp.ne.s32.totalorder %s6183_s22, %s5254_s16  ;;  %p5259_p10 = scmp.lt.s32.totalorder %s6183_s22, %s6416_s6 }
 0xdc0   : > { %p5260_p11 = scmp.lt.s32.totalorder %s5258_s17, %s5254_s16 }
 0xdc1   : > { %p5256_p7 = pnand %p5255_p6, %p5406_p4 }
 0xdc2   : > { %p5261_p12 = por %p5260_p11, %p5259_p10 }
 0xdc3   : > { %p5257_p9 = pneg %p5256_p7 }
 0xdc5   : > { %p5262_p13 = pnand %p5261_p12, %p5257_p9 }
 0xdc7   : > { %5265 = shalt.err (!%p5262_p13)
}
 0xdc8   : > { %s5324_s30 = smov 64   ;;  %s5325_s18 = smov 4   ;;  %v3629_v40 = vpack.i.b16 %v3625_v49, %v3625_v49  ;;  %v3643_v62 = vrot.slane %v3627_v51, %v5533_v3  ;;  %v3650_v63 = vrot.slane %v4715_v52, %v5533_v3  ;;  %v3665_v1 = vsel %vm6197_vm3, %v3636_v53, %v3664_v45  ;;  %v3673_v2 = vld [vmem:[%s6166_s20 + $0xc] sm:$0x1]  ;;  %v3991_v26 = vld [vmem:[%s6166_s20] sm:$0x2]  ;;  %vm6272_vm8 = vmand %vm3662_vm2, %vm1140_vm10 }
 0xdc9   : > { %5171 = dma.vmem_to_hbm [thread:$0]  (%p5406_p4), %s6185_s19, 256, %s6183_s22, %s6213_s23, %s5324_s30, %s5324_s30, %s5325_s18   ;;  %v3789_v4 = vunpack.i.h.s16 %v3785_v0  ;;  %v3791_v5 = vpack.i.b16 %v3787_v59, %v3787_v59  ;;  %v4719_v6 = vpack.i.b16 %v3785_v0, %v3785_v0  ;;  %vm3989_vm5 = vcmask 41985  }
 0xdca   : > { %3666 = vst [vmem:[%s6166_s20] sm:$0x1] %v3665_v1  ;;  %v3657_v50 = vrot.slane %v3629_v40, %v5533_v3  ;;  %v3668_v8 = vsel %vm6197_vm3, %v3643_v62, %v3667_v55  ;;  %v3671_v9 = vsel %vm6197_vm3, %v3650_v63, %v3670_v57  ;;  %v3941_v10 = vrot.slane %v3933_v47, %v5527_v56  ;;  %vm6263_vm6 = vmand %vm3989_vm5, %vm1531_vm13  ;;  %v3997_v31 = vld [vmem:[%s6166_s20 + $0x8] sm:$0x2]  ;;  %v3994_v23 = vld [vmem:[%s6166_s20 + $0x4] sm:$0x2] }
 0xdcb   : > { %3669 = vst [vmem:[%s6166_s20 + $0x4] sm:$0x1] %v3668_v8  ;;  %3672 = vst [vmem:[%s6166_s20 + $0x8] sm:$0x1] %v3671_v9  ;;  %v3793_v11 = vpack.i.b16 %v3789_v4, %v3789_v4  ;;  %v3800_v13 = vrot.slane %v4718_v60, %v5533_v3  ;;  %v3807_v14 = vrot.slane %v3791_v5, %v5533_v3  ;;  %v4000_v42 = vld [vmem:[%s6166_s20 + $0xc] sm:$0x2] }
 0xdcc   : > { %v3948_v15 = vrot.slane %v3934_v61, %v5527_v56  ;;  %v3674_v16 = vsel %vm6197_vm3, %v3657_v50, %v3673_v2  ;;  %v3950_v17 = vunpack.i.h.s16 %v3941_v10  ;;  %v4722_v18 = vpack.i.b16 %v3941_v10, %v3941_v10  ;;  %vm6319_vm10 = vmand %vm3989_vm5, %vm1921_vm15  ;;  %v4321_v28 = vld [vmem:[%s6166_s20 + $0x4] sm:$0x4] }
 0xdcd   : > { %v4097_v12 = vrot.slane %v4089_v48, %v5527_v56  ;;  %3675 = vst [vmem:[%s6166_s20 + $0xc] sm:$0x1] %v3674_v16  ;;  %v3814_v19 = vrot.slane %v4719_v6, %v5533_v3  ;;  %v4249_v27 = vadd.f32 %v6170_v34, %v6137_v54  ;;  %v3821_v35 = vrot.slane %v3793_v11, %v5533_v3 }
 0xdce   : > { %v3952_v20 = vunpack.i.h.s16 %v3948_v15  ;;  %v4723_v24 = vpack.i.b16 %v3948_v15, %v3948_v15  ;;  %v3954_v29 = vpack.i.b16 %v3950_v17, %v3950_v17  ;;  %v3963_v30 = vrot.slane %v4722_v18, %v5533_v3 }
 0xdcf   : > { %v4098_v32 = vcombine.high %v4097_v12, %v4097_v12  ;;  %v4105_v33 = vrot.slane %v4097_v12, %v5527_v56  ;;  %v4252_v37 = vpack.c.bf16 %v4249_v27, %v4249_v27  ;;  %v4413_v46 = vadd.f32 %v6191_v21, %v6137_v54 }
 0xdd0   : > { %v3956_v36 = vpack.i.b16 %v3952_v20, %v3952_v20  ;;  %v3977_v34 = vrot.slane %v4723_v24, %v5533_v3  ;;  %v3970_v39 = vrot.slane %v3954_v29, %v5533_v3  ;;  %v3992_v41 = vsel %vm6263_vm6, %v3963_v30, %v3991_v26  ;;  %v4318_v24 = vld [vmem:[%s6166_s20] sm:$0x4]  ;;  %v4324_v29 = vld [vmem:[%s6166_s20 + $0x8] sm:$0x4] }
 0xdd1   : > { %v3827_v38 = vld [vmem:[%s6166_s20] sm:$0x1]  ;;  %v4112_v7 = vrot.slane %v4098_v32, %v5527_v56  ;;  %v4114_v43 = vunpack.i.h.s16 %v4105_v33  ;;  %3993 = vst [vmem:[%s6166_s20] sm:$0x2] %v3992_v41  ;;  %v4726_v52 = vpack.i.b16 %v4105_v33, %v4105_v33  ;;  %v4260_v0 = vrot.slane %v4252_v37, %v5527_v56 }
 0xdd2   : > { %v3828_v44 = vsel %vm6272_vm8, %v3800_v13, %v3827_v38  ;;  %v3984_v22 = vrot.slane %v3956_v36, %v5533_v3  ;;  %v3998_v45 = vsel %vm6263_vm6, %v3977_v34, %v3997_v31  ;;  %v3830_v47 = vld [vmem:[%s6166_s20 + $0x4] sm:$0x1]  ;;  %v3833_v48 = vld [vmem:[%s6166_s20 + $0x8] sm:$0x1]  ;;  %v3995_v49 = vsel %vm6263_vm6, %v3970_v39, %v3994_v23  ;;  %v4327_v34 = vld [vmem:[%s6166_s20 + $0xc] sm:$0x4] }
 0xdd3   : > { %3829 = vst [vmem:[%s6166_s20] sm:$0x1] %v3828_v44  ;;  %3999 = vst [vmem:[%s6166_s20 + $0x8] sm:$0x2] %v3998_v45  ;;  %v4116_v51 = vunpack.i.h.s16 %v4112_v7  ;;  %v3831_v53 = vsel %vm6272_vm8, %v3807_v14, %v3830_v47  ;;  %v3834_v55 = vsel %vm6272_vm8, %v3814_v19, %v3833_v48  ;;  %v4118_v21 = vpack.i.b16 %v4114_v43, %v4114_v43 }
 0xdd4   : > { %3996 = vst [vmem:[%s6166_s20 + $0x4] sm:$0x2] %v3995_v49  ;;  %v4001_v54 = vsel %vm6263_vm6, %v3984_v22, %v4000_v42  ;;  %3832 = vst [vmem:[%s6166_s20 + $0x4] sm:$0x1] %v3831_v53  ;;  %v3836_v57 = vld [vmem:[%s6166_s20 + $0xc] sm:$0x1]  ;;  %v4727_v58 = vpack.i.b16 %v4112_v7, %v4112_v7  ;;  %v4416_v61 = vpack.c.bf16 %v4413_v46, %v4413_v46 }
 0xdd5   : > { %3835 = vst [vmem:[%s6166_s20 + $0x8] sm:$0x1] %v3834_v55  ;;  %4002 = vst [vmem:[%s6166_s20 + $0xc] sm:$0x2] %v4001_v54  ;;  %v3837_v59 = vsel %vm6272_vm8, %v3821_v35, %v3836_v57  ;;  %v4120_v60 = vpack.i.b16 %v4116_v51, %v4116_v51  ;;  %v4261_v62 = vcombine.high %v4260_v0, %v4260_v0  ;;  %vm4316_vm13 = vcmask 43010  }
 0xdd6   : > { %3838 = vst [vmem:[%s6166_s20 + $0xc] sm:$0x1] %v3837_v59  ;;  %v4268_v63 = vrot.slane %v4260_v0, %v5527_v56  ;;  %v4127_v1 = vrot.slane %v4726_v52, %v5533_v3  ;;  %v4134_v2 = vrot.slane %v4118_v21, %v5533_v3  ;;  %v4424_v4 = vrot.slane %v4416_v61, %v5527_v56  ;;  %vm6341_vm15 = vmand %vm4316_vm13, %vm2312_vm11 }
 0xdd7   : > { %v4141_v5 = vrot.slane %v4727_v58, %v5533_v3  ;;  %v4275_v50 = vrot.slane %v4261_v62, %v5527_v56  ;;  %v4148_v10 = vrot.slane %v4120_v60, %v5533_v3  ;;  %vm4480_vm11 = vmand %vm4316_vm13, %vm2702_vm14 }
 0xdd8   : > { %v4154_v6 = vld [vmem:[%s6166_s20] sm:$0x2]  ;;  %v4277_v8 = vunpack.i.h.s16 %v4268_v63  ;;  %v4730_v9 = vpack.i.b16 %v4268_v63, %v4268_v63  ;;  %v4425_v14 = vcombine.high %v4424_v4, %v4424_v4  ;;  %v4432_v15 = vrot.slane %v4424_v4, %v5527_v56 }
 0xdd9   : > { %v4155_v11 = vsel %vm6319_vm10, %v4127_v1, %v4154_v6  ;;  %v4279_v18 = vunpack.i.h.s16 %v4275_v50  ;;  %v4731_v19 = vpack.i.b16 %v4275_v50, %v4275_v50 }
 0xdda   : > { %v4160_v13 = vld [vmem:[%s6166_s20 + $0x8] sm:$0x2]  ;;  %4156 = vst [vmem:[%s6166_s20] sm:$0x2] %v4155_v11  ;;  %v4281_v12 = vpack.i.b16 %v4277_v8, %v4277_v8  ;;  %v4290_v27 = vrot.slane %v4730_v9, %v5533_v3  ;;  %v4439_v30 = vrot.slane %v4425_v14, %v5527_v56  ;;  %v4441_v23 = vunpack.i.h.s16 %v4432_v15 }
 0xddb   : > { %v4157_v16 = vld [vmem:[%s6166_s20 + $0x4] sm:$0x2]  ;;  %v4161_v17 = vsel %vm6319_vm10, %v4141_v5, %v4160_v13  ;;  %v4283_v32 = vpack.i.b16 %v4279_v18, %v4279_v18  ;;  %v4304_v35 = vrot.slane %v4731_v19, %v5533_v3  ;;  %v4734_v42 = vpack.i.b16 %v4432_v15, %v4432_v15 }
 0xddc   : > { %v4158_v25 = vsel %vm6319_vm10, %v4134_v2, %v4157_v16  ;;  %4162 = vst [vmem:[%s6166_s20 + $0x8] sm:$0x2] %v4161_v17  ;;  %v4163_v26 = vld [vmem:[%s6166_s20 + $0xc] sm:$0x2]  ;;  %v4297_v33 = vrot.slane %v4281_v12, %v5533_v3  ;;  %v4319_v36 = vsel %vm6341_vm15, %v4290_v27, %v4318_v24  ;;  %v4443_v39 = vunpack.i.h.s16 %v4439_v30 }
 0xddd   : > { %4159 = vst [vmem:[%s6166_s20 + $0x4] sm:$0x2] %v4158_v25  ;;  %v4164_v31 = vsel %vm6319_vm10, %v4148_v10, %v4163_v26  ;;  %v4311_v37 = vrot.slane %v4283_v32, %v5533_v3  ;;  %4320 = vst [vmem:[%s6166_s20] sm:$0x4] %v4319_v36  ;;  %v4325_v38 = vsel %vm6341_vm15, %v4304_v35, %v4324_v29 }
 0xdde   : > { %4165 = vst [vmem:[%s6166_s20 + $0xc] sm:$0x2] %v4164_v31  ;;  %v4322_v56 = vsel %vm6341_vm15, %v4297_v33, %v4321_v28  ;;  %4326 = vst [vmem:[%s6166_s20 + $0x8] sm:$0x4] %v4325_v38  ;;  %v4445_v7 = vpack.i.b16 %v4441_v23, %v4441_v23  ;;  %v4735_v43 = vpack.i.b16 %v4439_v30, %v4439_v30 }
 0xddf   : > { %4323 = vst [vmem:[%s6166_s20 + $0x4] sm:$0x4] %v4322_v56  ;;  %v4328_v41 = vsel %vm6341_vm15, %v4311_v37, %v4327_v34  ;;  %v4447_v44 = vpack.i.b16 %v4443_v39, %v4443_v39  ;;  %v4454_v22 = vrot.slane %v4734_v42, %v5533_v3 }
 0xde0   : > { %4329 = vst [vmem:[%s6166_s20 + $0xc] sm:$0x4] %v4328_v41  ;;  %v4461_v45 = vrot.slane %v4445_v7, %v5533_v3  ;;  %v4468_v46 = vrot.slane %v4735_v43, %v5533_v3 }
 0xde1   : > { %v4475_v52 = vrot.slane %v4447_v44, %v5533_v3 }
 0xde4   : > { %v4481_v47 = vld [vmem:[%s6166_s20] sm:$0x4] }
 0xde5   : > { %v4482_v48 = vsel %vm4480_vm11, %v4454_v22, %v4481_v47  ;;  %v4487_v51 = vld [vmem:[%s6166_s20 + $0x8] sm:$0x4] }
 0xde6   : > { %v4484_v49 = vld [vmem:[%s6166_s20 + $0x4] sm:$0x4]  ;;  %4483 = vst [vmem:[%s6166_s20] sm:$0x4] %v4482_v48  ;;  %v4488_v55 = vsel %vm4480_vm11, %v4468_v46, %v4487_v51 }
 0xde7   : > { %v4485_v53 = vsel %vm4480_vm11, %v4461_v45, %v4484_v49  ;;  %4489 = vst [vmem:[%s6166_s20 + $0x8] sm:$0x4] %v4488_v55  ;;  %v4490_v54 = vld [vmem:[%s6166_s20 + $0xc] sm:$0x4] }
 0xde8   : > { %4486 = vst [vmem:[%s6166_s20 + $0x4] sm:$0x4] %v4485_v53  ;;  %v4491_v21 = vsel %vm4480_vm11, %v4475_v52, %v4490_v54 }
 0xde9   : > { %4492 = vst [vmem:[%s6166_s20 + $0xc] sm:$0x4] %v4491_v21 }
 0xdea PF: > { %p5177_p4 = scmp.ge.s32.totalorder %s5316_s29, 2  ;;  %s4531_s11 = sand.u32 1, %s5296_s24  }
 0xdeb   : > { %s4532_s19 = scalar_lea.sflag [#allocation3], %s4531_s11 }
 0xdec   : > { %p5174_p0 = pnand %p5177_p4, %p5413_p8 }
 0xdee   : > { %p5175_p1 = pneg %p5174_p0 }
 0xdf0   : > { %5291 = dma.done.wait (%p5175_p1), %s4532_s19, 256  }
 0xdf1   : > { %5293 = vsyncadd (%p5175_p1), %s4532_s19, 4294967040  ;;  %s21_s29 = sadd.s32 1, %s5316_s29   ;;  %s6446_s24 = smov %s5300_s25 }
 0xdf2   : > { %p18_p2 = scmp.ge.s32.totalorder %s21_s29, 4   ;;  %s6447_s25 = smov %s5304_s26 }
 0xdf3   : > { %s6448_s26 = smov %s5419_s14  ;;  %s6449_s27 = smov %s5312_s28 }
 0xdf4   : > { %s6450_s28 = smov %s6452_s9  ;;  %20 = sbr.rel (!%p18_p2) target bundleno = 4 (0x4), region = 100 }
 0xdf9   :  { %4545 = vsyncpa [#allocation3], 1 }
 0xdfa   :  { %4547 = vsyncpa [#allocation3 + $0x1], 1 }

</bundles_post_ra>
